<compile_context>
chip_gen: v7x
topology: tpu7x:2x2x1
jax: 0.10.0
libtpu: 0.0.40
codegen_flags: <defaults>
</compile_context>

<pallas_src>
import functools

import jax
import jax.numpy as jnp
from jax.experimental import pallas as pl
from jax.experimental.pallas import tpu as pltpu

EPS = 1e-3  # BatchNorm2d eps


def bn_conv_kernel(gamma_ref, beta_ref, x_ref, w_ref, o_ref, *, p_true, p_pad):
    # ---- BatchNorm2d with batch statistics, recomputed per step (cheap, no scratch) ----
    x = x_ref[...]                                      # [P_pad, C_in] f32, zero-padded rows
    inv_p = 1.0 / p_true
    mean = jnp.sum(x, axis=0, keepdims=True) * inv_p    # [1, C_in] (padded rows are zero)
    diff = x - mean                                     # padded rows become -mean
    ssq = jnp.sum(diff * diff, axis=0, keepdims=True)   # includes (p_pad-p)*mean^2 from pad
    # exact correction for the zero-padded rows; biased variance over the TRUE P
    var = (ssq - (p_pad - p_true) * (mean * mean)) * inv_p
    inv = jax.lax.rsqrt(var + EPS)                      # EUP
    scale = gamma_ref[...] * inv                        # [1, C_in]
    shift = beta_ref[...] - mean * scale                # [1, C_in]
    xn = (x * scale + shift).astype(jnp.bfloat16)       # [P_pad, C_in]

    # ---- 1x1 conv == lane-dense MXU matmul: [P_pad, C_in] @ [C_in, tile_cout] ----
    o_ref[...] = jnp.dot(xn, w_ref[...], preferred_element_type=jnp.float32)


@functools.partial(jax.jit, static_argnames=("tile_cout",))
def batchnorm_conv2d(x_nchw, gamma, beta, weight, *, tile_cout=1536):
    n, c_in, h, w = x_nchw.shape
    c_out = weight.shape[0]
    p = n * h * w
    p_pad = ((p + 15) // 16) * 16  # multiple of 16: even bf16 sublane tiling for the MXU

    # Glue: NCHW -> [P, C_in] (channels on lanes), zero-pad P on the sublane axis.
    # Fused into this jit; padded rows are corrected out of BN stats and sliced off below.
    x2d = x_nchw.transpose(0, 2, 3, 1).reshape(p, c_in).astype(jnp.float32)
    x2d = jnp.pad(x2d, ((0, p_pad - p), (0, 0)))

    # 1x1 conv weight -> [C_in, C_out], bf16 (halves the dominant HBM traffic).
    w2d = weight.reshape(c_out, c_in).T.astype(jnp.bfloat16)

    gamma2d = gamma.reshape(1, c_in).astype(jnp.float32)
    beta2d = beta.reshape(1, c_in).astype(jnp.float32)

    assert c_out % tile_cout == 0
    num_steps = c_out // tile_cout  # 2: amortizes per-step overhead, keeps v7x megacore

    cost = pl.CostEstimate(
        flops=2 * c_out * c_in * p,
        transcendentals=c_in * num_steps,
        bytes_accessed=c_in * c_out * 2 + p_pad * c_in * 4 + p_pad * c_out * 4,
    )

    out2d = pl.pallas_call(
        functools.partial(bn_conv_kernel, p_true=float(p), p_pad=float(p_pad)),
        out_shape=jax.ShapeDtypeStruct((p_pad, c_out), jnp.float32),
        grid_spec=pltpu.PrefetchScalarGridSpec(
            num_scalar_prefetch=0,
            grid=(num_steps,),
            in_specs=[
                pl.BlockSpec((1, c_in), lambda j: (0, 0)),            # gamma [1, C_in]
                pl.BlockSpec((1, c_in), lambda j: (0, 0)),            # beta  [1, C_in]
                pl.BlockSpec((p_pad, c_in), lambda j: (0, 0)),        # x     (resident)
                pl.BlockSpec((c_in, tile_cout), lambda j: (0, j)),    # weight tile (bf16)
            ],
            out_specs=pl.BlockSpec((p_pad, tile_cout), lambda j: (0, j)),
        ),
        compiler_params=pltpu.CompilerParams(
            dimension_semantics=("parallel",)),
        cost_estimate=cost,
    )(gamma2d, beta2d, x2d, w2d)

    # [P_pad, C_out] -> drop padded rows -> [N, C_out, H, W] (module's NCHW output layout)
    return out2d[:p].reshape(n, h, w, c_out).transpose(0, 3, 1, 2)


if __name__ == "__main__":
    key = jax.random.PRNGKey(0)
    kx, kg, kb, kw = jax.random.split(key, 4)

    # Shapes implied by the module's forward: x [1, 512, 7, 7], 1x1 conv 512 -> 3072
    N, C_IN, H, W = 1, 512, 7, 7
    C_OUT = 3072

    x = jax.random.normal(kx, (N, C_IN, H, W), jnp.float32)
    gamma = 1.0 + 0.1 * jax.random.normal(kg, (C_IN,), jnp.float32)
    beta = 0.1 * jax.random.normal(kb, (C_IN,), jnp.float32)
    weight = 0.02 * jax.random.normal(kw, (C_OUT, C_IN, 1, 1), jnp.float32)

    out = jax.block_until_ready(batchnorm_conv2d(x, gamma, beta, weight))
    assert out.shape == (N, C_OUT, H, W)

    # Pure-JAX reference (training-mode BN + 1x1 conv), f32
    mean = x.mean(axis=(0, 2, 3), keepdims=True)
    var = ((x - mean) ** 2).mean(axis=(0, 2, 3), keepdims=True)
    xn = (x - mean) / jnp.sqrt(var + EPS) * gamma[None, :, None, None] \
         + beta[None, :, None, None]
    ref = jnp.einsum('oc,nchw->nohw', weight[:, :, 0, 0], xn)

    assert jnp.allclose(out, ref, atol=1e-2, rtol=1e-2), \
        float(jnp.max(jnp.abs(out - ref)))
    print("KERNEL_OK")
</pallas_src>

<mosaic_0001>
module attributes {stable_mosaic.version = 11 : i64} {
  func.func @bn_conv_kernel(%arg0: i32, %arg1: memref<1x512xf32, #tpu.memory_space<vmem>>, %arg2: memref<1x512xf32, #tpu.memory_space<vmem>>, %arg3: memref<64x512xf32, #tpu.memory_space<vmem>>, %arg4: memref<512x1536xbf16, #tpu.memory_space<vmem>>, %arg5: memref<64x1536xf32, #tpu.memory_space<vmem>>) attributes {dimension_semantics = [#tpu.dimension_semantics<parallel>], iteration_bounds = array<i64: 2>, scalar_prefetch = 0 : i64, scratch_operands = 0 : i64, tpu.core_type = #tpu.core_type<tc>, window_params = [{pipeline_mode = #tpu.pipeline_mode<synchronous>, transform_indices = @transform_0, window_bounds = array<i64: 1, 512>}, {pipeline_mode = #tpu.pipeline_mode<synchronous>, transform_indices = @transform_1, window_bounds = array<i64: 1, 512>}, {pipeline_mode = #tpu.pipeline_mode<synchronous>, transform_indices = @transform_2, window_bounds = array<i64: 64, 512>}, {transform_indices = @transform_3, window_bounds = array<i64: 512, 1536>}, {transform_indices = @transform_4, window_bounds = array<i64: 64, 1536>}]} {
    %c0 = arith.constant 0 : index
    %c0_0 = arith.constant 0 : index
    %0 = vector.load %arg3[%c0, %c0_0] : memref<64x512xf32, #tpu.memory_space<vmem>>, vector<64x512xf32>
    %cst = arith.constant dense<0.000000e+00> : vector<512xf32>
    %1 = vector.multi_reduction <add>, %0, %cst [0] : vector<64x512xf32> to vector<512xf32>
    %2 = vector.shape_cast %1 : vector<512xf32> to vector<1x512xf32>
    %cst_1 = arith.constant 0.0204081628 : f32
    %3 = vector.broadcast %cst_1 : f32 to vector<1x512xf32>
    %4 = arith.mulf %2, %3 : vector<1x512xf32>
    %5 = vector.broadcast %4 : vector<1x512xf32> to vector<64x512xf32>
    %6 = arith.subf %0, %5 : vector<64x512xf32>
    %7 = arith.mulf %6, %6 : vector<64x512xf32>
    %cst_2 = arith.constant dense<0.000000e+00> : vector<512xf32>
    %8 = vector.multi_reduction <add>, %7, %cst_2 [0] : vector<64x512xf32> to vector<512xf32>
    %9 = vector.shape_cast %8 : vector<512xf32> to vector<1x512xf32>
    %10 = arith.mulf %4, %4 : vector<1x512xf32>
    %cst_3 = arith.constant 1.500000e+01 : f32
    %11 = vector.broadcast %cst_3 : f32 to vector<1x512xf32>
    %12 = arith.mulf %11, %10 : vector<1x512xf32>
    %13 = arith.subf %9, %12 : vector<1x512xf32>
    %cst_4 = arith.constant 0.0204081628 : f32
    %14 = vector.broadcast %cst_4 : f32 to vector<1x512xf32>
    %15 = arith.mulf %13, %14 : vector<1x512xf32>
    %cst_5 = arith.constant 1.000000e-03 : f32
    %16 = vector.broadcast %cst_5 : f32 to vector<1x512xf32>
    %17 = arith.addf %15, %16 : vector<1x512xf32>
    %18 = math.rsqrt %17 : vector<1x512xf32>
    %c0_6 = arith.constant 0 : index
    %c0_7 = arith.constant 0 : index
    %19 = vector.load %arg1[%c0_6, %c0_7] : memref<1x512xf32, #tpu.memory_space<vmem>>, vector<1x512xf32>
    %20 = arith.mulf %19, %18 : vector<1x512xf32>
    %c0_8 = arith.constant 0 : index
    %c0_9 = arith.constant 0 : index
    %21 = vector.load %arg2[%c0_8, %c0_9] : memref<1x512xf32, #tpu.memory_space<vmem>>, vector<1x512xf32>
    %22 = arith.mulf %4, %20 : vector<1x512xf32>
    %23 = arith.subf %21, %22 : vector<1x512xf32>
    %24 = vector.broadcast %20 : vector<1x512xf32> to vector<64x512xf32>
    %25 = arith.mulf %0, %24 : vector<64x512xf32>
    %26 = vector.broadcast %23 : vector<1x512xf32> to vector<64x512xf32>
    %27 = arith.addf %25, %26 : vector<64x512xf32>
    %28 = arith.truncf %27 : vector<64x512xf32> to vector<64x512xbf16>
    %c0_10 = arith.constant 0 : index
    %c0_11 = arith.constant 0 : index
    %29 = vector.load %arg4[%c0_10, %c0_11] : memref<512x1536xbf16, #tpu.memory_space<vmem>>, vector<512x1536xbf16>
    %cst_12 = arith.constant dense<0.000000e+00> : vector<64x1536xf32>
    %30 = tpu.matmul %28, %29, %cst_12 {dimension_numbers = #tpu.dot_dimension_numbers<[1], [0], [0], [1], [0, 0, 1, 1], [], []>} : vector<64x512xbf16>, vector<512x1536xbf16>, vector<64x1536xf32> -> vector<64x1536xf32>
    %c0_13 = arith.constant 0 : index
    %c0_14 = arith.constant 0 : index
    %31 = vector.load %arg5[%c0_13, %c0_14] : memref<64x1536xf32, #tpu.memory_space<vmem>>, vector<64x1536xf32>
    tpu.vector_store %arg5[%c0_13, %c0_14], %30 {strides = array<i32>} : memref<64x1536xf32, #tpu.memory_space<vmem>>, vector<64x1536xf32>,
    return
  }
  func.func @transform_0(%arg0: i32) -> (i32, i32) {
    %c0_i32 = arith.constant 0 : i32
    %c0_i32_0 = arith.constant 0 : i32
    %c0_i32_1 = arith.constant 0 : i32
    return %c0_i32, %c0_i32_0 : i32, i32
  }
  func.func @transform_1(%arg0: i32) -> (i32, i32) {
    %c0_i32 = arith.constant 0 : i32
    %c0_i32_0 = arith.constant 0 : i32
    %c0_i32_1 = arith.constant 0 : i32
    return %c0_i32, %c0_i32_0 : i32, i32
  }
  func.func @transform_2(%arg0: i32) -> (i32, i32) {
    %c0_i32 = arith.constant 0 : i32
    %c0_i32_0 = arith.constant 0 : i32
    %c0_i32_1 = arith.constant 0 : i32
    return %c0_i32, %c0_i32_0 : i32, i32
  }
  func.func @transform_3(%arg0: i32) -> (i32, i32) {
    %c0_i32 = arith.constant 0 : i32
    %c0_i32_0 = arith.constant 0 : i32
    return %c0_i32, %arg0 : i32, i32
  }
  func.func @transform_4(%arg0: i32) -> (i32, i32) {
    %c0_i32 = arith.constant 0 : i32
    %c0_i32_0 = arith.constant 0 : i32
    return %c0_i32, %arg0 : i32, i32
  }
}

</mosaic_0001>

<bundles_post_ra>
// kernel: batchnorm_conv2d.1
= control target key start
LH: loop header
LB: loop body
LE: loop exit
PB: predicated region body
PF: predicated region fallthrough
CT: control target
= control target key end

     0   :  { %s6116_s15 = smov 0   ;;  %s6118_s16 = smov 0   ;;  %s8209_s0 = inlined_call_operand.vmem [shape: f32[1,512], index: 0, kind: input, shape index: {}]   ;;  %s8210_s1 = inlined_call_operand.vmem [shape: f32[1,512], index: 1, kind: input, shape index: {}]   ;;  %s8211_s2 = inlined_call_operand.vmem [shape: f32[64,512], index: 2, kind: input, shape index: {}]   ;;  %s8212_s3 = inlined_call_operand.vmem [shape: bf16[512,3072], index: 3, kind: input, shape index: {}]   ;;  %s8213_s4 = inlined_call_operand.vmem [shape: f32[64,3072], index: 4, kind: output, shape index: {}]  }
   0x1   :  { %s6120_s17 = smov 0  }
   0x2 LB: > { %s4945_s18 = sadd.s32 4294967295, %s6088_s17   ;;  %s6133_s19 = sadd.s32 1, %s6088_s17   ;;  %s6088_s17 = sphi %s6120_s17, %s8235_s17   ;;  %s6084_s16 = sphi %s6118_s16, %s8234_s16   ;;  %s6080_s15 = sphi %s6116_s15, %s8233_s15  }
   0x3   : > { %s81_s20 = ssub.s32 %s6088_s17, %s6133_s19  ;;  %s84_s21 = sadd.s32 1, %s6084_s16 }
   0x4   : > { %p82_p0 = scmp.eq.s32.totalorder %s81_s20, 0  ;;  %p91_p1 = scmp.ne.s32.totalorder %s6084_s16, %s6080_s15 }
   0x5   : > { %p92_p2 = scmp.eq.s32.totalorder %s6088_s17, 0  ;;  %p121_p3 = scmp.eq.s32.totalorder %s4945_s18, 1 }
   0x6   : > { %s6144_s22 = scalar_select %p82_p0, %s6084_s16, %s84_s21  }
   0x7   : > { %p93_p4 = por %p92_p2, %p91_p1  ;;  %p6146_p5 = por %p121_p3, %p91_p1 }
   0x8   : > { %p4948_p6 = scmp.ge.s32.totalorder %s6088_s17, 2 }
   0xa   : > { %152 = sbr.rel (%p4948_p6) target bundleno = 214 (0xd6), region = 28 }
  0x11   : > { %155 = sbr.rel (!%p93_p4) target bundleno = 214 (0xd6), region = 32  ;;  %s157_s24 = sand.u32 (%p93_p4), 1, %s6084_s16  }
  0x12   : > { %s5338_s25 = smul.u32 (%p93_p4), 48, %s6088_s17 }
  0x13   : > { %s5436_s26 = smul.u32 (%p93_p4), 3072, %s157_s24 }
  0x14   : > { %s6156_s29 = scalar_lea.vmem (%p93_p4), %s8212_s3, %s5338_s25 }
  0x15   : > { %v175_v0 = vld [vmem:[%s6156_s29] sm:$0xff] (%p93_p4)  ;;  %v177_v1 = vld [vmem:[%s6156_s29 + $0x8] sm:$0xff] (%p93_p4)  ;;  %v179_v2 = vld [vmem:[%s6156_s29 + $0x10] sm:$0xff] (%p93_p4)  ;;  %s6161_s30 = scalar_lea.vmem (%p93_p4), [#allocation2], %s5436_s26 }
  0x16   : > { %176 = vst [vmem:[%s6161_s30] sm:$0xff] (%p93_p4), %v175_v0  ;;  %178 = vst [vmem:[%s6161_s30 + $0x8] sm:$0xff] (%p93_p4), %v177_v1  ;;  %v181_v3 = vld [vmem:[%s6156_s29 + $0x18] sm:$0xff] (%p93_p4)  ;;  %v183_v4 = vld [vmem:[%s6156_s29 + $0x20] sm:$0xff] (%p93_p4) }
  0x17   : > { %180 = vst [vmem:[%s6161_s30 + $0x10] sm:$0xff] (%p93_p4), %v179_v2  ;;  %v185_v5 = vld [vmem:[%s6156_s29 + $0x28] sm:$0xff] (%p93_p4)  ;;  %182 = vst [vmem:[%s6161_s30 + $0x18] sm:$0xff] (%p93_p4), %v181_v3  ;;  %v187_v6 = vld [vmem:[%s6156_s29 + $0x60] sm:$0xff] (%p93_p4) }
  0x18   : > { %184 = vst [vmem:[%s6161_s30 + $0x20] sm:$0xff] %v183_v4  ;;  %186 = vst [vmem:[%s6161_s30 + $0x28] sm:$0xff] %v185_v5  ;;  %v189_v7 = vld [vmem:[%s6156_s29 + $0x68] sm:$0xff]  ;;  %v191_v8 = vld [vmem:[%s6156_s29 + $0x70] sm:$0xff] }
  0x19   : > { %188 = vst [vmem:[%s6161_s30 + $0x30] sm:$0xff] %v187_v6  ;;  %190 = vst [vmem:[%s6161_s30 + $0x38] sm:$0xff] %v189_v7  ;;  %v193_v9 = vld [vmem:[%s6156_s29 + $0x78] sm:$0xff]  ;;  %v195_v10 = vld [vmem:[%s6156_s29 + $0x80] sm:$0xff] }
  0x1a   : > { %192 = vst [vmem:[%s6161_s30 + $0x40] sm:$0xff] %v191_v8  ;;  %v197_v11 = vld [vmem:[%s6156_s29 + $0x88] sm:$0xff]  ;;  %194 = vst [vmem:[%s6161_s30 + $0x48] sm:$0xff] %v193_v9  ;;  %v199_v12 = vld [vmem:[%s6156_s29 + $0xc0] sm:$0xff] }
  0x1b   : > { %196 = vst [vmem:[%s6161_s30 + $0x50] sm:$0xff] %v195_v10  ;;  %198 = vst [vmem:[%s6161_s30 + $0x58] sm:$0xff] %v197_v11  ;;  %v201_v13 = vld [vmem:[%s6156_s29 + $0xc8] sm:$0xff]  ;;  %v203_v14 = vld [vmem:[%s6156_s29 + $0xd0] sm:$0xff] }
  0x1c   : > { %200 = vst [vmem:[%s6161_s30 + $0x60] sm:$0xff] %v199_v12  ;;  %202 = vst [vmem:[%s6161_s30 + $0x68] sm:$0xff] %v201_v13  ;;  %v205_v15 = vld [vmem:[%s6156_s29 + $0xd8] sm:$0xff]  ;;  %v207_v16 = vld [vmem:[%s6156_s29 + $0xe0] sm:$0xff] }
  0x1d   : > { %204 = vst [vmem:[%s6161_s30 + $0x70] sm:$0xff] %v203_v14  ;;  %v209_v17 = vld [vmem:[%s6156_s29 + $0xe8] sm:$0xff]  ;;  %206 = vst [vmem:[%s6161_s30 + $0x78] sm:$0xff] %v205_v15  ;;  %v211_v18 = vld [vmem:[%s6156_s29 + $0x120] sm:$0xff] }
  0x1e   : > { %208 = vst [vmem:[%s6161_s30 + $0x80] sm:$0xff] %v207_v16  ;;  %210 = vst [vmem:[%s6161_s30 + $0x88] sm:$0xff] %v209_v17  ;;  %v213_v19 = vld [vmem:[%s6156_s29 + $0x128] sm:$0xff]  ;;  %v215_v20 = vld [vmem:[%s6156_s29 + $0x130] sm:$0xff] }
  0x1f   : > { %212 = vst [vmem:[%s6161_s30 + $0x90] sm:$0xff] %v211_v18  ;;  %214 = vst [vmem:[%s6161_s30 + $0x98] sm:$0xff] %v213_v19  ;;  %v217_v21 = vld [vmem:[%s6156_s29 + $0x138] sm:$0xff]  ;;  %v219_v22 = vld [vmem:[%s6156_s29 + $0x140] sm:$0xff] }
  0x20   : > { %216 = vst [vmem:[%s6161_s30 + $0xa0] sm:$0xff] %v215_v20  ;;  %v221_v23 = vld [vmem:[%s6156_s29 + $0x148] sm:$0xff]  ;;  %218 = vst [vmem:[%s6161_s30 + $0xa8] sm:$0xff] %v217_v21  ;;  %v223_v24 = vld [vmem:[%s6156_s29 + $0x180] sm:$0xff] }
  0x21   : > { %220 = vst [vmem:[%s6161_s30 + $0xb0] sm:$0xff] %v219_v22  ;;  %222 = vst [vmem:[%s6161_s30 + $0xb8] sm:$0xff] %v221_v23  ;;  %v225_v25 = vld [vmem:[%s6156_s29 + $0x188] sm:$0xff]  ;;  %v227_v26 = vld [vmem:[%s6156_s29 + $0x190] sm:$0xff] }
  0x22   : > { %224 = vst [vmem:[%s6161_s30 + $0xc0] sm:$0xff] %v223_v24  ;;  %226 = vst [vmem:[%s6161_s30 + $0xc8] sm:$0xff] %v225_v25  ;;  %v229_v27 = vld [vmem:[%s6156_s29 + $0x198] sm:$0xff]  ;;  %v231_v28 = vld [vmem:[%s6156_s29 + $0x1a0] sm:$0xff] }
  0x23   : > { %228 = vst [vmem:[%s6161_s30 + $0xd0] sm:$0xff] %v227_v26  ;;  %v233_v29 = vld [vmem:[%s6156_s29 + $0x1a8] sm:$0xff]  ;;  %230 = vst [vmem:[%s6161_s30 + $0xd8] sm:$0xff] %v229_v27  ;;  %v235_v30 = vld [vmem:[%s6156_s29 + $0x1e0] sm:$0xff] }
  0x24   : > { %232 = vst [vmem:[%s6161_s30 + $0xe0] sm:$0xff] %v231_v28  ;;  %234 = vst [vmem:[%s6161_s30 + $0xe8] sm:$0xff] %v233_v29  ;;  %v237_v31 = vld [vmem:[%s6156_s29 + $0x1e8] sm:$0xff]  ;;  %v239_v32 = vld [vmem:[%s6156_s29 + $0x1f0] sm:$0xff] }
  0x25   : > { %236 = vst [vmem:[%s6161_s30 + $0xf0] sm:$0xff] %v235_v30  ;;  %238 = vst [vmem:[%s6161_s30 + $0xf8] sm:$0xff] %v237_v31  ;;  %v241_v33 = vld [vmem:[%s6156_s29 + $0x1f8] sm:$0xff]  ;;  %v243_v34 = vld [vmem:[%s6156_s29 + $0x200] sm:$0xff] }
  0x26   : > { %240 = vst [vmem:[%s6161_s30 + $0x100] sm:$0xff] %v239_v32  ;;  %v245_v35 = vld [vmem:[%s6156_s29 + $0x208] sm:$0xff]  ;;  %242 = vst [vmem:[%s6161_s30 + $0x108] sm:$0xff] %v241_v33  ;;  %v247_v36 = vld [vmem:[%s6156_s29 + $0x240] sm:$0xff] }
  0x27   : > { %244 = vst [vmem:[%s6161_s30 + $0x110] sm:$0xff] %v243_v34  ;;  %246 = vst [vmem:[%s6161_s30 + $0x118] sm:$0xff] %v245_v35  ;;  %v249_v37 = vld [vmem:[%s6156_s29 + $0x248] sm:$0xff]  ;;  %v251_v38 = vld [vmem:[%s6156_s29 + $0x250] sm:$0xff] }
  0x28   : > { %248 = vst [vmem:[%s6161_s30 + $0x120] sm:$0xff] %v247_v36  ;;  %250 = vst [vmem:[%s6161_s30 + $0x128] sm:$0xff] %v249_v37  ;;  %v253_v39 = vld [vmem:[%s6156_s29 + $0x258] sm:$0xff]  ;;  %v255_v40 = vld [vmem:[%s6156_s29 + $0x260] sm:$0xff] }
  0x29   : > { %252 = vst [vmem:[%s6161_s30 + $0x130] sm:$0xff] %v251_v38  ;;  %v257_v41 = vld [vmem:[%s6156_s29 + $0x268] sm:$0xff]  ;;  %254 = vst [vmem:[%s6161_s30 + $0x138] sm:$0xff] %v253_v39  ;;  %v259_v42 = vld [vmem:[%s6156_s29 + $0x2a0] sm:$0xff] }
  0x2a   : > { %256 = vst [vmem:[%s6161_s30 + $0x140] sm:$0xff] %v255_v40  ;;  %258 = vst [vmem:[%s6161_s30 + $0x148] sm:$0xff] %v257_v41  ;;  %v261_v43 = vld [vmem:[%s6156_s29 + $0x2a8] sm:$0xff]  ;;  %v263_v44 = vld [vmem:[%s6156_s29 + $0x2b0] sm:$0xff] }
  0x2b   : > { %260 = vst [vmem:[%s6161_s30 + $0x150] sm:$0xff] %v259_v42  ;;  %262 = vst [vmem:[%s6161_s30 + $0x158] sm:$0xff] %v261_v43  ;;  %v265_v45 = vld [vmem:[%s6156_s29 + $0x2b8] sm:$0xff]  ;;  %v267_v46 = vld [vmem:[%s6156_s29 + $0x2c0] sm:$0xff] }
  0x2c   : > { %264 = vst [vmem:[%s6161_s30 + $0x160] sm:$0xff] %v263_v44  ;;  %v269_v47 = vld [vmem:[%s6156_s29 + $0x2c8] sm:$0xff]  ;;  %266 = vst [vmem:[%s6161_s30 + $0x168] sm:$0xff] %v265_v45  ;;  %v271_v48 = vld [vmem:[%s6156_s29 + $0x300] sm:$0xff] }
  0x2d   : > { %268 = vst [vmem:[%s6161_s30 + $0x170] sm:$0xff] %v267_v46  ;;  %270 = vst [vmem:[%s6161_s30 + $0x178] sm:$0xff] %v269_v47  ;;  %v273_v49 = vld [vmem:[%s6156_s29 + $0x308] sm:$0xff]  ;;  %v275_v50 = vld [vmem:[%s6156_s29 + $0x310] sm:$0xff] }
  0x2e   : > { %272 = vst [vmem:[%s6161_s30 + $0x180] sm:$0xff] %v271_v48  ;;  %274 = vst [vmem:[%s6161_s30 + $0x188] sm:$0xff] %v273_v49  ;;  %v277_v51 = vld [vmem:[%s6156_s29 + $0x318] sm:$0xff]  ;;  %v279_v52 = vld [vmem:[%s6156_s29 + $0x320] sm:$0xff] }
  0x2f   : > { %276 = vst [vmem:[%s6161_s30 + $0x190] sm:$0xff] %v275_v50  ;;  %v281_v53 = vld [vmem:[%s6156_s29 + $0x328] sm:$0xff]  ;;  %278 = vst [vmem:[%s6161_s30 + $0x198] sm:$0xff] %v277_v51  ;;  %v283_v54 = vld [vmem:[%s6156_s29 + $0x360] sm:$0xff] }
  0x30   : > { %280 = vst [vmem:[%s6161_s30 + $0x1a0] sm:$0xff] %v279_v52  ;;  %282 = vst [vmem:[%s6161_s30 + $0x1a8] sm:$0xff] %v281_v53  ;;  %v285_v55 = vld [vmem:[%s6156_s29 + $0x368] sm:$0xff]  ;;  %v287_v56 = vld [vmem:[%s6156_s29 + $0x370] sm:$0xff] }
  0x31   : > { %284 = vst [vmem:[%s6161_s30 + $0x1b0] sm:$0xff] %v283_v54  ;;  %286 = vst [vmem:[%s6161_s30 + $0x1b8] sm:$0xff] %v285_v55  ;;  %v289_v57 = vld [vmem:[%s6156_s29 + $0x378] sm:$0xff]  ;;  %v291_v58 = vld [vmem:[%s6156_s29 + $0x380] sm:$0xff] }
  0x32   : > { %288 = vst [vmem:[%s6161_s30 + $0x1c0] sm:$0xff] %v287_v56  ;;  %v293_v59 = vld [vmem:[%s6156_s29 + $0x388] sm:$0xff]  ;;  %290 = vst [vmem:[%s6161_s30 + $0x1c8] sm:$0xff] %v289_v57  ;;  %v295_v60 = vld [vmem:[%s6156_s29 + $0x3c0] sm:$0xff] }
  0x33   : > { %292 = vst [vmem:[%s6161_s30 + $0x1d0] sm:$0xff] %v291_v58  ;;  %294 = vst [vmem:[%s6161_s30 + $0x1d8] sm:$0xff] %v293_v59  ;;  %v297_v61 = vld [vmem:[%s6156_s29 + $0x3c8] sm:$0xff]  ;;  %v299_v62 = vld [vmem:[%s6156_s29 + $0x3d0] sm:$0xff] }
  0x34   : > { %296 = vst [vmem:[%s6161_s30 + $0x1e0] sm:$0xff] %v295_v60  ;;  %298 = vst [vmem:[%s6161_s30 + $0x1e8] sm:$0xff] %v297_v61  ;;  %v301_v63 = vld [vmem:[%s6156_s29 + $0x3d8] sm:$0xff]  ;;  %v303_v0 = vld [vmem:[%s6156_s29 + $0x3e0] sm:$0xff] }
  0x35   : > { %300 = vst [vmem:[%s6161_s30 + $0x1f0] sm:$0xff] %v299_v62  ;;  %v305_v1 = vld [vmem:[%s6156_s29 + $0x3e8] sm:$0xff]  ;;  %302 = vst [vmem:[%s6161_s30 + $0x1f8] sm:$0xff] %v301_v63  ;;  %v307_v2 = vld [vmem:[%s6156_s29 + $0x420] sm:$0xff] }
  0x36   : > { %304 = vst [vmem:[%s6161_s30 + $0x200] sm:$0xff] %v303_v0  ;;  %306 = vst [vmem:[%s6161_s30 + $0x208] sm:$0xff] %v305_v1  ;;  %v309_v3 = vld [vmem:[%s6156_s29 + $0x428] sm:$0xff]  ;;  %v311_v4 = vld [vmem:[%s6156_s29 + $0x430] sm:$0xff] }
  0x37   : > { %308 = vst [vmem:[%s6161_s30 + $0x210] sm:$0xff] %v307_v2  ;;  %310 = vst [vmem:[%s6161_s30 + $0x218] sm:$0xff] %v309_v3  ;;  %v313_v5 = vld [vmem:[%s6156_s29 + $0x438] sm:$0xff]  ;;  %v315_v6 = vld [vmem:[%s6156_s29 + $0x440] sm:$0xff] }
  0x38   : > { %312 = vst [vmem:[%s6161_s30 + $0x220] sm:$0xff] %v311_v4  ;;  %v317_v7 = vld [vmem:[%s6156_s29 + $0x448] sm:$0xff]  ;;  %314 = vst [vmem:[%s6161_s30 + $0x228] sm:$0xff] %v313_v5  ;;  %v319_v8 = vld [vmem:[%s6156_s29 + $0x480] sm:$0xff] }
  0x39   : > { %316 = vst [vmem:[%s6161_s30 + $0x230] sm:$0xff] %v315_v6  ;;  %318 = vst [vmem:[%s6161_s30 + $0x238] sm:$0xff] %v317_v7  ;;  %v321_v9 = vld [vmem:[%s6156_s29 + $0x488] sm:$0xff]  ;;  %v323_v10 = vld [vmem:[%s6156_s29 + $0x490] sm:$0xff] }
  0x3a   : > { %320 = vst [vmem:[%s6161_s30 + $0x240] sm:$0xff] %v319_v8  ;;  %322 = vst [vmem:[%s6161_s30 + $0x248] sm:$0xff] %v321_v9  ;;  %v325_v11 = vld [vmem:[%s6156_s29 + $0x498] sm:$0xff]  ;;  %v327_v12 = vld [vmem:[%s6156_s29 + $0x4a0] sm:$0xff] }
  0x3b   : > { %324 = vst [vmem:[%s6161_s30 + $0x250] sm:$0xff] %v323_v10  ;;  %v329_v13 = vld [vmem:[%s6156_s29 + $0x4a8] sm:$0xff]  ;;  %326 = vst [vmem:[%s6161_s30 + $0x258] sm:$0xff] %v325_v11  ;;  %v331_v14 = vld [vmem:[%s6156_s29 + $0x4e0] sm:$0xff] }
  0x3c   : > { %328 = vst [vmem:[%s6161_s30 + $0x260] sm:$0xff] %v327_v12  ;;  %330 = vst [vmem:[%s6161_s30 + $0x268] sm:$0xff] %v329_v13  ;;  %v333_v15 = vld [vmem:[%s6156_s29 + $0x4e8] sm:$0xff]  ;;  %v335_v16 = vld [vmem:[%s6156_s29 + $0x4f0] sm:$0xff] }
  0x3d   : > { %332 = vst [vmem:[%s6161_s30 + $0x270] sm:$0xff] %v331_v14  ;;  %334 = vst [vmem:[%s6161_s30 + $0x278] sm:$0xff] %v333_v15  ;;  %v337_v17 = vld [vmem:[%s6156_s29 + $0x4f8] sm:$0xff]  ;;  %v339_v18 = vld [vmem:[%s6156_s29 + $0x500] sm:$0xff] }
  0x3e   : > { %336 = vst [vmem:[%s6161_s30 + $0x280] sm:$0xff] %v335_v16  ;;  %v341_v19 = vld [vmem:[%s6156_s29 + $0x508] sm:$0xff]  ;;  %338 = vst [vmem:[%s6161_s30 + $0x288] sm:$0xff] %v337_v17  ;;  %v343_v20 = vld [vmem:[%s6156_s29 + $0x540] sm:$0xff] }
  0x3f   : > { %340 = vst [vmem:[%s6161_s30 + $0x290] sm:$0xff] %v339_v18  ;;  %342 = vst [vmem:[%s6161_s30 + $0x298] sm:$0xff] %v341_v19  ;;  %v345_v21 = vld [vmem:[%s6156_s29 + $0x548] sm:$0xff]  ;;  %v347_v22 = vld [vmem:[%s6156_s29 + $0x550] sm:$0xff] }
  0x40   : > { %344 = vst [vmem:[%s6161_s30 + $0x2a0] sm:$0xff] %v343_v20  ;;  %346 = vst [vmem:[%s6161_s30 + $0x2a8] sm:$0xff] %v345_v21  ;;  %v349_v23 = vld [vmem:[%s6156_s29 + $0x558] sm:$0xff]  ;;  %v351_v24 = vld [vmem:[%s6156_s29 + $0x560] sm:$0xff] }
  0x41   : > { %348 = vst [vmem:[%s6161_s30 + $0x2b0] sm:$0xff] %v347_v22  ;;  %v353_v25 = vld [vmem:[%s6156_s29 + $0x568] sm:$0xff]  ;;  %350 = vst [vmem:[%s6161_s30 + $0x2b8] sm:$0xff] %v349_v23  ;;  %v355_v26 = vld [vmem:[%s6156_s29 + $0x5a0] sm:$0xff] }
  0x42   : > { %352 = vst [vmem:[%s6161_s30 + $0x2c0] sm:$0xff] %v351_v24  ;;  %354 = vst [vmem:[%s6161_s30 + $0x2c8] sm:$0xff] %v353_v25  ;;  %v357_v27 = vld [vmem:[%s6156_s29 + $0x5a8] sm:$0xff]  ;;  %v359_v28 = vld [vmem:[%s6156_s29 + $0x5b0] sm:$0xff] }
  0x43   : > { %356 = vst [vmem:[%s6161_s30 + $0x2d0] sm:$0xff] %v355_v26  ;;  %358 = vst [vmem:[%s6161_s30 + $0x2d8] sm:$0xff] %v357_v27  ;;  %v361_v29 = vld [vmem:[%s6156_s29 + $0x5b8] sm:$0xff]  ;;  %v363_v30 = vld [vmem:[%s6156_s29 + $0x5c0] sm:$0xff] }
  0x44   : > { %360 = vst [vmem:[%s6161_s30 + $0x2e0] sm:$0xff] %v359_v28  ;;  %v365_v31 = vld [vmem:[%s6156_s29 + $0x5c8] sm:$0xff]  ;;  %362 = vst [vmem:[%s6161_s30 + $0x2e8] sm:$0xff] %v361_v29  ;;  %v367_v32 = vld [vmem:[%s6156_s29 + $0x600] sm:$0xff] }
  0x45   : > { %364 = vst [vmem:[%s6161_s30 + $0x2f0] sm:$0xff] %v363_v30  ;;  %366 = vst [vmem:[%s6161_s30 + $0x2f8] sm:$0xff] %v365_v31  ;;  %v369_v33 = vld [vmem:[%s6156_s29 + $0x608] sm:$0xff]  ;;  %v371_v34 = vld [vmem:[%s6156_s29 + $0x610] sm:$0xff] }
  0x46   : > { %368 = vst [vmem:[%s6161_s30 + $0x300] sm:$0xff] %v367_v32  ;;  %370 = vst [vmem:[%s6161_s30 + $0x308] sm:$0xff] %v369_v33  ;;  %v373_v35 = vld [vmem:[%s6156_s29 + $0x618] sm:$0xff]  ;;  %v375_v36 = vld [vmem:[%s6156_s29 + $0x620] sm:$0xff] }
  0x47   : > { %372 = vst [vmem:[%s6161_s30 + $0x310] sm:$0xff] %v371_v34  ;;  %v377_v37 = vld [vmem:[%s6156_s29 + $0x628] sm:$0xff]  ;;  %374 = vst [vmem:[%s6161_s30 + $0x318] sm:$0xff] %v373_v35  ;;  %v379_v38 = vld [vmem:[%s6156_s29 + $0x660] sm:$0xff] }
  0x48   : > { %376 = vst [vmem:[%s6161_s30 + $0x320] sm:$0xff] %v375_v36  ;;  %378 = vst [vmem:[%s6161_s30 + $0x328] sm:$0xff] %v377_v37  ;;  %v381_v39 = vld [vmem:[%s6156_s29 + $0x668] sm:$0xff]  ;;  %v383_v40 = vld [vmem:[%s6156_s29 + $0x670] sm:$0xff] }
  0x49   : > { %380 = vst [vmem:[%s6161_s30 + $0x330] sm:$0xff] %v379_v38  ;;  %382 = vst [vmem:[%s6161_s30 + $0x338] sm:$0xff] %v381_v39  ;;  %v385_v41 = vld [vmem:[%s6156_s29 + $0x678] sm:$0xff]  ;;  %v387_v42 = vld [vmem:[%s6156_s29 + $0x680] sm:$0xff] }
  0x4a   : > { %384 = vst [vmem:[%s6161_s30 + $0x340] sm:$0xff] %v383_v40  ;;  %v389_v43 = vld [vmem:[%s6156_s29 + $0x688] sm:$0xff]  ;;  %386 = vst [vmem:[%s6161_s30 + $0x348] sm:$0xff] %v385_v41  ;;  %v391_v44 = vld [vmem:[%s6156_s29 + $0x6c0] sm:$0xff] }
  0x4b   : > { %388 = vst [vmem:[%s6161_s30 + $0x350] sm:$0xff] %v387_v42  ;;  %390 = vst [vmem:[%s6161_s30 + $0x358] sm:$0xff] %v389_v43  ;;  %v393_v45 = vld [vmem:[%s6156_s29 + $0x6c8] sm:$0xff]  ;;  %v395_v46 = vld [vmem:[%s6156_s29 + $0x6d0] sm:$0xff] }
  0x4c   : > { %392 = vst [vmem:[%s6161_s30 + $0x360] sm:$0xff] %v391_v44  ;;  %394 = vst [vmem:[%s6161_s30 + $0x368] sm:$0xff] %v393_v45  ;;  %v397_v47 = vld [vmem:[%s6156_s29 + $0x6d8] sm:$0xff]  ;;  %v399_v48 = vld [vmem:[%s6156_s29 + $0x6e0] sm:$0xff] }
  0x4d   : > { %396 = vst [vmem:[%s6161_s30 + $0x370] sm:$0xff] %v395_v46  ;;  %v401_v49 = vld [vmem:[%s6156_s29 + $0x6e8] sm:$0xff]  ;;  %398 = vst [vmem:[%s6161_s30 + $0x378] sm:$0xff] %v397_v47  ;;  %v403_v50 = vld [vmem:[%s6156_s29 + $0x720] sm:$0xff] }
  0x4e   : > { %400 = vst [vmem:[%s6161_s30 + $0x380] sm:$0xff] %v399_v48  ;;  %402 = vst [vmem:[%s6161_s30 + $0x388] sm:$0xff] %v401_v49  ;;  %v405_v51 = vld [vmem:[%s6156_s29 + $0x728] sm:$0xff]  ;;  %v407_v52 = vld [vmem:[%s6156_s29 + $0x730] sm:$0xff] }
  0x4f   : > { %404 = vst [vmem:[%s6161_s30 + $0x390] sm:$0xff] %v403_v50  ;;  %406 = vst [vmem:[%s6161_s30 + $0x398] sm:$0xff] %v405_v51  ;;  %v409_v53 = vld [vmem:[%s6156_s29 + $0x738] sm:$0xff]  ;;  %v411_v54 = vld [vmem:[%s6156_s29 + $0x740] sm:$0xff] }
  0x50   : > { %408 = vst [vmem:[%s6161_s30 + $0x3a0] sm:$0xff] %v407_v52  ;;  %v413_v55 = vld [vmem:[%s6156_s29 + $0x748] sm:$0xff]  ;;  %410 = vst [vmem:[%s6161_s30 + $0x3a8] sm:$0xff] %v409_v53  ;;  %v415_v56 = vld [vmem:[%s6156_s29 + $0x780] sm:$0xff] }
  0x51   : > { %412 = vst [vmem:[%s6161_s30 + $0x3b0] sm:$0xff] %v411_v54  ;;  %414 = vst [vmem:[%s6161_s30 + $0x3b8] sm:$0xff] %v413_v55  ;;  %v417_v57 = vld [vmem:[%s6156_s29 + $0x788] sm:$0xff]  ;;  %v419_v58 = vld [vmem:[%s6156_s29 + $0x790] sm:$0xff] }
  0x52   : > { %416 = vst [vmem:[%s6161_s30 + $0x3c0] sm:$0xff] %v415_v56  ;;  %418 = vst [vmem:[%s6161_s30 + $0x3c8] sm:$0xff] %v417_v57  ;;  %v421_v59 = vld [vmem:[%s6156_s29 + $0x798] sm:$0xff]  ;;  %v423_v60 = vld [vmem:[%s6156_s29 + $0x7a0] sm:$0xff] }
  0x53   : > { %420 = vst [vmem:[%s6161_s30 + $0x3d0] sm:$0xff] %v419_v58  ;;  %v425_v61 = vld [vmem:[%s6156_s29 + $0x7a8] sm:$0xff]  ;;  %422 = vst [vmem:[%s6161_s30 + $0x3d8] sm:$0xff] %v421_v59  ;;  %v427_v62 = vld [vmem:[%s6156_s29 + $0x7e0] sm:$0xff] }
  0x54   : > { %424 = vst [vmem:[%s6161_s30 + $0x3e0] sm:$0xff] %v423_v60  ;;  %426 = vst [vmem:[%s6161_s30 + $0x3e8] sm:$0xff] %v425_v61  ;;  %v429_v63 = vld [vmem:[%s6156_s29 + $0x7e8] sm:$0xff]  ;;  %v431_v0 = vld [vmem:[%s6156_s29 + $0x7f0] sm:$0xff] }
  0x55   : > { %428 = vst [vmem:[%s6161_s30 + $0x3f0] sm:$0xff] %v427_v62  ;;  %430 = vst [vmem:[%s6161_s30 + $0x3f8] sm:$0xff] %v429_v63  ;;  %v433_v1 = vld [vmem:[%s6156_s29 + $0x7f8] sm:$0xff]  ;;  %v435_v2 = vld [vmem:[%s6156_s29 + $0x800] sm:$0xff] }
  0x56   : > { %432 = vst [vmem:[%s6161_s30 + $0x400] sm:$0xff] %v431_v0  ;;  %v437_v3 = vld [vmem:[%s6156_s29 + $0x808] sm:$0xff]  ;;  %434 = vst [vmem:[%s6161_s30 + $0x408] sm:$0xff] %v433_v1  ;;  %v439_v4 = vld [vmem:[%s6156_s29 + $0x840] sm:$0xff] }
  0x57   : > { %436 = vst [vmem:[%s6161_s30 + $0x410] sm:$0xff] %v435_v2  ;;  %438 = vst [vmem:[%s6161_s30 + $0x418] sm:$0xff] %v437_v3  ;;  %v441_v5 = vld [vmem:[%s6156_s29 + $0x848] sm:$0xff]  ;;  %v443_v6 = vld [vmem:[%s6156_s29 + $0x850] sm:$0xff] }
  0x58   : > { %440 = vst [vmem:[%s6161_s30 + $0x420] sm:$0xff] %v439_v4  ;;  %442 = vst [vmem:[%s6161_s30 + $0x428] sm:$0xff] %v441_v5  ;;  %v445_v7 = vld [vmem:[%s6156_s29 + $0x858] sm:$0xff]  ;;  %v447_v8 = vld [vmem:[%s6156_s29 + $0x860] sm:$0xff] }
  0x59   : > { %444 = vst [vmem:[%s6161_s30 + $0x430] sm:$0xff] %v443_v6  ;;  %v449_v9 = vld [vmem:[%s6156_s29 + $0x868] sm:$0xff]  ;;  %446 = vst [vmem:[%s6161_s30 + $0x438] sm:$0xff] %v445_v7  ;;  %v451_v10 = vld [vmem:[%s6156_s29 + $0x8a0] sm:$0xff] }
  0x5a   : > { %448 = vst [vmem:[%s6161_s30 + $0x440] sm:$0xff] %v447_v8  ;;  %450 = vst [vmem:[%s6161_s30 + $0x448] sm:$0xff] %v449_v9  ;;  %v453_v11 = vld [vmem:[%s6156_s29 + $0x8a8] sm:$0xff]  ;;  %v455_v12 = vld [vmem:[%s6156_s29 + $0x8b0] sm:$0xff] }
  0x5b   : > { %452 = vst [vmem:[%s6161_s30 + $0x450] sm:$0xff] %v451_v10  ;;  %454 = vst [vmem:[%s6161_s30 + $0x458] sm:$0xff] %v453_v11  ;;  %v457_v13 = vld [vmem:[%s6156_s29 + $0x8b8] sm:$0xff]  ;;  %v459_v14 = vld [vmem:[%s6156_s29 + $0x8c0] sm:$0xff] }
  0x5c   : > { %456 = vst [vmem:[%s6161_s30 + $0x460] sm:$0xff] %v455_v12  ;;  %v461_v15 = vld [vmem:[%s6156_s29 + $0x8c8] sm:$0xff]  ;;  %458 = vst [vmem:[%s6161_s30 + $0x468] sm:$0xff] %v457_v13  ;;  %v463_v16 = vld [vmem:[%s6156_s29 + $0x900] sm:$0xff] }
  0x5d   : > { %460 = vst [vmem:[%s6161_s30 + $0x470] sm:$0xff] %v459_v14  ;;  %462 = vst [vmem:[%s6161_s30 + $0x478] sm:$0xff] %v461_v15  ;;  %v465_v17 = vld [vmem:[%s6156_s29 + $0x908] sm:$0xff]  ;;  %v467_v18 = vld [vmem:[%s6156_s29 + $0x910] sm:$0xff] }
  0x5e   : > { %464 = vst [vmem:[%s6161_s30 + $0x480] sm:$0xff] %v463_v16  ;;  %466 = vst [vmem:[%s6161_s30 + $0x488] sm:$0xff] %v465_v17  ;;  %v469_v19 = vld [vmem:[%s6156_s29 + $0x918] sm:$0xff]  ;;  %v471_v20 = vld [vmem:[%s6156_s29 + $0x920] sm:$0xff] }
  0x5f   : > { %468 = vst [vmem:[%s6161_s30 + $0x490] sm:$0xff] %v467_v18  ;;  %v473_v21 = vld [vmem:[%s6156_s29 + $0x928] sm:$0xff]  ;;  %470 = vst [vmem:[%s6161_s30 + $0x498] sm:$0xff] %v469_v19  ;;  %v475_v22 = vld [vmem:[%s6156_s29 + $0x960] sm:$0xff] }
  0x60   : > { %472 = vst [vmem:[%s6161_s30 + $0x4a0] sm:$0xff] %v471_v20  ;;  %474 = vst [vmem:[%s6161_s30 + $0x4a8] sm:$0xff] %v473_v21  ;;  %v477_v23 = vld [vmem:[%s6156_s29 + $0x968] sm:$0xff]  ;;  %v479_v24 = vld [vmem:[%s6156_s29 + $0x970] sm:$0xff] }
  0x61   : > { %476 = vst [vmem:[%s6161_s30 + $0x4b0] sm:$0xff] %v475_v22  ;;  %478 = vst [vmem:[%s6161_s30 + $0x4b8] sm:$0xff] %v477_v23  ;;  %v481_v25 = vld [vmem:[%s6156_s29 + $0x978] sm:$0xff]  ;;  %v483_v26 = vld [vmem:[%s6156_s29 + $0x980] sm:$0xff] }
  0x62   : > { %480 = vst [vmem:[%s6161_s30 + $0x4c0] sm:$0xff] %v479_v24  ;;  %v485_v27 = vld [vmem:[%s6156_s29 + $0x988] sm:$0xff]  ;;  %482 = vst [vmem:[%s6161_s30 + $0x4c8] sm:$0xff] %v481_v25  ;;  %v487_v28 = vld [vmem:[%s6156_s29 + $0x9c0] sm:$0xff] }
  0x63   : > { %484 = vst [vmem:[%s6161_s30 + $0x4d0] sm:$0xff] %v483_v26  ;;  %486 = vst [vmem:[%s6161_s30 + $0x4d8] sm:$0xff] %v485_v27  ;;  %v489_v29 = vld [vmem:[%s6156_s29 + $0x9c8] sm:$0xff]  ;;  %v491_v30 = vld [vmem:[%s6156_s29 + $0x9d0] sm:$0xff] }
  0x64   : > { %488 = vst [vmem:[%s6161_s30 + $0x4e0] sm:$0xff] %v487_v28  ;;  %490 = vst [vmem:[%s6161_s30 + $0x4e8] sm:$0xff] %v489_v29  ;;  %v493_v31 = vld [vmem:[%s6156_s29 + $0x9d8] sm:$0xff]  ;;  %v495_v32 = vld [vmem:[%s6156_s29 + $0x9e0] sm:$0xff] }
  0x65   : > { %492 = vst [vmem:[%s6161_s30 + $0x4f0] sm:$0xff] %v491_v30  ;;  %v497_v33 = vld [vmem:[%s6156_s29 + $0x9e8] sm:$0xff]  ;;  %494 = vst [vmem:[%s6161_s30 + $0x4f8] sm:$0xff] %v493_v31  ;;  %v499_v34 = vld [vmem:[%s6156_s29 + $0xa20] sm:$0xff] }
  0x66   : > { %496 = vst [vmem:[%s6161_s30 + $0x500] sm:$0xff] %v495_v32  ;;  %498 = vst [vmem:[%s6161_s30 + $0x508] sm:$0xff] %v497_v33  ;;  %v501_v35 = vld [vmem:[%s6156_s29 + $0xa28] sm:$0xff]  ;;  %v503_v36 = vld [vmem:[%s6156_s29 + $0xa30] sm:$0xff] }
  0x67   : > { %500 = vst [vmem:[%s6161_s30 + $0x510] sm:$0xff] %v499_v34  ;;  %502 = vst [vmem:[%s6161_s30 + $0x518] sm:$0xff] %v501_v35  ;;  %v505_v37 = vld [vmem:[%s6156_s29 + $0xa38] sm:$0xff]  ;;  %v507_v38 = vld [vmem:[%s6156_s29 + $0xa40] sm:$0xff] }
  0x68   : > { %504 = vst [vmem:[%s6161_s30 + $0x520] sm:$0xff] %v503_v36  ;;  %v509_v39 = vld [vmem:[%s6156_s29 + $0xa48] sm:$0xff]  ;;  %506 = vst [vmem:[%s6161_s30 + $0x528] sm:$0xff] %v505_v37  ;;  %v511_v40 = vld [vmem:[%s6156_s29 + $0xa80] sm:$0xff] }
  0x69   : > { %508 = vst [vmem:[%s6161_s30 + $0x530] sm:$0xff] %v507_v38  ;;  %510 = vst [vmem:[%s6161_s30 + $0x538] sm:$0xff] %v509_v39  ;;  %v513_v41 = vld [vmem:[%s6156_s29 + $0xa88] sm:$0xff]  ;;  %v515_v42 = vld [vmem:[%s6156_s29 + $0xa90] sm:$0xff] }
  0x6a   : > { %512 = vst [vmem:[%s6161_s30 + $0x540] sm:$0xff] %v511_v40  ;;  %514 = vst [vmem:[%s6161_s30 + $0x548] sm:$0xff] %v513_v41  ;;  %v517_v43 = vld [vmem:[%s6156_s29 + $0xa98] sm:$0xff]  ;;  %v519_v44 = vld [vmem:[%s6156_s29 + $0xaa0] sm:$0xff] }
  0x6b   : > { %516 = vst [vmem:[%s6161_s30 + $0x550] sm:$0xff] %v515_v42  ;;  %v521_v45 = vld [vmem:[%s6156_s29 + $0xaa8] sm:$0xff]  ;;  %518 = vst [vmem:[%s6161_s30 + $0x558] sm:$0xff] %v517_v43  ;;  %v523_v46 = vld [vmem:[%s6156_s29 + $0xae0] sm:$0xff] }
  0x6c   : > { %520 = vst [vmem:[%s6161_s30 + $0x560] sm:$0xff] %v519_v44  ;;  %522 = vst [vmem:[%s6161_s30 + $0x568] sm:$0xff] %v521_v45  ;;  %v525_v47 = vld [vmem:[%s6156_s29 + $0xae8] sm:$0xff]  ;;  %v527_v48 = vld [vmem:[%s6156_s29 + $0xaf0] sm:$0xff] }
  0x6d   : > { %524 = vst [vmem:[%s6161_s30 + $0x570] sm:$0xff] %v523_v46  ;;  %526 = vst [vmem:[%s6161_s30 + $0x578] sm:$0xff] %v525_v47  ;;  %v529_v49 = vld [vmem:[%s6156_s29 + $0xaf8] sm:$0xff]  ;;  %v531_v50 = vld [vmem:[%s6156_s29 + $0xb00] sm:$0xff] }
  0x6e   : > { %528 = vst [vmem:[%s6161_s30 + $0x580] sm:$0xff] %v527_v48  ;;  %v533_v51 = vld [vmem:[%s6156_s29 + $0xb08] sm:$0xff]  ;;  %530 = vst [vmem:[%s6161_s30 + $0x588] sm:$0xff] %v529_v49  ;;  %v535_v52 = vld [vmem:[%s6156_s29 + $0xb40] sm:$0xff] }
  0x6f   : > { %532 = vst [vmem:[%s6161_s30 + $0x590] sm:$0xff] %v531_v50  ;;  %534 = vst [vmem:[%s6161_s30 + $0x598] sm:$0xff] %v533_v51  ;;  %v537_v53 = vld [vmem:[%s6156_s29 + $0xb48] sm:$0xff]  ;;  %v539_v54 = vld [vmem:[%s6156_s29 + $0xb50] sm:$0xff] }
  0x70   : > { %536 = vst [vmem:[%s6161_s30 + $0x5a0] sm:$0xff] %v535_v52  ;;  %538 = vst [vmem:[%s6161_s30 + $0x5a8] sm:$0xff] %v537_v53  ;;  %v541_v55 = vld [vmem:[%s6156_s29 + $0xb58] sm:$0xff]  ;;  %v543_v56 = vld [vmem:[%s6156_s29 + $0xb60] sm:$0xff] }
  0x71   : > { %540 = vst [vmem:[%s6161_s30 + $0x5b0] sm:$0xff] %v539_v54  ;;  %v545_v57 = vld [vmem:[%s6156_s29 + $0xb68] sm:$0xff]  ;;  %542 = vst [vmem:[%s6161_s30 + $0x5b8] sm:$0xff] %v541_v55  ;;  %v547_v58 = vld [vmem:[%s6156_s29 + $0xba0] sm:$0xff] }
  0x72   : > { %544 = vst [vmem:[%s6161_s30 + $0x5c0] sm:$0xff] %v543_v56  ;;  %546 = vst [vmem:[%s6161_s30 + $0x5c8] sm:$0xff] %v545_v57  ;;  %v549_v59 = vld [vmem:[%s6156_s29 + $0xba8] sm:$0xff]  ;;  %v551_v60 = vld [vmem:[%s6156_s29 + $0xbb0] sm:$0xff] }
  0x73   : > { %548 = vst [vmem:[%s6161_s30 + $0x5d0] sm:$0xff] %v547_v58  ;;  %550 = vst [vmem:[%s6161_s30 + $0x5d8] sm:$0xff] %v549_v59  ;;  %v553_v61 = vld [vmem:[%s6156_s29 + $0xbb8] sm:$0xff]  ;;  %v555_v62 = vld [vmem:[%s6156_s29 + $0xbc0] sm:$0xff] }
  0x74   : > { %552 = vst [vmem:[%s6161_s30 + $0x5e0] sm:$0xff] %v551_v60  ;;  %v557_v63 = vld [vmem:[%s6156_s29 + $0xbc8] sm:$0xff]  ;;  %554 = vst [vmem:[%s6161_s30 + $0x5e8] sm:$0xff] %v553_v61  ;;  %v559_v0 = vld [vmem:[%s6156_s29 + $0xc00] sm:$0xff] }
  0x75   : > { %556 = vst [vmem:[%s6161_s30 + $0x5f0] sm:$0xff] %v555_v62  ;;  %558 = vst [vmem:[%s6161_s30 + $0x5f8] sm:$0xff] %v557_v63  ;;  %v561_v1 = vld [vmem:[%s6156_s29 + $0xc08] sm:$0xff]  ;;  %v563_v2 = vld [vmem:[%s6156_s29 + $0xc10] sm:$0xff] }
  0x76   : > { %560 = vst [vmem:[%s6161_s30 + $0x600] sm:$0xff] %v559_v0  ;;  %562 = vst [vmem:[%s6161_s30 + $0x608] sm:$0xff] %v561_v1  ;;  %v565_v3 = vld [vmem:[%s6156_s29 + $0xc18] sm:$0xff]  ;;  %v567_v4 = vld [vmem:[%s6156_s29 + $0xc20] sm:$0xff] }
  0x77   : > { %564 = vst [vmem:[%s6161_s30 + $0x610] sm:$0xff] %v563_v2  ;;  %v569_v5 = vld [vmem:[%s6156_s29 + $0xc28] sm:$0xff]  ;;  %566 = vst [vmem:[%s6161_s30 + $0x618] sm:$0xff] %v565_v3  ;;  %v571_v6 = vld [vmem:[%s6156_s29 + $0xc60] sm:$0xff] }
  0x78   : > { %568 = vst [vmem:[%s6161_s30 + $0x620] sm:$0xff] %v567_v4  ;;  %570 = vst [vmem:[%s6161_s30 + $0x628] sm:$0xff] %v569_v5  ;;  %v573_v7 = vld [vmem:[%s6156_s29 + $0xc68] sm:$0xff]  ;;  %v575_v8 = vld [vmem:[%s6156_s29 + $0xc70] sm:$0xff] }
  0x79   : > { %572 = vst [vmem:[%s6161_s30 + $0x630] sm:$0xff] %v571_v6  ;;  %574 = vst [vmem:[%s6161_s30 + $0x638] sm:$0xff] %v573_v7  ;;  %v577_v9 = vld [vmem:[%s6156_s29 + $0xc78] sm:$0xff]  ;;  %v579_v10 = vld [vmem:[%s6156_s29 + $0xc80] sm:$0xff] }
  0x7a   : > { %576 = vst [vmem:[%s6161_s30 + $0x640] sm:$0xff] %v575_v8  ;;  %v581_v11 = vld [vmem:[%s6156_s29 + $0xc88] sm:$0xff]  ;;  %578 = vst [vmem:[%s6161_s30 + $0x648] sm:$0xff] %v577_v9  ;;  %v583_v12 = vld [vmem:[%s6156_s29 + $0xcc0] sm:$0xff] }
  0x7b   : > { %580 = vst [vmem:[%s6161_s30 + $0x650] sm:$0xff] %v579_v10  ;;  %582 = vst [vmem:[%s6161_s30 + $0x658] sm:$0xff] %v581_v11  ;;  %v585_v13 = vld [vmem:[%s6156_s29 + $0xcc8] sm:$0xff]  ;;  %v587_v14 = vld [vmem:[%s6156_s29 + $0xcd0] sm:$0xff] }
  0x7c   : > { %584 = vst [vmem:[%s6161_s30 + $0x660] sm:$0xff] %v583_v12  ;;  %586 = vst [vmem:[%s6161_s30 + $0x668] sm:$0xff] %v585_v13  ;;  %v589_v15 = vld [vmem:[%s6156_s29 + $0xcd8] sm:$0xff]  ;;  %v591_v16 = vld [vmem:[%s6156_s29 + $0xce0] sm:$0xff] }
  0x7d   : > { %588 = vst [vmem:[%s6161_s30 + $0x670] sm:$0xff] %v587_v14  ;;  %v593_v17 = vld [vmem:[%s6156_s29 + $0xce8] sm:$0xff]  ;;  %590 = vst [vmem:[%s6161_s30 + $0x678] sm:$0xff] %v589_v15  ;;  %v595_v18 = vld [vmem:[%s6156_s29 + $0xd20] sm:$0xff] }
  0x7e   : > { %592 = vst [vmem:[%s6161_s30 + $0x680] sm:$0xff] %v591_v16  ;;  %594 = vst [vmem:[%s6161_s30 + $0x688] sm:$0xff] %v593_v17  ;;  %v597_v19 = vld [vmem:[%s6156_s29 + $0xd28] sm:$0xff]  ;;  %v599_v20 = vld [vmem:[%s6156_s29 + $0xd30] sm:$0xff] }
  0x7f   : > { %596 = vst [vmem:[%s6161_s30 + $0x690] sm:$0xff] %v595_v18  ;;  %598 = vst [vmem:[%s6161_s30 + $0x698] sm:$0xff] %v597_v19  ;;  %v601_v21 = vld [vmem:[%s6156_s29 + $0xd38] sm:$0xff]  ;;  %v603_v22 = vld [vmem:[%s6156_s29 + $0xd40] sm:$0xff] }
  0x80   : > { %600 = vst [vmem:[%s6161_s30 + $0x6a0] sm:$0xff] %v599_v20  ;;  %v605_v23 = vld [vmem:[%s6156_s29 + $0xd48] sm:$0xff]  ;;  %602 = vst [vmem:[%s6161_s30 + $0x6a8] sm:$0xff] %v601_v21  ;;  %v607_v24 = vld [vmem:[%s6156_s29 + $0xd80] sm:$0xff] }
  0x81   : > { %604 = vst [vmem:[%s6161_s30 + $0x6b0] sm:$0xff] %v603_v22  ;;  %606 = vst [vmem:[%s6161_s30 + $0x6b8] sm:$0xff] %v605_v23  ;;  %v609_v25 = vld [vmem:[%s6156_s29 + $0xd88] sm:$0xff]  ;;  %v611_v26 = vld [vmem:[%s6156_s29 + $0xd90] sm:$0xff] }
  0x82   : > { %608 = vst [vmem:[%s6161_s30 + $0x6c0] sm:$0xff] %v607_v24  ;;  %610 = vst [vmem:[%s6161_s30 + $0x6c8] sm:$0xff] %v609_v25  ;;  %v613_v27 = vld [vmem:[%s6156_s29 + $0xd98] sm:$0xff]  ;;  %v615_v28 = vld [vmem:[%s6156_s29 + $0xda0] sm:$0xff] }
  0x83   : > { %612 = vst [vmem:[%s6161_s30 + $0x6d0] sm:$0xff] %v611_v26  ;;  %v617_v29 = vld [vmem:[%s6156_s29 + $0xda8] sm:$0xff]  ;;  %614 = vst [vmem:[%s6161_s30 + $0x6d8] sm:$0xff] %v613_v27  ;;  %v619_v30 = vld [vmem:[%s6156_s29 + $0xde0] sm:$0xff] }
  0x84   : > { %616 = vst [vmem:[%s6161_s30 + $0x6e0] sm:$0xff] %v615_v28  ;;  %618 = vst [vmem:[%s6161_s30 + $0x6e8] sm:$0xff] %v617_v29  ;;  %v621_v31 = vld [vmem:[%s6156_s29 + $0xde8] sm:$0xff]  ;;  %v623_v32 = vld [vmem:[%s6156_s29 + $0xdf0] sm:$0xff] }
  0x85   : > { %620 = vst [vmem:[%s6161_s30 + $0x6f0] sm:$0xff] %v619_v30  ;;  %622 = vst [vmem:[%s6161_s30 + $0x6f8] sm:$0xff] %v621_v31  ;;  %v625_v33 = vld [vmem:[%s6156_s29 + $0xdf8] sm:$0xff]  ;;  %v627_v34 = vld [vmem:[%s6156_s29 + $0xe00] sm:$0xff] }
  0x86   : > { %624 = vst [vmem:[%s6161_s30 + $0x700] sm:$0xff] %v623_v32  ;;  %v629_v35 = vld [vmem:[%s6156_s29 + $0xe08] sm:$0xff]  ;;  %626 = vst [vmem:[%s6161_s30 + $0x708] sm:$0xff] %v625_v33  ;;  %v631_v36 = vld [vmem:[%s6156_s29 + $0xe40] sm:$0xff] }
  0x87   : > { %628 = vst [vmem:[%s6161_s30 + $0x710] sm:$0xff] %v627_v34  ;;  %630 = vst [vmem:[%s6161_s30 + $0x718] sm:$0xff] %v629_v35  ;;  %v633_v37 = vld [vmem:[%s6156_s29 + $0xe48] sm:$0xff]  ;;  %v635_v38 = vld [vmem:[%s6156_s29 + $0xe50] sm:$0xff] }
  0x88   : > { %632 = vst [vmem:[%s6161_s30 + $0x720] sm:$0xff] %v631_v36  ;;  %634 = vst [vmem:[%s6161_s30 + $0x728] sm:$0xff] %v633_v37  ;;  %v637_v39 = vld [vmem:[%s6156_s29 + $0xe58] sm:$0xff]  ;;  %v639_v40 = vld [vmem:[%s6156_s29 + $0xe60] sm:$0xff] }
  0x89   : > { %636 = vst [vmem:[%s6161_s30 + $0x730] sm:$0xff] %v635_v38  ;;  %v641_v41 = vld [vmem:[%s6156_s29 + $0xe68] sm:$0xff]  ;;  %638 = vst [vmem:[%s6161_s30 + $0x738] sm:$0xff] %v637_v39  ;;  %v643_v42 = vld [vmem:[%s6156_s29 + $0xea0] sm:$0xff] }
  0x8a   : > { %640 = vst [vmem:[%s6161_s30 + $0x740] sm:$0xff] %v639_v40  ;;  %642 = vst [vmem:[%s6161_s30 + $0x748] sm:$0xff] %v641_v41  ;;  %v645_v43 = vld [vmem:[%s6156_s29 + $0xea8] sm:$0xff]  ;;  %v647_v44 = vld [vmem:[%s6156_s29 + $0xeb0] sm:$0xff] }
  0x8b   : > { %644 = vst [vmem:[%s6161_s30 + $0x750] sm:$0xff] %v643_v42  ;;  %646 = vst [vmem:[%s6161_s30 + $0x758] sm:$0xff] %v645_v43  ;;  %v649_v45 = vld [vmem:[%s6156_s29 + $0xeb8] sm:$0xff]  ;;  %v651_v46 = vld [vmem:[%s6156_s29 + $0xec0] sm:$0xff] }
  0x8c   : > { %648 = vst [vmem:[%s6161_s30 + $0x760] sm:$0xff] %v647_v44  ;;  %v653_v47 = vld [vmem:[%s6156_s29 + $0xec8] sm:$0xff]  ;;  %650 = vst [vmem:[%s6161_s30 + $0x768] sm:$0xff] %v649_v45  ;;  %v655_v48 = vld [vmem:[%s6156_s29 + $0xf00] sm:$0xff] }
  0x8d   : > { %652 = vst [vmem:[%s6161_s30 + $0x770] sm:$0xff] %v651_v46  ;;  %654 = vst [vmem:[%s6161_s30 + $0x778] sm:$0xff] %v653_v47  ;;  %v657_v49 = vld [vmem:[%s6156_s29 + $0xf08] sm:$0xff]  ;;  %v659_v50 = vld [vmem:[%s6156_s29 + $0xf10] sm:$0xff] }
  0x8e   : > { %656 = vst [vmem:[%s6161_s30 + $0x780] sm:$0xff] %v655_v48  ;;  %658 = vst [vmem:[%s6161_s30 + $0x788] sm:$0xff] %v657_v49  ;;  %v661_v51 = vld [vmem:[%s6156_s29 + $0xf18] sm:$0xff]  ;;  %v663_v52 = vld [vmem:[%s6156_s29 + $0xf20] sm:$0xff] }
  0x8f   : > { %660 = vst [vmem:[%s6161_s30 + $0x790] sm:$0xff] %v659_v50  ;;  %v665_v53 = vld [vmem:[%s6156_s29 + $0xf28] sm:$0xff]  ;;  %662 = vst [vmem:[%s6161_s30 + $0x798] sm:$0xff] %v661_v51  ;;  %v667_v54 = vld [vmem:[%s6156_s29 + $0xf60] sm:$0xff] }
  0x90   : > { %664 = vst [vmem:[%s6161_s30 + $0x7a0] sm:$0xff] %v663_v52  ;;  %666 = vst [vmem:[%s6161_s30 + $0x7a8] sm:$0xff] %v665_v53  ;;  %v669_v55 = vld [vmem:[%s6156_s29 + $0xf68] sm:$0xff]  ;;  %v671_v56 = vld [vmem:[%s6156_s29 + $0xf70] sm:$0xff] }
  0x91   : > { %668 = vst [vmem:[%s6161_s30 + $0x7b0] sm:$0xff] %v667_v54  ;;  %670 = vst [vmem:[%s6161_s30 + $0x7b8] sm:$0xff] %v669_v55  ;;  %v673_v57 = vld [vmem:[%s6156_s29 + $0xf78] sm:$0xff]  ;;  %v675_v58 = vld [vmem:[%s6156_s29 + $0xf80] sm:$0xff] }
  0x92   : > { %672 = vst [vmem:[%s6161_s30 + $0x7c0] sm:$0xff] %v671_v56  ;;  %v677_v59 = vld [vmem:[%s6156_s29 + $0xf88] sm:$0xff]  ;;  %674 = vst [vmem:[%s6161_s30 + $0x7c8] sm:$0xff] %v673_v57  ;;  %v679_v60 = vld [vmem:[%s6156_s29 + $0xfc0] sm:$0xff] }
  0x93   : > { %676 = vst [vmem:[%s6161_s30 + $0x7d0] sm:$0xff] %v675_v58  ;;  %678 = vst [vmem:[%s6161_s30 + $0x7d8] sm:$0xff] %v677_v59  ;;  %v681_v61 = vld [vmem:[%s6156_s29 + $0xfc8] sm:$0xff]  ;;  %v683_v62 = vld [vmem:[%s6156_s29 + $0xfd0] sm:$0xff] }
  0x94   : > { %680 = vst [vmem:[%s6161_s30 + $0x7e0] sm:$0xff] %v679_v60  ;;  %682 = vst [vmem:[%s6161_s30 + $0x7e8] sm:$0xff] %v681_v61  ;;  %v685_v63 = vld [vmem:[%s6156_s29 + $0xfd8] sm:$0xff]  ;;  %v687_v0 = vld [vmem:[%s6156_s29 + $0xfe0] sm:$0xff] }
  0x95   : > { %684 = vst [vmem:[%s6161_s30 + $0x7f0] sm:$0xff] %v683_v62  ;;  %v689_v1 = vld [vmem:[%s6156_s29 + $0xfe8] sm:$0xff]  ;;  %686 = vst [vmem:[%s6161_s30 + $0x7f8] sm:$0xff] %v685_v63  ;;  %v691_v2 = vld [vmem:[%s6156_s29 + $0x1020] sm:$0xff] }
  0x96   : > { %688 = vst [vmem:[%s6161_s30 + $0x800] sm:$0xff] %v687_v0  ;;  %690 = vst [vmem:[%s6161_s30 + $0x808] sm:$0xff] %v689_v1  ;;  %v693_v3 = vld [vmem:[%s6156_s29 + $0x1028] sm:$0xff]  ;;  %v695_v4 = vld [vmem:[%s6156_s29 + $0x1030] sm:$0xff] }
  0x97   : > { %692 = vst [vmem:[%s6161_s30 + $0x810] sm:$0xff] %v691_v2  ;;  %694 = vst [vmem:[%s6161_s30 + $0x818] sm:$0xff] %v693_v3  ;;  %v697_v5 = vld [vmem:[%s6156_s29 + $0x1038] sm:$0xff]  ;;  %v699_v6 = vld [vmem:[%s6156_s29 + $0x1040] sm:$0xff] }
  0x98   : > { %696 = vst [vmem:[%s6161_s30 + $0x820] sm:$0xff] %v695_v4  ;;  %v701_v7 = vld [vmem:[%s6156_s29 + $0x1048] sm:$0xff]  ;;  %698 = vst [vmem:[%s6161_s30 + $0x828] sm:$0xff] %v697_v5  ;;  %v703_v8 = vld [vmem:[%s6156_s29 + $0x1080] sm:$0xff] }
  0x99   : > { %700 = vst [vmem:[%s6161_s30 + $0x830] sm:$0xff] %v699_v6  ;;  %702 = vst [vmem:[%s6161_s30 + $0x838] sm:$0xff] %v701_v7  ;;  %v705_v9 = vld [vmem:[%s6156_s29 + $0x1088] sm:$0xff]  ;;  %v707_v10 = vld [vmem:[%s6156_s29 + $0x1090] sm:$0xff] }
  0x9a   : > { %704 = vst [vmem:[%s6161_s30 + $0x840] sm:$0xff] %v703_v8  ;;  %706 = vst [vmem:[%s6161_s30 + $0x848] sm:$0xff] %v705_v9  ;;  %v709_v11 = vld [vmem:[%s6156_s29 + $0x1098] sm:$0xff]  ;;  %v711_v12 = vld [vmem:[%s6156_s29 + $0x10a0] sm:$0xff] }
  0x9b   : > { %708 = vst [vmem:[%s6161_s30 + $0x850] sm:$0xff] %v707_v10  ;;  %v713_v13 = vld [vmem:[%s6156_s29 + $0x10a8] sm:$0xff]  ;;  %710 = vst [vmem:[%s6161_s30 + $0x858] sm:$0xff] %v709_v11  ;;  %v715_v14 = vld [vmem:[%s6156_s29 + $0x10e0] sm:$0xff] }
  0x9c   : > { %712 = vst [vmem:[%s6161_s30 + $0x860] sm:$0xff] %v711_v12  ;;  %714 = vst [vmem:[%s6161_s30 + $0x868] sm:$0xff] %v713_v13  ;;  %v717_v15 = vld [vmem:[%s6156_s29 + $0x10e8] sm:$0xff]  ;;  %v719_v16 = vld [vmem:[%s6156_s29 + $0x10f0] sm:$0xff] }
  0x9d   : > { %716 = vst [vmem:[%s6161_s30 + $0x870] sm:$0xff] %v715_v14  ;;  %718 = vst [vmem:[%s6161_s30 + $0x878] sm:$0xff] %v717_v15  ;;  %v721_v17 = vld [vmem:[%s6156_s29 + $0x10f8] sm:$0xff]  ;;  %v723_v18 = vld [vmem:[%s6156_s29 + $0x1100] sm:$0xff] }
  0x9e   : > { %720 = vst [vmem:[%s6161_s30 + $0x880] sm:$0xff] %v719_v16  ;;  %v725_v19 = vld [vmem:[%s6156_s29 + $0x1108] sm:$0xff]  ;;  %722 = vst [vmem:[%s6161_s30 + $0x888] sm:$0xff] %v721_v17  ;;  %v727_v20 = vld [vmem:[%s6156_s29 + $0x1140] sm:$0xff] }
  0x9f   : > { %724 = vst [vmem:[%s6161_s30 + $0x890] sm:$0xff] %v723_v18  ;;  %726 = vst [vmem:[%s6161_s30 + $0x898] sm:$0xff] %v725_v19  ;;  %v729_v21 = vld [vmem:[%s6156_s29 + $0x1148] sm:$0xff]  ;;  %v731_v22 = vld [vmem:[%s6156_s29 + $0x1150] sm:$0xff] }
  0xa0   : > { %728 = vst [vmem:[%s6161_s30 + $0x8a0] sm:$0xff] %v727_v20  ;;  %730 = vst [vmem:[%s6161_s30 + $0x8a8] sm:$0xff] %v729_v21  ;;  %v733_v23 = vld [vmem:[%s6156_s29 + $0x1158] sm:$0xff]  ;;  %v735_v24 = vld [vmem:[%s6156_s29 + $0x1160] sm:$0xff] }
  0xa1   : > { %732 = vst [vmem:[%s6161_s30 + $0x8b0] sm:$0xff] %v731_v22  ;;  %v737_v25 = vld [vmem:[%s6156_s29 + $0x1168] sm:$0xff]  ;;  %734 = vst [vmem:[%s6161_s30 + $0x8b8] sm:$0xff] %v733_v23  ;;  %v739_v26 = vld [vmem:[%s6156_s29 + $0x11a0] sm:$0xff] }
  0xa2   : > { %736 = vst [vmem:[%s6161_s30 + $0x8c0] sm:$0xff] %v735_v24  ;;  %738 = vst [vmem:[%s6161_s30 + $0x8c8] sm:$0xff] %v737_v25  ;;  %v741_v27 = vld [vmem:[%s6156_s29 + $0x11a8] sm:$0xff]  ;;  %v743_v28 = vld [vmem:[%s6156_s29 + $0x11b0] sm:$0xff] }
  0xa3   : > { %740 = vst [vmem:[%s6161_s30 + $0x8d0] sm:$0xff] %v739_v26  ;;  %742 = vst [vmem:[%s6161_s30 + $0x8d8] sm:$0xff] %v741_v27  ;;  %v745_v29 = vld [vmem:[%s6156_s29 + $0x11b8] sm:$0xff]  ;;  %v747_v30 = vld [vmem:[%s6156_s29 + $0x11c0] sm:$0xff] }
  0xa4   : > { %744 = vst [vmem:[%s6161_s30 + $0x8e0] sm:$0xff] %v743_v28  ;;  %v749_v31 = vld [vmem:[%s6156_s29 + $0x11c8] sm:$0xff]  ;;  %746 = vst [vmem:[%s6161_s30 + $0x8e8] sm:$0xff] %v745_v29  ;;  %v751_v32 = vld [vmem:[%s6156_s29 + $0x1200] sm:$0xff] }
  0xa5   : > { %748 = vst [vmem:[%s6161_s30 + $0x8f0] sm:$0xff] %v747_v30  ;;  %750 = vst [vmem:[%s6161_s30 + $0x8f8] sm:$0xff] %v749_v31  ;;  %v753_v33 = vld [vmem:[%s6156_s29 + $0x1208] sm:$0xff]  ;;  %v755_v34 = vld [vmem:[%s6156_s29 + $0x1210] sm:$0xff] }
  0xa6   : > { %752 = vst [vmem:[%s6161_s30 + $0x900] sm:$0xff] %v751_v32  ;;  %754 = vst [vmem:[%s6161_s30 + $0x908] sm:$0xff] %v753_v33  ;;  %v757_v35 = vld [vmem:[%s6156_s29 + $0x1218] sm:$0xff]  ;;  %v759_v36 = vld [vmem:[%s6156_s29 + $0x1220] sm:$0xff] }
  0xa7   : > { %756 = vst [vmem:[%s6161_s30 + $0x910] sm:$0xff] %v755_v34  ;;  %v761_v37 = vld [vmem:[%s6156_s29 + $0x1228] sm:$0xff]  ;;  %758 = vst [vmem:[%s6161_s30 + $0x918] sm:$0xff] %v757_v35  ;;  %v763_v38 = vld [vmem:[%s6156_s29 + $0x1260] sm:$0xff] }
  0xa8   : > { %760 = vst [vmem:[%s6161_s30 + $0x920] sm:$0xff] %v759_v36  ;;  %762 = vst [vmem:[%s6161_s30 + $0x928] sm:$0xff] %v761_v37  ;;  %v765_v39 = vld [vmem:[%s6156_s29 + $0x1268] sm:$0xff]  ;;  %v767_v40 = vld [vmem:[%s6156_s29 + $0x1270] sm:$0xff] }
  0xa9   : > { %764 = vst [vmem:[%s6161_s30 + $0x930] sm:$0xff] %v763_v38  ;;  %766 = vst [vmem:[%s6161_s30 + $0x938] sm:$0xff] %v765_v39  ;;  %v769_v41 = vld [vmem:[%s6156_s29 + $0x1278] sm:$0xff]  ;;  %v771_v42 = vld [vmem:[%s6156_s29 + $0x1280] sm:$0xff] }
  0xaa   : > { %768 = vst [vmem:[%s6161_s30 + $0x940] sm:$0xff] %v767_v40  ;;  %v773_v43 = vld [vmem:[%s6156_s29 + $0x1288] sm:$0xff]  ;;  %770 = vst [vmem:[%s6161_s30 + $0x948] sm:$0xff] %v769_v41  ;;  %v775_v44 = vld [vmem:[%s6156_s29 + $0x12c0] sm:$0xff] }
  0xab   : > { %772 = vst [vmem:[%s6161_s30 + $0x950] sm:$0xff] %v771_v42  ;;  %774 = vst [vmem:[%s6161_s30 + $0x958] sm:$0xff] %v773_v43  ;;  %v777_v45 = vld [vmem:[%s6156_s29 + $0x12c8] sm:$0xff]  ;;  %v779_v46 = vld [vmem:[%s6156_s29 + $0x12d0] sm:$0xff] }
  0xac   : > { %776 = vst [vmem:[%s6161_s30 + $0x960] sm:$0xff] %v775_v44  ;;  %778 = vst [vmem:[%s6161_s30 + $0x968] sm:$0xff] %v777_v45  ;;  %v781_v47 = vld [vmem:[%s6156_s29 + $0x12d8] sm:$0xff]  ;;  %v783_v48 = vld [vmem:[%s6156_s29 + $0x12e0] sm:$0xff] }
  0xad   : > { %780 = vst [vmem:[%s6161_s30 + $0x970] sm:$0xff] %v779_v46  ;;  %v785_v49 = vld [vmem:[%s6156_s29 + $0x12e8] sm:$0xff]  ;;  %782 = vst [vmem:[%s6161_s30 + $0x978] sm:$0xff] %v781_v47  ;;  %v787_v50 = vld [vmem:[%s6156_s29 + $0x1320] sm:$0xff] }
  0xae   : > { %784 = vst [vmem:[%s6161_s30 + $0x980] sm:$0xff] %v783_v48  ;;  %786 = vst [vmem:[%s6161_s30 + $0x988] sm:$0xff] %v785_v49  ;;  %v789_v51 = vld [vmem:[%s6156_s29 + $0x1328] sm:$0xff]  ;;  %v791_v52 = vld [vmem:[%s6156_s29 + $0x1330] sm:$0xff] }
  0xaf   : > { %788 = vst [vmem:[%s6161_s30 + $0x990] sm:$0xff] %v787_v50  ;;  %790 = vst [vmem:[%s6161_s30 + $0x998] sm:$0xff] %v789_v51  ;;  %v793_v53 = vld [vmem:[%s6156_s29 + $0x1338] sm:$0xff]  ;;  %v795_v54 = vld [vmem:[%s6156_s29 + $0x1340] sm:$0xff] }
  0xb0   : > { %792 = vst [vmem:[%s6161_s30 + $0x9a0] sm:$0xff] %v791_v52  ;;  %v797_v55 = vld [vmem:[%s6156_s29 + $0x1348] sm:$0xff]  ;;  %794 = vst [vmem:[%s6161_s30 + $0x9a8] sm:$0xff] %v793_v53  ;;  %v799_v56 = vld [vmem:[%s6156_s29 + $0x1380] sm:$0xff] }
  0xb1   : > { %796 = vst [vmem:[%s6161_s30 + $0x9b0] sm:$0xff] %v795_v54  ;;  %798 = vst [vmem:[%s6161_s30 + $0x9b8] sm:$0xff] %v797_v55  ;;  %v801_v57 = vld [vmem:[%s6156_s29 + $0x1388] sm:$0xff]  ;;  %v803_v58 = vld [vmem:[%s6156_s29 + $0x1390] sm:$0xff] }
  0xb2   : > { %800 = vst [vmem:[%s6161_s30 + $0x9c0] sm:$0xff] %v799_v56  ;;  %802 = vst [vmem:[%s6161_s30 + $0x9c8] sm:$0xff] %v801_v57  ;;  %v805_v59 = vld [vmem:[%s6156_s29 + $0x1398] sm:$0xff]  ;;  %v807_v60 = vld [vmem:[%s6156_s29 + $0x13a0] sm:$0xff] }
  0xb3   : > { %804 = vst [vmem:[%s6161_s30 + $0x9d0] sm:$0xff] %v803_v58  ;;  %v809_v61 = vld [vmem:[%s6156_s29 + $0x13a8] sm:$0xff]  ;;  %806 = vst [vmem:[%s6161_s30 + $0x9d8] sm:$0xff] %v805_v59  ;;  %v811_v62 = vld [vmem:[%s6156_s29 + $0x13e0] sm:$0xff] }
  0xb4   : > { %808 = vst [vmem:[%s6161_s30 + $0x9e0] sm:$0xff] %v807_v60  ;;  %810 = vst [vmem:[%s6161_s30 + $0x9e8] sm:$0xff] %v809_v61  ;;  %v813_v63 = vld [vmem:[%s6156_s29 + $0x13e8] sm:$0xff]  ;;  %v815_v0 = vld [vmem:[%s6156_s29 + $0x13f0] sm:$0xff] }
  0xb5   : > { %812 = vst [vmem:[%s6161_s30 + $0x9f0] sm:$0xff] %v811_v62  ;;  %814 = vst [vmem:[%s6161_s30 + $0x9f8] sm:$0xff] %v813_v63  ;;  %v817_v1 = vld [vmem:[%s6156_s29 + $0x13f8] sm:$0xff]  ;;  %v819_v2 = vld [vmem:[%s6156_s29 + $0x1400] sm:$0xff] }
  0xb6   : > { %816 = vst [vmem:[%s6161_s30 + $0xa00] sm:$0xff] %v815_v0  ;;  %v821_v3 = vld [vmem:[%s6156_s29 + $0x1408] sm:$0xff]  ;;  %818 = vst [vmem:[%s6161_s30 + $0xa08] sm:$0xff] %v817_v1  ;;  %v823_v4 = vld [vmem:[%s6156_s29 + $0x1440] sm:$0xff] }
  0xb7   : > { %820 = vst [vmem:[%s6161_s30 + $0xa10] sm:$0xff] %v819_v2  ;;  %822 = vst [vmem:[%s6161_s30 + $0xa18] sm:$0xff] %v821_v3  ;;  %v825_v5 = vld [vmem:[%s6156_s29 + $0x1448] sm:$0xff]  ;;  %v827_v6 = vld [vmem:[%s6156_s29 + $0x1450] sm:$0xff] }
  0xb8   : > { %824 = vst [vmem:[%s6161_s30 + $0xa20] sm:$0xff] %v823_v4  ;;  %826 = vst [vmem:[%s6161_s30 + $0xa28] sm:$0xff] %v825_v5  ;;  %v829_v7 = vld [vmem:[%s6156_s29 + $0x1458] sm:$0xff]  ;;  %v831_v8 = vld [vmem:[%s6156_s29 + $0x1460] sm:$0xff] }
  0xb9   : > { %828 = vst [vmem:[%s6161_s30 + $0xa30] sm:$0xff] %v827_v6  ;;  %v833_v9 = vld [vmem:[%s6156_s29 + $0x1468] sm:$0xff]  ;;  %830 = vst [vmem:[%s6161_s30 + $0xa38] sm:$0xff] %v829_v7  ;;  %v835_v10 = vld [vmem:[%s6156_s29 + $0x14a0] sm:$0xff] }
  0xba   : > { %832 = vst [vmem:[%s6161_s30 + $0xa40] sm:$0xff] %v831_v8  ;;  %834 = vst [vmem:[%s6161_s30 + $0xa48] sm:$0xff] %v833_v9  ;;  %v837_v11 = vld [vmem:[%s6156_s29 + $0x14a8] sm:$0xff]  ;;  %v839_v12 = vld [vmem:[%s6156_s29 + $0x14b0] sm:$0xff] }
  0xbb   : > { %836 = vst [vmem:[%s6161_s30 + $0xa50] sm:$0xff] %v835_v10  ;;  %838 = vst [vmem:[%s6161_s30 + $0xa58] sm:$0xff] %v837_v11  ;;  %v841_v13 = vld [vmem:[%s6156_s29 + $0x14b8] sm:$0xff]  ;;  %v843_v14 = vld [vmem:[%s6156_s29 + $0x14c0] sm:$0xff] }
  0xbc   : > { %840 = vst [vmem:[%s6161_s30 + $0xa60] sm:$0xff] %v839_v12  ;;  %v845_v15 = vld [vmem:[%s6156_s29 + $0x14c8] sm:$0xff]  ;;  %842 = vst [vmem:[%s6161_s30 + $0xa68] sm:$0xff] %v841_v13  ;;  %v847_v16 = vld [vmem:[%s6156_s29 + $0x1500] sm:$0xff] }
  0xbd   : > { %844 = vst [vmem:[%s6161_s30 + $0xa70] sm:$0xff] %v843_v14  ;;  %846 = vst [vmem:[%s6161_s30 + $0xa78] sm:$0xff] %v845_v15  ;;  %v849_v17 = vld [vmem:[%s6156_s29 + $0x1508] sm:$0xff]  ;;  %v851_v18 = vld [vmem:[%s6156_s29 + $0x1510] sm:$0xff] }
  0xbe   : > { %848 = vst [vmem:[%s6161_s30 + $0xa80] sm:$0xff] %v847_v16  ;;  %850 = vst [vmem:[%s6161_s30 + $0xa88] sm:$0xff] %v849_v17  ;;  %v853_v19 = vld [vmem:[%s6156_s29 + $0x1518] sm:$0xff]  ;;  %v855_v20 = vld [vmem:[%s6156_s29 + $0x1520] sm:$0xff] }
  0xbf   : > { %852 = vst [vmem:[%s6161_s30 + $0xa90] sm:$0xff] %v851_v18  ;;  %v857_v21 = vld [vmem:[%s6156_s29 + $0x1528] sm:$0xff]  ;;  %854 = vst [vmem:[%s6161_s30 + $0xa98] sm:$0xff] %v853_v19  ;;  %v859_v22 = vld [vmem:[%s6156_s29 + $0x1560] sm:$0xff] }
  0xc0   : > { %856 = vst [vmem:[%s6161_s30 + $0xaa0] sm:$0xff] %v855_v20  ;;  %858 = vst [vmem:[%s6161_s30 + $0xaa8] sm:$0xff] %v857_v21  ;;  %v861_v23 = vld [vmem:[%s6156_s29 + $0x1568] sm:$0xff]  ;;  %v863_v24 = vld [vmem:[%s6156_s29 + $0x1570] sm:$0xff] }
  0xc1   : > { %860 = vst [vmem:[%s6161_s30 + $0xab0] sm:$0xff] %v859_v22  ;;  %862 = vst [vmem:[%s6161_s30 + $0xab8] sm:$0xff] %v861_v23  ;;  %v865_v25 = vld [vmem:[%s6156_s29 + $0x1578] sm:$0xff]  ;;  %v867_v26 = vld [vmem:[%s6156_s29 + $0x1580] sm:$0xff] }
  0xc2   : > { %864 = vst [vmem:[%s6161_s30 + $0xac0] sm:$0xff] %v863_v24  ;;  %v869_v27 = vld [vmem:[%s6156_s29 + $0x1588] sm:$0xff]  ;;  %866 = vst [vmem:[%s6161_s30 + $0xac8] sm:$0xff] %v865_v25  ;;  %v871_v28 = vld [vmem:[%s6156_s29 + $0x15c0] sm:$0xff] }
  0xc3   : > { %868 = vst [vmem:[%s6161_s30 + $0xad0] sm:$0xff] %v867_v26  ;;  %870 = vst [vmem:[%s6161_s30 + $0xad8] sm:$0xff] %v869_v27  ;;  %v873_v29 = vld [vmem:[%s6156_s29 + $0x15c8] sm:$0xff]  ;;  %v875_v30 = vld [vmem:[%s6156_s29 + $0x15d0] sm:$0xff] }
  0xc4   : > { %872 = vst [vmem:[%s6161_s30 + $0xae0] sm:$0xff] %v871_v28  ;;  %874 = vst [vmem:[%s6161_s30 + $0xae8] sm:$0xff] %v873_v29  ;;  %v877_v31 = vld [vmem:[%s6156_s29 + $0x15d8] sm:$0xff]  ;;  %v879_v32 = vld [vmem:[%s6156_s29 + $0x15e0] sm:$0xff] }
  0xc5   : > { %876 = vst [vmem:[%s6161_s30 + $0xaf0] sm:$0xff] %v875_v30  ;;  %v881_v33 = vld [vmem:[%s6156_s29 + $0x15e8] sm:$0xff]  ;;  %878 = vst [vmem:[%s6161_s30 + $0xaf8] sm:$0xff] %v877_v31  ;;  %v883_v34 = vld [vmem:[%s6156_s29 + $0x1620] sm:$0xff] }
  0xc6   : > { %880 = vst [vmem:[%s6161_s30 + $0xb00] sm:$0xff] %v879_v32  ;;  %882 = vst [vmem:[%s6161_s30 + $0xb08] sm:$0xff] %v881_v33  ;;  %v885_v35 = vld [vmem:[%s6156_s29 + $0x1628] sm:$0xff]  ;;  %v887_v36 = vld [vmem:[%s6156_s29 + $0x1630] sm:$0xff] }
  0xc7   : > { %884 = vst [vmem:[%s6161_s30 + $0xb10] sm:$0xff] %v883_v34  ;;  %886 = vst [vmem:[%s6161_s30 + $0xb18] sm:$0xff] %v885_v35  ;;  %v889_v37 = vld [vmem:[%s6156_s29 + $0x1638] sm:$0xff]  ;;  %v891_v38 = vld [vmem:[%s6156_s29 + $0x1640] sm:$0xff] }
  0xc8   : > { %888 = vst [vmem:[%s6161_s30 + $0xb20] sm:$0xff] %v887_v36  ;;  %v893_v39 = vld [vmem:[%s6156_s29 + $0x1648] sm:$0xff]  ;;  %890 = vst [vmem:[%s6161_s30 + $0xb28] sm:$0xff] %v889_v37  ;;  %v895_v40 = vld [vmem:[%s6156_s29 + $0x1680] sm:$0xff] }
  0xc9   : > { %892 = vst [vmem:[%s6161_s30 + $0xb30] sm:$0xff] %v891_v38  ;;  %894 = vst [vmem:[%s6161_s30 + $0xb38] sm:$0xff] %v893_v39  ;;  %v897_v41 = vld [vmem:[%s6156_s29 + $0x1688] sm:$0xff]  ;;  %v899_v42 = vld [vmem:[%s6156_s29 + $0x1690] sm:$0xff] }
  0xca   : > { %896 = vst [vmem:[%s6161_s30 + $0xb40] sm:$0xff] %v895_v40  ;;  %898 = vst [vmem:[%s6161_s30 + $0xb48] sm:$0xff] %v897_v41  ;;  %v901_v43 = vld [vmem:[%s6156_s29 + $0x1698] sm:$0xff]  ;;  %v903_v44 = vld [vmem:[%s6156_s29 + $0x16a0] sm:$0xff] }
  0xcb   : > { %900 = vst [vmem:[%s6161_s30 + $0xb50] sm:$0xff] %v899_v42  ;;  %v905_v45 = vld [vmem:[%s6156_s29 + $0x16a8] sm:$0xff]  ;;  %902 = vst [vmem:[%s6161_s30 + $0xb58] sm:$0xff] %v901_v43  ;;  %v907_v46 = vld [vmem:[%s6156_s29 + $0x16e0] sm:$0xff] }
  0xcc   : > { %904 = vst [vmem:[%s6161_s30 + $0xb60] sm:$0xff] %v903_v44  ;;  %906 = vst [vmem:[%s6161_s30 + $0xb68] sm:$0xff] %v905_v45  ;;  %v909_v47 = vld [vmem:[%s6156_s29 + $0x16e8] sm:$0xff]  ;;  %v911_v48 = vld [vmem:[%s6156_s29 + $0x16f0] sm:$0xff] }
  0xcd   : > { %908 = vst [vmem:[%s6161_s30 + $0xb70] sm:$0xff] %v907_v46  ;;  %910 = vst [vmem:[%s6161_s30 + $0xb78] sm:$0xff] %v909_v47  ;;  %v913_v49 = vld [vmem:[%s6156_s29 + $0x16f8] sm:$0xff]  ;;  %v915_v50 = vld [vmem:[%s6156_s29 + $0x1700] sm:$0xff] }
  0xce   : > { %912 = vst [vmem:[%s6161_s30 + $0xb80] sm:$0xff] %v911_v48  ;;  %v917_v51 = vld [vmem:[%s6156_s29 + $0x1708] sm:$0xff]  ;;  %914 = vst [vmem:[%s6161_s30 + $0xb88] sm:$0xff] %v913_v49  ;;  %v919_v52 = vld [vmem:[%s6156_s29 + $0x1740] sm:$0xff] }
  0xcf   : > { %916 = vst [vmem:[%s6161_s30 + $0xb90] sm:$0xff] %v915_v50  ;;  %918 = vst [vmem:[%s6161_s30 + $0xb98] sm:$0xff] %v917_v51  ;;  %v921_v53 = vld [vmem:[%s6156_s29 + $0x1748] sm:$0xff]  ;;  %v923_v54 = vld [vmem:[%s6156_s29 + $0x1750] sm:$0xff] }
  0xd0   : > { %920 = vst [vmem:[%s6161_s30 + $0xba0] sm:$0xff] %v919_v52  ;;  %922 = vst [vmem:[%s6161_s30 + $0xba8] sm:$0xff] %v921_v53  ;;  %v925_v55 = vld [vmem:[%s6156_s29 + $0x1758] sm:$0xff]  ;;  %v927_v56 = vld [vmem:[%s6156_s29 + $0x1760] sm:$0xff] }
  0xd1   : > { %924 = vst [vmem:[%s6161_s30 + $0xbb0] sm:$0xff] %v923_v54  ;;  %v929_v57 = vld [vmem:[%s6156_s29 + $0x1768] sm:$0xff]  ;;  %926 = vst [vmem:[%s6161_s30 + $0xbb8] sm:$0xff] %v925_v55  ;;  %v931_v58 = vld [vmem:[%s6156_s29 + $0x17a0] sm:$0xff] }
  0xd2   : > { %928 = vst [vmem:[%s6161_s30 + $0xbc0] sm:$0xff] %v927_v56  ;;  %930 = vst [vmem:[%s6161_s30 + $0xbc8] sm:$0xff] %v929_v57  ;;  %v933_v59 = vld [vmem:[%s6156_s29 + $0x17a8] sm:$0xff]  ;;  %v935_v60 = vld [vmem:[%s6156_s29 + $0x17b0] sm:$0xff] }
  0xd3   : > { %932 = vst [vmem:[%s6161_s30 + $0xbd0] sm:$0xff] %v931_v58  ;;  %934 = vst [vmem:[%s6161_s30 + $0xbd8] sm:$0xff] %v933_v59  ;;  %v937_v61 = vld [vmem:[%s6156_s29 + $0x17b8] sm:$0xff]  ;;  %v939_v62 = vld [vmem:[%s6156_s29 + $0x17c0] sm:$0xff] }
  0xd4   : > { %936 = vst [vmem:[%s6161_s30 + $0xbe0] sm:$0xff] %v935_v60  ;;  %v941_v63 = vld [vmem:[%s6156_s29 + $0x17c8] sm:$0xff]  ;;  %938 = vst [vmem:[%s6161_s30 + $0xbe8] sm:$0xff] %v937_v61 }
  0xd5   : > { %940 = vst [vmem:[%s6161_s30 + $0xbf0] sm:$0xff] %v939_v62  ;;  %942 = vst [vmem:[%s6161_s30 + $0xbf8] sm:$0xff] %v941_v63 }
  0xd6 PF: > { %p4950_p7 = scmp.ge.s32.totalorder %s6088_s17, 1  ;;  %p947_p8 = scmp.lt.s32.totalorder %s6088_s17, 3 }
  0xd8   : > { %p948_p9 = pnand %p4950_p7, %p947_p8 }
  0xda   : > { %951 = sbr.rel (%p948_p9) target bundleno = 958 (0x3be), region = 55 }
  0xe1   : > { %s954_s5 = sand.u32 1, %s6080_s15   ;;  %v6972_v34 = vld [vmem:[%s8211_s2] sm:$0xff]  ;;  %v6984_v38 = vld [vmem:[%s8211_s2 + $0x8] sm:$0xff]  ;;  %v6989_v39 = vld [vmem:[%s8211_s2 + $0x10] sm:$0xff] }
  0xe2   : > { %s5437_s6 = smul.u32 3072, %s954_s5  ;;  %v6977_v35 = vld [vmem:[%s8211_s2 + $0x20] sm:$0xff]  ;;  %v6994_v40 = vld [vmem:[%s8211_s2 + $0x18] sm:$0xff]  ;;  %v6999_v41 = vld [vmem:[%s8211_s2 + $0x28] sm:$0xff] }
  0xe3   : > { %v7004_v42 = vld [vmem:[%s8211_s2 + $0x30] sm:$0xff]  ;;  %v7009_v43 = vld [vmem:[%s8211_s2 + $0x38] sm:$0xff]  ;;  %v7016_v46 = vld [vmem:[%s8211_s2 + $0x40] sm:$0xff]  ;;  %v1012_v51 = vadd.f32 %v6977_v35, %v6972_v34  ;;  %v1025_v54 = vadd.f32 %v6999_v41, %v6984_v38  ;;  %s5438_s10 = smul.u32 768, %s954_s5 }
  0xe4   : > { %s6933_s7 = scalar_lea.vmem [#allocation2], %s5437_s6  ;;  %v7022_v48 = vld [vmem:[%s8211_s2 + $0x48] sm:$0xff]  ;;  %v7027_v49 = vld [vmem:[%s8211_s2 + $0x50] sm:$0xff]  ;;  %v7032_v50 = vld [vmem:[%s8211_s2 + $0x58] sm:$0xff]  ;;  %v1038_v55 = vadd.f32 %v7004_v42, %v6989_v39  ;;  %v1051_v56 = vadd.f32 %v7009_v43, %v6994_v40  ;;  %s5339_s5 = smul.u32 (%p6146_p5), 96, %s4945_s18 }
  0xe5   : > { %v5464_v0 = vld [vmem:[%s6933_s7 + $0x4] ss:$48 sps:$4 sm:$0xff]   ;;  %v5466_v1 = vld [vmem:[%s6933_s7 + $0xc] ss:$48 sps:$4 sm:$0xff]   ;;  %v5468_v2 = vld [vmem:[%s6933_s7] ss:$48 sps:$4 sm:$0xff]   ;;  %v1013_v60 = vadd.f32 %v1012_v51, %v7016_v46  ;;  %v1026_v62 = vadd.f32 %v1025_v54, %v7022_v48 }
  0xe6   : > { %3700 = vmatprep.subr.bf16.mxu0 %v5464_v0  ;;  %v5469_v3 = vld [vmem:[%s6933_s7 + $0x8] ss:$48 sps:$4 sm:$0xff]   ;;  %3846 = vmatprep.subr.bf16.mxu1 %v5466_v1  ;;  %v5470_v4 = vld [vmem:[%s6933_s7 + $0x64] ss:$48 sps:$4 sm:$0xff]   ;;  %v5472_v5 = vld [vmem:[%s6933_s7 + $0x6c] ss:$48 sps:$4 sm:$0xff]   ;;  %v1039_v63 = vadd.f32 %v1038_v55, %v7027_v49  ;;  %v1052_v0 = vadd.f32 %v1051_v56, %v7032_v50 }
  0xe7   : > { %3701 = vmatpush1.bf16.msra.mxu0 %v5468_v2  ;;  %3847 = vmatpush1.bf16.msra.mxu1 %v5469_v3  ;;  %v5474_v6 = vld [vmem:[%s6933_s7 + $0x60] ss:$48 sps:$4 sm:$0xff]   ;;  %v5475_v7 = vld [vmem:[%s6933_s7 + $0x68] ss:$48 sps:$4 sm:$0xff]   ;;  %v5476_v8 = vld [vmem:[%s6933_s7 + $0xc4] ss:$48 sps:$4 sm:$0xff]  }
  0xe8   : > { %3702 = vmatprep.subr.bf16.mxu0 %v5470_v4  ;;  %3848 = vmatprep.subr.bf16.mxu1 %v5472_v5  ;;  %v5478_v9 = vld [vmem:[%s6933_s7 + $0xcc] ss:$48 sps:$4 sm:$0xff]   ;;  %v5480_v10 = vld [vmem:[%s6933_s7 + $0xc0] ss:$48 sps:$4 sm:$0xff]   ;;  %v5481_v11 = vld [vmem:[%s6933_s7 + $0xc8] ss:$48 sps:$4 sm:$0xff]  }
  0xe9   : > { %v5482_v12 = vld [vmem:[%s6933_s7 + $0x124] ss:$48 sps:$4 sm:$0xff]   ;;  %v5484_v13 = vld [vmem:[%s6933_s7 + $0x12c] ss:$48 sps:$4 sm:$0xff]   ;;  %v5486_v14 = vld [vmem:[%s6933_s7 + $0x120] ss:$48 sps:$4 sm:$0xff]  }
  0xea   : > { %v5487_v15 = vld [vmem:[%s6933_s7 + $0x128] ss:$48 sps:$4 sm:$0xff]   ;;  %v5488_v16 = vld [vmem:[%s6933_s7 + $0x184] ss:$48 sps:$4 sm:$0xff]   ;;  %v5490_v17 = vld [vmem:[%s6933_s7 + $0x18c] ss:$48 sps:$4 sm:$0xff]  }
  0xeb   : > { %3703 = vmatpush1.bf16.msra.mxu0 %v5474_v6  ;;  %3849 = vmatpush1.bf16.msra.mxu1 %v5475_v7  ;;  %v5492_v18 = vld [vmem:[%s6933_s7 + $0x180] ss:$48 sps:$4 sm:$0xff]   ;;  %v5493_v19 = vld [vmem:[%s6933_s7 + $0x188] ss:$48 sps:$4 sm:$0xff]   ;;  %v5494_v20 = vld [vmem:[%s6933_s7 + $0x1e4] ss:$48 sps:$4 sm:$0xff]  }
  0xec   : > { %3704 = vmatprep.subr.bf16.mxu0 %v5476_v8  ;;  %3850 = vmatprep.subr.bf16.mxu1 %v5478_v9  ;;  %v5496_v21 = vld [vmem:[%s6933_s7 + $0x1ec] ss:$48 sps:$4 sm:$0xff]   ;;  %v5498_v22 = vld [vmem:[%s6933_s7 + $0x1e0] ss:$48 sps:$4 sm:$0xff]   ;;  %v5499_v23 = vld [vmem:[%s6933_s7 + $0x1e8] ss:$48 sps:$4 sm:$0xff]  }
  0xed   : > { %v5500_v24 = vld [vmem:[%s6933_s7 + $0x244] ss:$48 sps:$4 sm:$0xff]   ;;  %v5502_v25 = vld [vmem:[%s6933_s7 + $0x24c] ss:$48 sps:$4 sm:$0xff]   ;;  %v5504_v26 = vld [vmem:[%s6933_s7 + $0x240] ss:$48 sps:$4 sm:$0xff]  }
  0xee   : > { %v5505_v27 = vld [vmem:[%s6933_s7 + $0x248] ss:$48 sps:$4 sm:$0xff]   ;;  %v5506_v28 = vld [vmem:[%s6933_s7 + $0x2a4] ss:$48 sps:$4 sm:$0xff]   ;;  %v5508_v29 = vld [vmem:[%s6933_s7 + $0x2ac] ss:$48 sps:$4 sm:$0xff]  }
  0xef   : > { %3705 = vmatpush1.bf16.msra.mxu0 %v5480_v10  ;;  %3851 = vmatpush1.bf16.msra.mxu1 %v5481_v11  ;;  %v5510_v30 = vld [vmem:[%s6933_s7 + $0x2a0] ss:$48 sps:$4 sm:$0xff]   ;;  %v5511_v31 = vld [vmem:[%s6933_s7 + $0x2a8] ss:$48 sps:$4 sm:$0xff]   ;;  %v5512_v32 = vld [vmem:[%s6933_s7 + $0x304] ss:$48 sps:$4 sm:$0xff]  }
  0xf0   : > { %3706 = vmatprep.subr.bf16.mxu0 %v5482_v12  ;;  %3852 = vmatprep.subr.bf16.mxu1 %v5484_v13  ;;  %v5514_v33 = vld [vmem:[%s6933_s7 + $0x30c] ss:$48 sps:$4 sm:$0xff]   ;;  %v5516_v36 = vld [vmem:[%s6933_s7 + $0x300] ss:$48 sps:$4 sm:$0xff]   ;;  %v5517_v37 = vld [vmem:[%s6933_s7 + $0x308] ss:$48 sps:$4 sm:$0xff]  }
  0xf1   : > { %v5518_v44 = vld [vmem:[%s6933_s7 + $0x364] ss:$48 sps:$4 sm:$0xff]   ;;  %v5520_v45 = vld [vmem:[%s6933_s7 + $0x36c] ss:$48 sps:$4 sm:$0xff]   ;;  %v5522_v47 = vld [vmem:[%s6933_s7 + $0x360] ss:$48 sps:$4 sm:$0xff]  }
  0xf2   : > { %v5523_v52 = vld [vmem:[%s6933_s7 + $0x368] ss:$48 sps:$4 sm:$0xff]   ;;  %v5524_v53 = vld [vmem:[%s6933_s7 + $0x3c4] ss:$48 sps:$4 sm:$0xff]   ;;  %v5526_v57 = vld [vmem:[%s6933_s7 + $0x3cc] ss:$48 sps:$4 sm:$0xff]  }
  0xf3   : > { %3707 = vmatpush1.bf16.msra.mxu0 %v5486_v14  ;;  %3853 = vmatpush1.bf16.msra.mxu1 %v5487_v15  ;;  %v5528_v58 = vld [vmem:[%s6933_s7 + $0x3c0] ss:$48 sps:$4 sm:$0xff]   ;;  %v5529_v59 = vld [vmem:[%s6933_s7 + $0x3c8] ss:$48 sps:$4 sm:$0xff]   ;;  %v5530_v61 = vld [vmem:[%s6933_s7 + $0x424] ss:$48 sps:$4 sm:$0xff]  }
  0xf4   : > { %3708 = vmatprep.subr.bf16.mxu0 %v5488_v16  ;;  %3854 = vmatprep.subr.bf16.mxu1 %v5490_v17  ;;  %v5532_v1 = vld [vmem:[%s6933_s7 + $0x42c] ss:$48 sps:$4 sm:$0xff]   ;;  %v5534_v2 = vld [vmem:[%s6933_s7 + $0x420] ss:$48 sps:$4 sm:$0xff]   ;;  %v5535_v3 = vld [vmem:[%s6933_s7 + $0x428] ss:$48 sps:$4 sm:$0xff]  }
  0xf5   : > { %v7058_v4 = vld [vmem:[%s8211_s2 + $0x60] sm:$0xff]  ;;  %v5538_v6 = vld [vmem:[%s6933_s7 + $0x48c] ss:$48 sps:$4 sm:$0xff]   ;;  %v7070_v8 = vld [vmem:[%s8211_s2 + $0x70] sm:$0xff]  ;;  %s7844_s15 = scalar_lea.vmem [#allocation3], %s5438_s10 }
  0xf6   : > { %v5536_v5 = vld [vmem:[%s6933_s7 + $0x484] ss:$48 sps:$4 sm:$0xff]   ;;  %v7065_v7 = vld [vmem:[%s8211_s2 + $0x68] sm:$0xff]  ;;  %8221 = vst [vmem:[#allocation4_spill] sm:$0xff] %v7070_v8  ;;  %v7075_v9 = vld [vmem:[%s8211_s2 + $0x78] sm:$0xff]  ;;  %v1014_v10 = vadd.f32 %v1013_v60, %v7058_v4  ;;  %v1040_v15 = vadd.f32 %v1039_v63, %v7070_v8 }
  0xf7   : > { %3709 = vmatpush1.bf16.msra.mxu0 %v5492_v18  ;;  %3855 = vmatpush1.bf16.msra.mxu1 %v5493_v19  ;;  %v7081_v11 = vld [vmem:[%s8211_s2 + $0x80] sm:$0xff]  ;;  %v7086_v12 = vld [vmem:[%s8211_s2 + $0x88] sm:$0xff]  ;;  %v7091_v13 = vld [vmem:[%s8211_s2 + $0x90] sm:$0xff]  ;;  %v1027_v14 = vadd.f32 %v1026_v62, %v7065_v7  ;;  %v1053_v16 = vadd.f32 %v1052_v0, %v7075_v9 }
  0xf8   : > { %3710 = vmatprep.subr.bf16.mxu0 %v5494_v20  ;;  %3856 = vmatprep.subr.bf16.mxu1 %v5496_v21  ;;  %8222 = vst [vmem:[#allocation5_spill] sm:$0xff] %v7091_v13  ;;  %v7099_v17 = vld [vmem:[%s8211_s2 + $0x98] sm:$0xff]  ;;  %v7104_v18 = vld [vmem:[%s8211_s2 + $0xa0] sm:$0xff]  ;;  %v7109_v19 = vld [vmem:[%s8211_s2 + $0xa8] sm:$0xff]  ;;  %v1015_v20 = vadd.f32 %v1014_v10, %v7081_v11 }
  0xf9   : > { %8223 = vst [vmem:[#allocation6_spill] sm:$0xff] %v7104_v18  ;;  %v5540_v21 = vld [vmem:[%s6933_s7 + $0x480] ss:$48 sps:$4 sm:$0xff]   ;;  %v7161_v51 = vld [vmem:[%s8211_s2 + $0xe8] sm:$0xff]  ;;  %v5548_v0 = vld [vmem:[%s6933_s7 + $0x544] ss:$48 sps:$4 sm:$0xff]  }
  0xfa   : > { %v5547_v60 = vld [vmem:[%s6933_s7 + $0x4e8] ss:$48 sps:$4 sm:$0xff]  }
  0xfb   : > { %3711 = vmatpush1.bf16.msra.mxu0 %v5498_v22  ;;  %3857 = vmatpush1.bf16.msra.mxu1 %v5499_v23  ;;  %v5541_v22 = vld [vmem:[%s6933_s7 + $0x488] ss:$48 sps:$4 sm:$0xff]   ;;  %v7117_v23 = vld [vmem:[%s8211_s2 + $0xb0] sm:$0xff] }
  0xfc   : > { %3712 = vmatprep.subr.bf16.mxu0 %v5500_v24  ;;  %3858 = vmatprep.subr.bf16.mxu1 %v5502_v25  ;;  %8224 = vst [vmem:[#allocation7_spill] sm:$0xff] %v7117_v23  ;;  %v7122_v24 = vld [vmem:[%s8211_s2 + $0xb8] sm:$0xff]  ;;  %v7127_v25 = vld [vmem:[%s8211_s2 + $0xc0] sm:$0xff] }
  0xff   : > { %3713 = vmatpush1.bf16.msra.mxu0 %v5504_v26  ;;  %3859 = vmatpush1.bf16.msra.mxu1 %v5505_v27  ;;  %v1028_v26 = vadd.f32 %v1027_v14, %v7086_v12  ;;  %v1041_v27 = vadd.f32 %v1040_v15, %v7091_v13  ;;  %v5552_v14 = vld [vmem:[%s6933_s7 + $0x540] ss:$48 sps:$4 sm:$0xff]   ;;  %v5553_v15 = vld [vmem:[%s6933_s7 + $0x548] ss:$48 sps:$4 sm:$0xff]  }
 0x100   : > { %3714 = vmatprep.subr.bf16.mxu0 %v5506_v28  ;;  %3860 = vmatprep.subr.bf16.mxu1 %v5508_v29  ;;  %v1054_v28 = vadd.f32 %v1053_v16, %v7099_v17  ;;  %v7135_v29 = vld [vmem:[%s8211_s2 + $0xc8] sm:$0xff] }
 0x103   : > { %3715 = vmatpush1.bf16.msra.mxu0 %v5510_v30  ;;  %3861 = vmatpush1.bf16.msra.mxu1 %v5511_v31  ;;  %v7140_v30 = vld [vmem:[%s8211_s2 + $0xd0] sm:$0xff]  ;;  %v7145_v31 = vld [vmem:[%s8211_s2 + $0xd8] sm:$0xff] }
 0x104   : > { %3716 = vmatprep.subr.bf16.mxu0 %v5512_v32  ;;  %3862 = vmatprep.subr.bf16.mxu1 %v5514_v33  ;;  %8225 = vst [vmem:[#allocation8_spill] sm:$0xff] %v7140_v30  ;;  %v1016_v32 = vadd.f32 %v1015_v20, %v7104_v18  ;;  %v5542_v33 = vld [vmem:[%s6933_s7 + $0x4e4] ss:$48 sps:$4 sm:$0xff]  }
 0x106   : > { %v1017_v54 = vadd.f32 %v1016_v32, %v7127_v25 }
 0x107   : > { %3717 = vmatpush1.bf16.msra.mxu0 %v5516_v36  ;;  %3863 = vmatpush1.bf16.msra.mxu1 %v5517_v37  ;;  %v5544_v36 = vld [vmem:[%s6933_s7 + $0x4ec] ss:$48 sps:$4 sm:$0xff]   ;;  %v7153_v37 = vld [vmem:[%s8211_s2 + $0xe0] sm:$0xff] }
 0x108   : > { %3718 = vmatprep.subr.bf16.mxu0 %v5518_v44  ;;  %3864 = vmatprep.subr.bf16.mxu1 %v5520_v45  ;;  %v1029_v44 = vadd.f32 %v1028_v26, %v7109_v19  ;;  %v1042_v45 = vadd.f32 %v1041_v27, %v7117_v23  ;;  %v5556_v26 = vld [vmem:[%s6933_s7 + $0x5ac] ss:$48 sps:$4 sm:$0xff]  }
 0x10a   : > { %v1030_v55 = vadd.f32 %v1029_v44, %v7135_v29  ;;  %v1043_v56 = vadd.f32 %v1042_v45, %v7140_v30  ;;  %v5558_v44 = vld [vmem:[%s6933_s7 + $0x5a0] ss:$48 sps:$4 sm:$0xff]   ;;  %v5559_v45 = vld [vmem:[%s6933_s7 + $0x5a8] ss:$48 sps:$4 sm:$0xff]  }
 0x10b   : > { %3719 = vmatpush1.bf16.msra.mxu0 %v5522_v47  ;;  %3865 = vmatpush1.bf16.msra.mxu1 %v5523_v52  ;;  %v1055_v47 = vadd.f32 %v1054_v28, %v7122_v24  ;;  %v7166_v52 = vld [vmem:[%s8211_s2 + $0xf0] sm:$0xff] }
 0x10c   : > { %3720 = vmatprep.subr.bf16.mxu0 %v5524_v53  ;;  %3866 = vmatprep.subr.bf16.mxu1 %v5526_v57  ;;  %8226 = vst [vmem:[#allocation9_spill] sm:$0xff] %v7166_v52  ;;  %v7171_v53 = vld [vmem:[%s8211_s2 + $0xf8] sm:$0xff]  ;;  %v1044_v62 = vadd.f32 %v1043_v56, %v7166_v52 }
 0x10d   : > { %v1056_v57 = vadd.f32 %v1055_v47, %v7145_v31 }
 0x10f   : > { %3721 = vmatpush1.bf16.msra.mxu0 %v5528_v58  ;;  %3867 = vmatpush1.bf16.msra.mxu1 %v5529_v59  ;;  %v1018_v58 = vadd.f32 %v1017_v54, %v7153_v37  ;;  %v5546_v59 = vld [vmem:[%s6933_s7 + $0x4e0] ss:$48 sps:$4 sm:$0xff]   ;;  %v1057_v63 = vadd.f32 %v1056_v57, %v7171_v53  ;;  %v5562_v57 = vld [vmem:[%s6933_s7 + $0x604] ss:$48 sps:$4 sm:$0xff]  }
 0x110   : > { %3722 = vmatprep.subr.bf16.mxu0 %v5530_v61  ;;  %3868 = vmatprep.subr.bf16.mxu1 %v5532_v1  ;;  %v1031_v61 = vadd.f32 %v1030_v55, %v7161_v51  ;;  %v5550_v1 = vld [vmem:[%s6933_s7 + $0x54c] ss:$48 sps:$4 sm:$0xff]  }
 0x113   : > { %3723 = vmatpush1.bf16.msra.mxu0 %v5534_v2  ;;  %3869 = vmatpush1.bf16.msra.mxu1 %v5535_v3  ;;  %v1019_v2 = vrot.slane %v1018_v58, 4  ;;  %v1032_v3 = vrot.slane %v1031_v61, 4 }
 0x114   : > { %3724 = vmatprep.subr.bf16.mxu0 %v5536_v5  ;;  %3870 = vmatprep.subr.bf16.mxu1 %v5538_v6  ;;  %v1045_v5 = vrot.slane %v1044_v62, 4  ;;  %v1058_v6 = vrot.slane %v1057_v63, 4 }
 0x115   : > { %v1020_v10 = vadd.f32 %v1019_v2, %v1018_v58  ;;  %v1033_v16 = vadd.f32 %v1032_v3, %v1031_v61  ;;  %v5565_v58 = vld [vmem:[%s6933_s7 + $0x60c] ss:$48 sps:$4 sm:$0xff]  }
 0x116   : > { %v1046_v20 = vadd.f32 %v1045_v5, %v1044_v62 }
 0x117   : > { %3725 = vmatpush1.bf16.msra.mxu0 %v5540_v21  ;;  %3871 = vmatpush1.bf16.msra.mxu1 %v5541_v22  ;;  %v1059_v21 = vadd.f32 %v1058_v6, %v1057_v63  ;;  %v5554_v22 = vld [vmem:[%s6933_s7 + $0x5a4] ss:$48 sps:$4 sm:$0xff]   ;;  %v1021_v27 = vrot.slane %v1020_v10, 2  ;;  %v1034_v28 = vrot.slane %v1033_v16, 2 }
 0x118   : > { %3726 = vmatprep.subr.bf16.mxu0 %v5542_v33  ;;  %3872 = vmatprep.subr.bf16.mxu1 %v5544_v36  ;;  %v1047_v32 = vrot.slane %v1046_v20, 2 }
 0x119   : > { %v1060_v33 = vrot.slane %v1059_v21, 2  ;;  %v1022_v36 = vadd.f32 %v1021_v27, %v1020_v10  ;;  %v1035_v47 = vadd.f32 %v1034_v28, %v1033_v16 }
 0x11a   : > { %v1048_v54 = vadd.f32 %v1047_v32, %v1046_v20 }
 0x11b   : > { %3727 = vmatpush1.bf16.msra.mxu0 %v5546_v59  ;;  %3873 = vmatpush1.bf16.msra.mxu1 %v5547_v60  ;;  %v1061_v55 = vadd.f32 %v1060_v33, %v1059_v21  ;;  %v1023_v56 = vrot.slane %v1022_v36, 1  ;;  %v1036_v59 = vrot.slane %v1035_v47, 1 }
 0x11c   : > { %3728 = vmatprep.subr.bf16.mxu0 %v5548_v0  ;;  %3874 = vmatprep.subr.bf16.mxu1 %v5550_v1  ;;  %v1049_v60 = vrot.slane %v1048_v54, 1 }
 0x11d   : > { %v1062_v61 = vrot.slane %v1061_v55, 1  ;;  %v1024_v62 = vadd.f32 %v1023_v56, %v1022_v36  ;;  %v1037_v63 = vadd.f32 %v1036_v59, %v1035_v47 }
 0x11e   : > { %v1050_v0 = vadd.f32 %v1049_v60, %v1048_v54 }
 0x11f   : > { %3729 = vmatpush1.bf16.msra.mxu0 %v5552_v14  ;;  %3875 = vmatpush1.bf16.msra.mxu1 %v5553_v15  ;;  %v1063_v1 = vadd.f32 %v1062_v61, %v1061_v55  ;;  %v7193_v2 = vmul.f32 0.020408163, %v1024_v62  ;;  %v7195_v3 = vmul.f32 0.020408163, %v1037_v63 }
 0x120   : > { %3730 = vmatprep.subr.bf16.mxu0 %v5554_v22  ;;  %3876 = vmatprep.subr.bf16.mxu1 %v5556_v26  ;;  %v7197_v5 = vmul.f32 0.020408163, %v1050_v0 }
 0x121   : > { %v7199_v6 = vmul.f32 0.020408163, %v1063_v1  ;;  %v1068_v10 = vsub.f32 %v6972_v34, %v7193_v2  ;;  %v1072_v14 = vsub.f32 %v6977_v35, %v7193_v2  ;;  %v1076_v15 = vsub.f32 %v7016_v46, %v7193_v2 }
 0x122   : > { %v1080_v16 = vsub.f32 %v7058_v4, %v7193_v2  ;;  %v1069_v20 = vsub.f32 %v6984_v38, %v7195_v3  ;;  %v1070_v21 = vsub.f32 %v6989_v39, %v7197_v5  ;;  %v1073_v34 = vsub.f32 %v6999_v41, %v7195_v3 }
 0x123   : > { %3731 = vmatpush1.bf16.msra.mxu0 %v5558_v44  ;;  %3877 = vmatpush1.bf16.msra.mxu1 %v5559_v45  ;;  %v1071_v22 = vsub.f32 %v6994_v40, %v7199_v6  ;;  %v1074_v35 = vsub.f32 %v7004_v42, %v7197_v5  ;;  %v1075_v46 = vsub.f32 %v7009_v43, %v7199_v6 }
 0x124   : > { %3773 = vmatprep.subr.bf16.mxu0 %v5562_v57  ;;  %3919 = vmatprep.subr.bf16.mxu1 %v5565_v58  ;;  %v1077_v26 = vsub.f32 %v7022_v48, %v7195_v3  ;;  %v1078_v27 = vsub.f32 %v7027_v49, %v7197_v5  ;;  %v1079_v39 = vsub.f32 %v7032_v50, %v7199_v6 }
 0x125   : > { %v1081_v40 = vsub.f32 %v7065_v7, %v7195_v3  ;;  %v1082_v28 = vsub.f32 %v7070_v8, %v7197_v5  ;;  %v1083_v42 = vsub.f32 %v7075_v9, %v7199_v6  ;;  %v1084_v43 = vsub.f32 %v7081_v11, %v7193_v2 }
 0x126   : > { %v1085_v32 = vsub.f32 %v7086_v12, %v7195_v3  ;;  %v1086_v49 = vsub.f32 %v7091_v13, %v7197_v5  ;;  %v1087_v50 = vsub.f32 %v7099_v17, %v7199_v6  ;;  %v1088_v33 = vsub.f32 %v7104_v18, %v7193_v2 }
 0x127   : > { %v1089_v36 = vsub.f32 %v7109_v19, %v7195_v3  ;;  %v1090_v9 = vsub.f32 %v7117_v23, %v7197_v5  ;;  %v1091_v44 = vsub.f32 %v7122_v24, %v7199_v6  ;;  %v1092_v45 = vsub.f32 %v7127_v25, %v7193_v2 }
 0x128   : > { %v1093_v47 = vsub.f32 %v7135_v29, %v7195_v3  ;;  %v1094_v17 = vsub.f32 %v7140_v30, %v7197_v5  ;;  %v1095_v54 = vsub.f32 %v7145_v31, %v7199_v6  ;;  %v1100_v55 = vmul.f32 %v1068_v10, %v1068_v10 }
 0x129   : > { %v1101_v56 = vmul.f32 %v1069_v20, %v1069_v20  ;;  %v1102_v57 = vmul.f32 %v1070_v21, %v1070_v21  ;;  %v1103_v58 = vmul.f32 %v1071_v22, %v1071_v22  ;;  %v1104_v59 = vmul.f32 %v1072_v14, %v1072_v14 }
 0x12a   : > { %v1105_v60 = vmul.f32 %v1073_v34, %v1073_v34  ;;  %v1106_v61 = vmul.f32 %v1074_v35, %v1074_v35  ;;  %v1107_v24 = vmul.f32 %v1075_v46, %v1075_v46  ;;  %v1096_v25 = vsub.f32 %v7153_v37, %v7193_v2 }
 0x12b   : > { %v1097_v29 = vsub.f32 %v7161_v51, %v7195_v3  ;;  %v1098_v62 = vsub.f32 %v7166_v52, %v7197_v5  ;;  %v1099_v31 = vsub.f32 %v7171_v53, %v7199_v6  ;;  %v1108_v63 = vmul.f32 %v1076_v15, %v1076_v15 }
 0x12c   : > { %v1109_v0 = vmul.f32 %v1077_v26, %v1077_v26  ;;  %v1110_v1 = vmul.f32 %v1078_v27, %v1078_v27  ;;  %v1111_v10 = vmul.f32 %v1079_v39, %v1079_v39  ;;  %v1112_v14 = vmul.f32 %v1080_v16, %v1080_v16 }
 0x12d   : > { %v1113_v20 = vmul.f32 %v1081_v40, %v1081_v40  ;;  %v1114_v21 = vmul.f32 %v1082_v28, %v1082_v28  ;;  %v1115_v22 = vmul.f32 %v1083_v42, %v1083_v42  ;;  %v1132_v34 = vadd.f32 %v1104_v59, %v1100_v55 }
 0x12e   : > { %v1145_v35 = vadd.f32 %v1105_v60, %v1101_v56  ;;  %v1158_v37 = vadd.f32 %v1106_v61, %v1102_v57  ;;  %v1171_v46 = vadd.f32 %v1107_v24, %v1103_v58  ;;  %v1116_v30 = vmul.f32 %v1084_v43, %v1084_v43 }
 0x12f   : > { %v1117_v51 = vmul.f32 %v1085_v32, %v1085_v32  ;;  %v1118_v23 = vmul.f32 %v1086_v49, %v1086_v49  ;;  %v1119_v13 = vmul.f32 %v1087_v50, %v1087_v50  ;;  %v1133_v52 = vadd.f32 %v1132_v34, %v1108_v63 }
 0x130   : > { %v1146_v18 = vadd.f32 %v1145_v35, %v1109_v0  ;;  %v1159_v8 = vadd.f32 %v1158_v37, %v1110_v1  ;;  %v1172_v53 = vadd.f32 %v1171_v46, %v1111_v10  ;;  %v1120_v15 = vmul.f32 %v1088_v33, %v1088_v33 }
 0x131   : > { %v1121_v26 = vmul.f32 %v1089_v36, %v1089_v36  ;;  %v1122_v27 = vmul.f32 %v1090_v9, %v1090_v9  ;;  %v1123_v39 = vmul.f32 %v1091_v44, %v1091_v44  ;;  %v1134_v16 = vadd.f32 %v1133_v52, %v1112_v14 }
 0x132   : > { %v1147_v40 = vadd.f32 %v1146_v18, %v1113_v20  ;;  %v1160_v28 = vadd.f32 %v1159_v8, %v1114_v21  ;;  %v1173_v42 = vadd.f32 %v1172_v53, %v1115_v22  ;;  %v1124_v55 = vmul.f32 %v1092_v45, %v1092_v45 }
 0x133   : > { %v1125_v56 = vmul.f32 %v1093_v47, %v1093_v47  ;;  %v1126_v57 = vmul.f32 %v1094_v17, %v1094_v17  ;;  %v1127_v58 = vmul.f32 %v1095_v54, %v1095_v54  ;;  %v1135_v43 = vadd.f32 %v1134_v16, %v1116_v30 }
 0x134   : > { %v1148_v32 = vadd.f32 %v1147_v40, %v1117_v51  ;;  %v1161_v49 = vadd.f32 %v1160_v28, %v1118_v23  ;;  %v1174_v50 = vadd.f32 %v1173_v42, %v1119_v13  ;;  %v1128_v59 = vmul.f32 %v1096_v25, %v1096_v25 }
 0x135   : > { %v1129_v60 = vmul.f32 %v1097_v29, %v1097_v29  ;;  %v1130_v61 = vmul.f32 %v1098_v62, %v1098_v62  ;;  %v1131_v24 = vmul.f32 %v1099_v31, %v1099_v31  ;;  %v1136_v33 = vadd.f32 %v1135_v43, %v1120_v15 }
 0x136   : > { %v1149_v36 = vadd.f32 %v1148_v32, %v1121_v26  ;;  %v1162_v9 = vadd.f32 %v1161_v49, %v1122_v27  ;;  %v1175_v44 = vadd.f32 %v1174_v50, %v1123_v39  ;;  %v1184_v25 = vmul.f32 %v7193_v2, %v7193_v2 }
 0x137   : > { %v1137_v52 = vadd.f32 %v1136_v33, %v1124_v55  ;;  %v1185_v10 = vmul.f32 %v7195_v3, %v7195_v3  ;;  %v1186_v14 = vmul.f32 %v7197_v5, %v7197_v5  ;;  %v1187_v20 = vmul.f32 %v7199_v6, %v7199_v6 }
 0x138   : > { %v1150_v18 = vadd.f32 %v1149_v36, %v1125_v56  ;;  %v1163_v8 = vadd.f32 %v1162_v9, %v1126_v57  ;;  %v1176_v63 = vadd.f32 %v1175_v44, %v1127_v58  ;;  %v1188_v37 = vmul.f32 15.0, %v1184_v25 }
 0x139   : > { %v1138_v45 = vadd.f32 %v1137_v52, %v1128_v59  ;;  %v1189_v26 = vmul.f32 15.0, %v1185_v10  ;;  %v1190_v27 = vmul.f32 15.0, %v1186_v14  ;;  %v1191_v39 = vmul.f32 15.0, %v1187_v20 }
 0x13a   : > { %v1151_v47 = vadd.f32 %v1150_v18, %v1129_v60  ;;  %v1164_v17 = vadd.f32 %v1163_v8, %v1130_v61  ;;  %v1177_v54 = vadd.f32 %v1176_v63, %v1131_v24  ;;  %v6090_v52 = vmov 1966171168  }
 0x13b   : > { %v1139_v30 = vrot.slane %v1138_v45, 4  ;;  %v1216_v18 = vunpack.c.l.s4 %v6090_v52  ;;  %v1218_v8 = vlaneseq  ;;  %v5563_v52 = vld [vmem:[%s6933_s7 + $0x608] ss:$48 sps:$4 sm:$0xff]  }
 0x13c   : > { %v1152_v0 = vrot.slane %v1151_v47, 4  ;;  %v1165_v23 = vrot.slane %v1164_v17, 4  ;;  %v1178_v13 = vrot.slane %v1177_v54, 4 }
 0x13d   : > { %v1140_v29 = vadd.f32 %v1139_v30, %v1138_v45  ;;  %v1217_v63 = vunpack.c.0.s8 %v1216_v18  ;;  %v7273_v45 = vshrl.u32 %v1218_v8, 7  ;;  %v5568_v8 = vld [vmem:[%s6933_s7 + $0x664] ss:$48 sps:$4 sm:$0xff]  }
 0x13e   : > { %v1153_v62 = vadd.f32 %v1152_v0, %v1151_v47  ;;  %v1166_v31 = vadd.f32 %v1165_v23, %v1164_v17  ;;  %v1179_v1 = vadd.f32 %v1178_v13, %v1177_v54 }
 0x13f   : > { %v1141_v21 = vrot.slane %v1140_v29, 2  ;;  %v1220_v17 = vsub.s32 %v1217_v63, %v7273_v45  ;;  %v1247_v14 = vsub.s32 1, %v7273_v45  ;;  %v1251_v20 = vsub.s32 2, %v7273_v45  ;;  %v5571_v63 = vld [vmem:[%s6933_s7 + $0x66c] ss:$48 sps:$4 sm:$0xff]  }
 0x140   : > { %v1154_v22 = vrot.slane %v1153_v62, 2  ;;  %v1167_v34 = vrot.slane %v1166_v31, 2  ;;  %v1180_v35 = vrot.slane %v1179_v1, 2 }
 0x141   : > { %v1142_v46 = vadd.f32 %v1141_v21, %v1140_v29  ;;  %v1255_v21 = vsub.s32 3, %v7273_v45 }
 0x142   : > { %v1155_v51 = vadd.f32 %v1154_v22, %v1153_v62  ;;  %v1168_v53 = vadd.f32 %v1167_v34, %v1166_v31  ;;  %v1181_v15 = vadd.f32 %v1180_v35, %v1179_v1  ;;  %v1208_v31 = vld [vmem:[%s8209_s0] sm:$0xf]  ;;  %v1243_v1 = vsub.s32 0, %v7273_v45  ;;  %v5598_v45 = vld [vmem:[%s6933_s7 + $0x844] ss:$48 sps:$4 sm:$0xff]  }
 0x143   : > { %v1143_v16 = vrot.slane %v1142_v46, 1 }
 0x144   : > { %v1156_v40 = vrot.slane %v1155_v51, 1  ;;  %v1169_v28 = vrot.slane %v1168_v53, 1  ;;  %v1182_v42 = vrot.slane %v1181_v15, 1 }
 0x145   : > { %v1144_v55 = vadd.f32 %v1143_v16, %v1142_v46 }
 0x146   : > { %v1157_v56 = vadd.f32 %v1156_v40, %v1155_v51  ;;  %v1170_v57 = vadd.f32 %v1169_v28, %v1168_v53  ;;  %v1183_v58 = vadd.f32 %v1182_v42, %v1181_v15  ;;  %v1239_v28 = vld [vmem:[%s8210_s1] sm:$0xf] }
 0x147   : > { %v1192_v43 = vsub.f32 %v1144_v55, %v1188_v37 }
 0x148   : > { %v1193_v32 = vsub.f32 %v1157_v56, %v1189_v26  ;;  %v1194_v49 = vsub.f32 %v1170_v57, %v1190_v27  ;;  %v1195_v50 = vsub.f32 %v1183_v58, %v1191_v39  ;;  %v6049_v57 = vld [vmem:[%s8211_s2 + $0x20] sm:$0xff] }
 0x149   : > { %v1196_v59 = vmul.f32 0.020408163, %v1192_v43 }
 0x14a   : > { %v1197_v60 = vmul.f32 0.020408163, %v1193_v32  ;;  %v1198_v61 = vmul.f32 0.020408163, %v1194_v49  ;;  %v1199_v24 = vmul.f32 0.020408163, %v1195_v50 }
 0x14b   : > { %v1200_v33 = vadd.f32 0.001, %v1196_v59 }
 0x14c   : > { %v1201_v36 = vadd.f32 0.001, %v1197_v60  ;;  %v1202_v9 = vadd.f32 0.001, %v1198_v61  ;;  %v1203_v44 = vadd.f32 0.001, %v1199_v24 }
 0x14d   : > { %6040 = vrsqrt.f32 %v1200_v33  ;;  %v6050_v24 = vld [vmem:[%s8211_s2 + $0x40] sm:$0xff] }
 0x14e   : > { %6042 = vrsqrt.f32 %v1201_v36 }
 0x14f   : > { %6044 = vrsqrt.f32 %v1202_v9 }
 0x150   : > { %6046 = vrsqrt.f32 %v1203_v44  ;;  %v5560_v44 = vld [vmem:[%s6933_s7 + $0x600] ss:$48 sps:$4 sm:$0xff]  }
 0x157   : > { %v6041_v47 = vpop.eup %6040 }
 0x158   : > { %v6043_v54 = vpop.eup %6042 }
 0x159   : > { %v6045_v30 = vpop.eup %6044  ;;  %v1213_v0 = vcombine.low %v6041_v47, %v6043_v54  ;;  %v6051_v54 = vld [vmem:[%s8211_s2 + $0x10] sm:$0xff] }
 0x15a   : > { %v6047_v23 = vpop.eup %6046 }
 0x15b   : > { %v1214_v13 = vcombine.low %v6045_v30, %v6047_v23  ;;  %v1221_v25 = vrot.slane %v1213_v0, %v1220_v17  ;;  %v6052_v30 = vld [vmem:[%s8211_s2 + $0x30] sm:$0xff] }
 0x15c   : > { %v6053_v23 = vld [vmem:[%s8211_s2 + $0x50] sm:$0xff] }
 0x15d   : > { %v1228_v29 = vrot.slane %v1214_v13, %v1220_v17 }
 0x15f   : > { %v1229_v62 = vcombine.low %v1221_v25, %v1228_v29 }
 0x161   : > { %v1236_v10 = vrot.slane %v1229_v62, %v1220_v17  ;;  %v8227_v62 = vld [vmem:[#allocation4_spill] sm:$0xff] }
 0x163   : > { %v1238_v22 = vmul.f32 %v1236_v10, %v1208_v31  ;;  %v8228_v10 = vld [vmem:[#allocation6_spill] sm:$0xff] }
 0x165   : > { %v7283_v34 = vrot.slane %v1238_v22, %v1243_v1  ;;  %v7285_v35 = vrot.slane %v1238_v22, %v1247_v14  ;;  %v7287_v37 = vrot.slane %v1238_v22, %v1251_v20  ;;  %v7291_v46 = vrot.slane %v1238_v22, %v1255_v21 }
 0x167   : > { %v1261_v51 = vmul.f32 %v7283_v34, %v7193_v2  ;;  %v1262_v53 = vmul.f32 %v7285_v35, %v7195_v3  ;;  %v1263_v15 = vmul.f32 %v7287_v37, %v7197_v5  ;;  %v1264_v26 = vmul.f32 %v7291_v46, %v7199_v6  ;;  %v6048_v6 = vld [vmem:[%s8211_s2] sm:$0xff] }
 0x168   : > { %v1296_v2 = vmul.f32 %v7285_v35, %v6984_v38  ;;  %v1300_v5 = vmul.f32 %v7285_v35, %v6999_v41  ;;  %v1295_v56 = vmul.f32 %v6048_v6, %v7283_v34  ;;  %v1299_v58 = vmul.f32 %v6049_v57, %v7283_v34 }
 0x169   : > { %v1269_v27 = vcombine.low %v1261_v51, %v1262_v53  ;;  %v1270_v39 = vcombine.low %v1263_v15, %v1264_v26  ;;  %v1304_v38 = vmul.f32 %v7285_v35, %v7022_v48  ;;  %v1308_v41 = vmul.f32 %v7285_v35, %v7065_v7  ;;  %v8230_v51 = vld [vmem:[#allocation7_spill] sm:$0xff]  ;;  %v5574_v15 = vld [vmem:[%s6933_s7 + $0x6c4] ss:$48 sps:$4 sm:$0xff]  }
 0x16a   : > { %v1303_v33 = vmul.f32 %v6050_v24, %v7283_v34  ;;  %v1307_v36 = vmul.f32 %v7283_v34, %v7058_v4  ;;  %v1312_v47 = vmul.f32 %v7285_v35, %v7086_v12  ;;  %v1297_v4 = vmul.f32 %v6051_v54, %v7287_v37  ;;  %v5577_v26 = vld [vmem:[%s6933_s7 + $0x6cc] ss:$48 sps:$4 sm:$0xff]  }
 0x16b   : > { %v1277_v16 = vrot.slane %v1269_v27, %v1220_v17  ;;  %v1284_v40 = vrot.slane %v1270_v39, %v1220_v17  ;;  %v1301_v0 = vmul.f32 %v6052_v30, %v7287_v37  ;;  %v1305_v13 = vmul.f32 %v6053_v23, %v7287_v37  ;;  %v6055_v24 = vld [vmem:[%s8211_s2 + $0xe8] sm:$0xff] }
 0x16c   : > { %v1309_v31 = vmul.f32 %v7287_v37, %v8227_v62  ;;  %v1317_v53 = vmul.f32 %v7287_v37, %v8230_v51  ;;  %v5589_v54 = vld [vmem:[%s6933_s7 + $0x78c] ss:$48 sps:$4 sm:$0xff]   ;;  %v5587_v62 = vld [vmem:[%s6933_s7 + $0x788] ss:$48 sps:$4 sm:$0xff]  }
 0x16d   : > { %v1285_v42 = vcombine.low %v1277_v16, %v1284_v40  ;;  %v8231_v16 = vld [vmem:[#allocation8_spill] sm:$0xff] }
 0x16e   : > { %v1321_v40 = vmul.f32 %v7287_v37, %v8231_v16  ;;  %v5604_v16 = vld [vmem:[%s6933_s7 + $0x8a4] ss:$48 sps:$4 sm:$0xff]  }
 0x16f   : > { %v1292_v55 = vrot.slane %v1285_v42, %v1220_v17  ;;  %v1316_v17 = vmul.f32 %v7285_v35, %v7109_v19  ;;  %v1311_v19 = vmul.f32 %v7283_v34, %v7081_v11  ;;  %v5566_v11 = vld [vmem:[%s6933_s7 + $0x660] ss:$48 sps:$4 sm:$0xff]  }
 0x171   : > { %v7306_v3 = vsub.f32 %v1239_v28, %v1292_v55  ;;  %v8232_v55 = vld [vmem:[#allocation9_spill] sm:$0xff] }
 0x173   : > { %v7323_v43 = vrot.slane %v7306_v3, %v1247_v14  ;;  %v7326_v32 = vrot.slane %v7306_v3, %v1243_v1  ;;  %v7329_v49 = vrot.slane %v7306_v3, %v1251_v20  ;;  %v5569_v1 = vld [vmem:[%s6933_s7 + $0x668] ss:$48 sps:$4 sm:$0xff]   ;;  %v1315_v14 = vmul.f32 %v7283_v34, %v8228_v10 }
 0x174   : > { %v8229_v20 = vld [vmem:[#allocation5_spill] sm:$0xff]  ;;  %v6059_v10 = vld [vmem:[%s8211_s2 + $0x38] sm:$0xff] }
 0x175   : > { %v1349_v50 = vadd.f32 %v7323_v43, %v1296_v2  ;;  %v1353_v59 = vadd.f32 %v7323_v43, %v1300_v5  ;;  %v1348_v48 = vadd.f32 %v7326_v32, %v1295_v56  ;;  %v1352_v60 = vadd.f32 %v7326_v32, %v1299_v58  ;;  %v5572_v58 = vld [vmem:[%s6933_s7 + $0x6c0] ss:$48 sps:$4 sm:$0xff]  }
 0x176   : > { %v1357_v7 = vadd.f32 %v7323_v43, %v1304_v38  ;;  %v1361_v61 = vadd.f32 %v7323_v43, %v1308_v41  ;;  %v1356_v25 = vadd.f32 %v7326_v32, %v1303_v33  ;;  %v1360_v29 = vadd.f32 %v7326_v32, %v1307_v36  ;;  %v5575_v38 = vld [vmem:[%s6933_s7 + $0x6c8] ss:$48 sps:$4 sm:$0xff]  }
 0x177   : > { %v7343_v9 = vpack.c.bf16 %v1353_v59, %v1349_v50  ;;  %v7347_v18 = vpack.c.bf16 %v1352_v60, %v1348_v48  ;;  %v1313_v22 = vmul.f32 %v7287_v37, %v8229_v20  ;;  %v1350_v27 = vadd.f32 %v7329_v49, %v1297_v4  ;;  %v5580_v50 = vld [vmem:[%s6933_s7 + $0x724] ss:$48 sps:$4 sm:$0xff]   ;;  %v5583_v59 = vld [vmem:[%s6933_s7 + $0x72c] ss:$48 sps:$4 sm:$0xff]  }
 0x178   : > { %v7365_v12 = vpack.c.bf16 %v1361_v61, %v1357_v7  ;;  %v1354_v39 = vadd.f32 %v7329_v49, %v1301_v0  ;;  %v1365_v28 = vadd.f32 %v7323_v43, %v1312_v47  ;;  %v1369_v42 = vadd.f32 %v7323_v43, %v1316_v17  ;;  %v5578_v47 = vld [vmem:[%s6933_s7 + $0x720] ss:$48 sps:$4 sm:$0xff]   ;;  %v5581_v17 = vld [vmem:[%s6933_s7 + $0x728] ss:$48 sps:$4 sm:$0xff]  }
 0x179   : > { %3732 = vmatprep.mubr.bf16.mxu0 %v7343_v9  ;;  %3878 = vmatprep.mubr.bf16.mxu1 %v7343_v9  ;;  %v1325_v2 = vmul.f32 %v7287_v37, %v8232_v55  ;;  %v7399_v5 = vpack.c.bf16 %v1360_v29, %v1356_v25  ;;  %v1358_v56 = vadd.f32 %v7329_v49, %v1305_v13  ;;  %v6054_v37 = vld [vmem:[%s8211_s2 + $0xc8] sm:$0xff]  ;;  %v6057_v13 = vld [vmem:[%s8211_s2 + $0xe0] sm:$0xff] }
 0x17a   : > { %3733 = vmatmul.mubr.bf16.vlgmr.msra.gmra.mrb[0].mxu0 %v7347_v18  ;;  %3879 = vmatmul.mubr.bf16.vlgmr.msra.gmra.mrb[0].mxu1 %v7347_v18  ;;  %v7401_v6 = vpack.c.bf16 %v1354_v39, %v1350_v27  ;;  %v1362_v57 = vadd.f32 %v7329_v49, %v1309_v31  ;;  %v1366_v41 = vadd.f32 %v7329_v49, %v1313_v22  ;;  %v5584_v29 = vld [vmem:[%s6933_s7 + $0x780] ss:$48 sps:$4 sm:$0xff]   ;;  %v5595_v31 = vld [vmem:[%s6933_s7 + $0x7ec] ss:$48 sps:$4 sm:$0xff]   ;;  %v5599_v39 = vld [vmem:[%s6933_s7 + $0x848] ss:$48 sps:$4 sm:$0xff]  }
 0x17b   : > { %3774 = vmatpush1.bf16.msra.mxu0 %v5560_v44  ;;  %3920 = vmatpush1.bf16.msra.mxu1 %v5563_v52  ;;  %v1320_v48 = vmul.f32 %v6054_v37, %v7285_v35  ;;  %v1370_v7 = vadd.f32 %v7329_v49, %v1317_v53  ;;  %v7417_v61 = vpack.c.bf16 %v1369_v42, %v1365_v28  ;;  %v5590_v53 = vld [vmem:[%s6933_s7 + $0x7e0] ss:$48 sps:$4 sm:$0xff]   ;;  %v5605_v55 = vld [vmem:[%s6933_s7 + $0x8a8] ss:$48 sps:$4 sm:$0xff]   ;;  %v5622_v37 = vld [vmem:[%s6933_s7 + $0x9c4] ss:$48 sps:$4 sm:$0xff]  }
 0x17c   : > { %3775 = vmatprep.subr.bf16.mxu0 %v5568_v8  ;;  %3921 = vmatprep.subr.bf16.mxu1 %v5571_v63  ;;  %v7414_v60 = vpack.c.bf16 %v1362_v57, %v1358_v56  ;;  %v1324_v33 = vmul.f32 %v6055_v24, %v7285_v35  ;;  %v1374_v36 = vadd.f32 %v7329_v49, %v1321_v40  ;;  %v5596_v27 = vld [vmem:[%s6933_s7 + $0x840] ss:$48 sps:$4 sm:$0xff]   ;;  %v5607_v40 = vld [vmem:[%s6933_s7 + $0x8ac] ss:$48 sps:$4 sm:$0xff]   ;;  %v5623_v24 = vld [vmem:[%s6933_s7 + $0x9c8] ss:$48 sps:$4 sm:$0xff]  }
 0x17d   : > { %3742 = vmatprep.mubr.bf16.mxu0 %v7365_v12  ;;  %3888 = vmatprep.mubr.bf16.mxu1 %v7365_v12  ;;  %v1378_v44 = vadd.f32 %v7329_v49, %v1325_v2  ;;  %v1364_v52 = vadd.f32 %v7326_v32, %v1311_v19  ;;  %v1368_v8 = vadd.f32 %v7326_v32, %v1315_v14  ;;  %v5586_v49 = vld [vmem:[%s6933_s7 + $0x784] ss:$48 sps:$4 sm:$0xff]   ;;  %v5602_v42 = vld [vmem:[%s6933_s7 + $0x8a0] ss:$48 sps:$4 sm:$0xff]   ;;  %v5613_v56 = vld [vmem:[%s6933_s7 + $0x90c] ss:$48 sps:$4 sm:$0xff]  }
 0x17e   : > { %v7429_v63 = vpack.c.bf16 %v1370_v7, %v1366_v41  ;;  %v1373_v4 = vadd.f32 %v7323_v43, %v1320_v48  ;;  %v1377_v30 = vadd.f32 %v7323_v43, %v1324_v33  ;;  %v6056_v19 = vld [vmem:[%s8211_s2 + $0xc0] sm:$0xff]  ;;  %v1323_v25 = vmul.f32 %v6057_v13, %v7283_v34  ;;  %v5619_v41 = vld [vmem:[%s6933_s7 + $0x96c] ss:$48 sps:$4 sm:$0xff]  }
 0x17f   : > { %3776 = vmatpush1.bf16.msra.mxu0 %v5566_v11  ;;  %3922 = vmatpush1.bf16.msra.mxu1 %v5569_v1  ;;  %v7433_v35 = vpack.c.bf16 %v1378_v44, %v1374_v36  ;;  %v7441_v0 = vpack.c.bf16 %v1368_v8, %v1364_v52  ;;  %v1319_v23 = vmul.f32 %v6056_v19, %v7283_v34  ;;  %v5592_v43 = vld [vmem:[%s6933_s7 + $0x7e4] ss:$48 sps:$4 sm:$0xff]   ;;  %v6058_v1 = vld [vmem:[%s8211_s2 + $0x18] sm:$0xff]  ;;  %v5608_v57 = vld [vmem:[%s6933_s7 + $0x900] ss:$48 sps:$4 sm:$0xff]  }
 0x180   : > { %3777 = vmatprep.subr.bf16.mxu0 %v5574_v15  ;;  %3923 = vmatprep.subr.bf16.mxu1 %v5577_v26  ;;  %v7455_v11 = vpack.c.bf16 %v1377_v30, %v1373_v4  ;;  %v1298_v34 = vmul.f32 %v6058_v1, %v7291_v46  ;;  %v1302_v14 = vmul.f32 %v6059_v10, %v7291_v46  ;;  %v5593_v15 = vld [vmem:[%s6933_s7 + $0x7e8] ss:$48 sps:$4 sm:$0xff]   ;;  %v5610_v2 = vld [vmem:[%s6933_s7 + $0x904] ss:$48 sps:$4 sm:$0xff]   ;;  %v5625_v48 = vld [vmem:[%s6933_s7 + $0x9cc] ss:$48 sps:$4 sm:$0xff]  }
 0x181   : > { %v7468_v20 = vrot.slane %v7306_v3, %v1255_v21  ;;  %v1372_v22 = vadd.f32 %v7326_v32, %v1319_v23  ;;  %v1376_v51 = vadd.f32 %v7326_v32, %v1323_v25  ;;  %v5601_v21 = vld [vmem:[%s6933_s7 + $0x84c] ss:$48 sps:$4 sm:$0xff]   ;;  %v5620_v7 = vld [vmem:[%s6933_s7 + $0x9c0] ss:$48 sps:$4 sm:$0xff]   ;;  %v5628_v33 = vld [vmem:[%s6933_s7 + $0xa24] ss:$48 sps:$4 sm:$0xff]  }
 0x182   : > { %3743 = vmatmul.mubr.bf16.gmra.mrb[4].mxu0 %v7399_v5  ;;  %3889 = vmatmul.mubr.bf16.gmra.mrb[4].mxu1 %v7399_v5  ;;  %v5631_v36 = vld [vmem:[%s6933_s7 + $0xa2c] ss:$48 sps:$4 sm:$0xff]   ;;  %v5626_v44 = vld [vmem:[%s6933_s7 + $0xa20] ss:$48 sps:$4 sm:$0xff]   ;;  %v5629_v52 = vld [vmem:[%s6933_s7 + $0xa28] ss:$48 sps:$4 sm:$0xff]  }
 0x183   : > { %3778 = vmatpush1.bf16.msra.mxu0 %v5572_v58  ;;  %3924 = vmatpush1.bf16.msra.mxu1 %v5575_v38  ;;  %v1351_v3 = vadd.f32 %v7468_v20, %v1298_v34  ;;  %v1355_v32 = vadd.f32 %v7468_v20, %v1302_v14  ;;  %v7482_v26 = vpack.c.bf16 %v1376_v51, %v1372_v22  ;;  %v5611_v58 = vld [vmem:[%s6933_s7 + $0x908] ss:$48 sps:$4 sm:$0xff]   ;;  %v5616_v38 = vld [vmem:[%s6933_s7 + $0x964] ss:$48 sps:$4 sm:$0xff]   ;;  %v5643_v4 = vld [vmem:[%s6933_s7 + $0xaec] ss:$48 sps:$4 sm:$0xff]  }
 0x184   : > { %3779 = vmatprep.subr.bf16.mxu0 %v5580_v50  ;;  %3925 = vmatprep.subr.bf16.mxu1 %v5583_v59  ;;  %v5614_v50 = vld [vmem:[%s6933_s7 + $0x960] ss:$48 sps:$4 sm:$0xff]   ;;  %v5617_v59 = vld [vmem:[%s6933_s7 + $0x968] ss:$48 sps:$4 sm:$0xff]   ;;  %v5634_v8 = vld [vmem:[%s6933_s7 + $0xa84] ss:$48 sps:$4 sm:$0xff]  }
 0x185   : > { %3752 = vmatprep.mubr.bf16.mxu0 %v7417_v61  ;;  %3898 = vmatprep.mubr.bf16.mxu1 %v7417_v61  ;;  %v7488_v28 = vpack.c.bf16 %v1355_v32, %v1351_v3  ;;  %v5638_v30 = vld [vmem:[%s6933_s7 + $0xae0] ss:$48 sps:$4 sm:$0xff]   ;;  %v5641_v19 = vld [vmem:[%s6933_s7 + $0xae8] ss:$48 sps:$4 sm:$0xff]   ;;  %v5646_v23 = vld [vmem:[%s6933_s7 + $0xb44] ss:$48 sps:$4 sm:$0xff]  }
 0x186   : > { %v5649_v13 = vld [vmem:[%s6933_s7 + $0xb4c] ss:$48 sps:$4 sm:$0xff]   ;;  %v5644_v25 = vld [vmem:[%s6933_s7 + $0xb40] ss:$48 sps:$4 sm:$0xff]   ;;  %v5653_v22 = vld [vmem:[%s6933_s7 + $0xba8] ss:$48 sps:$4 sm:$0xff]  }
 0x187   : > { %3780 = vmatpush1.bf16.msra.mxu0 %v5578_v47  ;;  %3926 = vmatpush1.bf16.msra.mxu1 %v5581_v17  ;;  %v5637_v47 = vld [vmem:[%s6933_s7 + $0xa8c] ss:$48 sps:$4 sm:$0xff]   ;;  %v5632_v17 = vld [vmem:[%s6933_s7 + $0xa80] ss:$48 sps:$4 sm:$0xff]   ;;  %v5658_v51 = vld [vmem:[%s6933_s7 + $0x14] ss:$48 sps:$4 sm:$0xff]  }
 0x188   : > { %3781 = vmatprep.subr.bf16.mxu0 %v5586_v49  ;;  %3927 = vmatprep.subr.bf16.mxu1 %v5589_v54  ;;  %v5635_v49 = vld [vmem:[%s6933_s7 + $0xa88] ss:$48 sps:$4 sm:$0xff]   ;;  %v5640_v54 = vld [vmem:[%s6933_s7 + $0xae4] ss:$48 sps:$4 sm:$0xff]   ;;  %v5650_v14 = vld [vmem:[%s6933_s7 + $0xba0] ss:$48 sps:$4 sm:$0xff]  }
 0x189   : > { %v6061_v34 = vld [vmem:[%s8211_s2 + $0x78] sm:$0xff]  ;;  %v5664_v32 = vld [vmem:[%s6933_s7 + $0x74] ss:$48 sps:$4 sm:$0xff]  }
 0x18a   : > { %3753 = vmatmul.mubr.bf16.gmra.mrb[8].mxu0 %v7441_v0  ;;  %3899 = vmatmul.mubr.bf16.gmra.mrb[8].mxu1 %v7441_v0  ;;  %v1310_v10 = vmul.f32 %v6061_v34, %v7291_v46  ;;  %v5698_v34 = vld [vmem:[%s6933_s7 + $0x2b0] ss:$48 sps:$4 sm:$0xff]  }
 0x18b   : > { %3782 = vmatpush1.bf16.msra.mxu0 %v5584_v29  ;;  %3928 = vmatpush1.bf16.msra.mxu1 %v5587_v62  ;;  %v5647_v29 = vld [vmem:[%s6933_s7 + $0xb48] ss:$48 sps:$4 sm:$0xff]   ;;  %v5652_v62 = vld [vmem:[%s6933_s7 + $0xba4] ss:$48 sps:$4 sm:$0xff]  }
 0x18c   : > { %3783 = vmatprep.subr.bf16.mxu0 %v5592_v43  ;;  %3929 = vmatprep.subr.bf16.mxu1 %v5595_v31  ;;  %v5655_v43 = vld [vmem:[%s6933_s7 + $0xbac] ss:$48 sps:$4 sm:$0xff]   ;;  %v1363_v3 = vadd.f32 %v7468_v20, %v1310_v10  ;;  %v5701_v10 = vld [vmem:[%s6933_s7 + $0x2b8] ss:$48 sps:$4 sm:$0xff]  }
 0x18d   : > { %3762 = vmatprep.mubr.bf16.mxu0 %v7455_v11  ;;  %3908 = vmatprep.mubr.bf16.mxu1 %v7455_v11  ;;  %v6060_v31 = vld [vmem:[%s8211_s2 + $0x58] sm:$0xff] }
 0x18e   : > { %v1306_v1 = vmul.f32 %v6060_v31, %v7291_v46  ;;  %v5700_v31 = vld [vmem:[%s6933_s7 + $0x2b4] ss:$48 sps:$4 sm:$0xff]  }
 0x18f   : > { %3784 = vmatpush1.bf16.msra.mxu0 %v5590_v53  ;;  %3930 = vmatpush1.bf16.msra.mxu1 %v5593_v15  ;;  %v5661_v53 = vld [vmem:[%s6933_s7 + $0x1c] ss:$48 sps:$4 sm:$0xff]   ;;  %v5656_v15 = vld [vmem:[%s6933_s7 + $0x10] ss:$48 sps:$4 sm:$0xff]  }
 0x190   : > { %3785 = vmatprep.subr.bf16.mxu0 %v5598_v45  ;;  %3931 = vmatprep.subr.bf16.mxu1 %v5601_v21  ;;  %v5659_v45 = vld [vmem:[%s6933_s7 + $0x18] ss:$48 sps:$4 sm:$0xff]   ;;  %v1359_v21 = vadd.f32 %v7468_v20, %v1306_v1  ;;  %v5703_v1 = vld [vmem:[%s6933_s7 + $0x2bc] ss:$48 sps:$4 sm:$0xff]  }
 0x192   : > { %3763 = vmatmul.mubr.bf16.gmra.mrb[12].mxu0 %v7482_v26  ;;  %3909 = vmatmul.mubr.bf16.gmra.mrb[12].mxu1 %v7482_v26 }
 0x193   : > { %3786 = vmatpush1.bf16.msra.mxu0 %v5596_v27  ;;  %3932 = vmatpush1.bf16.msra.mxu1 %v5599_v39  ;;  %v5667_v27 = vld [vmem:[%s6933_s7 + $0x7c] ss:$48 sps:$4 sm:$0xff]   ;;  %v7544_v39 = vpack.c.bf16 %v1363_v3, %v1359_v21  ;;  %v5710_v21 = vld [vmem:[%s6933_s7 + $0x370] ss:$48 sps:$4 sm:$0xff]   ;;  %v5713_v3 = vld [vmem:[%s6933_s7 + $0x378] ss:$48 sps:$4 sm:$0xff]  }
 0x194   : > { %3787 = vmatprep.subr.bf16.mxu0 %v5604_v16  ;;  %3933 = vmatprep.subr.bf16.mxu1 %v5607_v40  ;;  %v6062_v16 = vld [vmem:[%s8211_s2 + $0x98] sm:$0xff] }
 0x195   : > { %3805 = vmatprep.mubr.bf16.mxu0 %v7488_v28  ;;  %3951 = vmatprep.mubr.bf16.mxu1 %v7488_v28  ;;  %v1314_v40 = vmul.f32 %v6062_v16, %v7291_v46  ;;  %v5716_v16 = vld [vmem:[%s6933_s7 + $0x3d0] ss:$48 sps:$4 sm:$0xff]  }
 0x197   : > { %3788 = vmatpush1.bf16.msra.mxu0 %v5602_v42  ;;  %3934 = vmatpush1.bf16.msra.mxu1 %v5605_v55  ;;  %v6063_v42 = vld [vmem:[%s8211_s2 + $0xb8] sm:$0xff] }
 0x198   : > { %3789 = vmatprep.subr.bf16.mxu0 %v5610_v2  ;;  %3935 = vmatprep.subr.bf16.mxu1 %v5613_v56  ;;  %v1318_v55 = vmul.f32 %v6063_v42, %v7291_v46  ;;  %v5662_v2 = vld [vmem:[%s6933_s7 + $0x70] ss:$48 sps:$4 sm:$0xff]   ;;  %v5665_v56 = vld [vmem:[%s6933_s7 + $0x78] ss:$48 sps:$4 sm:$0xff]   ;;  %v5724_v42 = vld [vmem:[%s6933_s7 + $0x434] ss:$48 sps:$4 sm:$0xff]  }
 0x19b   : > { %3790 = vmatpush1.bf16.msra.mxu0 %v5608_v57  ;;  %3936 = vmatpush1.bf16.msra.mxu1 %v5611_v58  ;;  %v5670_v57 = vld [vmem:[%s6933_s7 + $0xd4] ss:$48 sps:$4 sm:$0xff]   ;;  %v5673_v58 = vld [vmem:[%s6933_s7 + $0xdc] ss:$48 sps:$4 sm:$0xff]  }
 0x19c   : > { %3791 = vmatprep.subr.bf16.mxu0 %v5616_v38  ;;  %3937 = vmatprep.subr.bf16.mxu1 %v5619_v41  ;;  %v1367_v38 = vadd.f32 %v7468_v20, %v1314_v40  ;;  %v1371_v41 = vadd.f32 %v7468_v20, %v1318_v55  ;;  %v5719_v40 = vld [vmem:[%s6933_s7 + $0x3d8] ss:$48 sps:$4 sm:$0xff]   ;;  %v5727_v55 = vld [vmem:[%s6933_s7 + $0x43c] ss:$48 sps:$4 sm:$0xff]  }
 0x19f   : > { %3792 = vmatpush1.bf16.msra.mxu0 %v5614_v50  ;;  %3938 = vmatpush1.bf16.msra.mxu1 %v5617_v59  ;;  %v5668_v50 = vld [vmem:[%s6933_s7 + $0xd0] ss:$48 sps:$4 sm:$0xff]   ;;  %v5671_v59 = vld [vmem:[%s6933_s7 + $0xd8] ss:$48 sps:$4 sm:$0xff]  }
 0x1a0   : > { %3793 = vmatprep.subr.bf16.mxu0 %v5622_v37  ;;  %3939 = vmatprep.subr.bf16.mxu1 %v5625_v48  ;;  %v5676_v37 = vld [vmem:[%s6933_s7 + $0x134] ss:$48 sps:$4 sm:$0xff]   ;;  %v5679_v48 = vld [vmem:[%s6933_s7 + $0x13c] ss:$48 sps:$4 sm:$0xff]  }
 0x1a3   : > { %3794 = vmatpush1.bf16.msra.mxu0 %v5620_v7  ;;  %3940 = vmatpush1.bf16.msra.mxu1 %v5623_v24  ;;  %v7568_v7 = vpack.c.bf16 %v1371_v41, %v1367_v38  ;;  %v6064_v24 = vld [vmem:[%s8211_s2 + $0xd8] sm:$0xff]  ;;  %v5728_v38 = vld [vmem:[%s6933_s7 + $0x490] ss:$48 sps:$4 sm:$0xff]  }
 0x1a4   : > { %3795 = vmatprep.subr.bf16.mxu0 %v5628_v33  ;;  %3941 = vmatprep.subr.bf16.mxu1 %v5631_v36  ;;  %v1322_v33 = vmul.f32 %v6064_v24, %v7291_v46  ;;  %v6065_v36 = vld [vmem:[%s8211_s2 + $0xf8] sm:$0xff]  ;;  %v5742_v24 = vld [vmem:[%s6933_s7 + $0x554] ss:$48 sps:$4 sm:$0xff]  }
 0x1a5   : > { %v5731_v41 = vld [vmem:[%s6933_s7 + $0x498] ss:$48 sps:$4 sm:$0xff]  }
 0x1a7   : > { %3796 = vmatpush1.bf16.msra.mxu0 %v5626_v44  ;;  %3942 = vmatpush1.bf16.msra.mxu1 %v5629_v52  ;;  %v1326_v44 = vmul.f32 %v6065_v36, %v7291_v46  ;;  %v5674_v52 = vld [vmem:[%s6933_s7 + $0x130] ss:$48 sps:$4 sm:$0xff]   ;;  %v1375_v46 = vadd.f32 %v7468_v20, %v1322_v33  ;;  %v5745_v33 = vld [vmem:[%s6933_s7 + $0x55c] ss:$48 sps:$4 sm:$0xff]  }
 0x1a8   : > { %3797 = vmatprep.subr.bf16.mxu0 %v5634_v8  ;;  %3943 = vmatprep.subr.bf16.mxu1 %v5637_v47  ;;  %v5677_v8 = vld [vmem:[%s6933_s7 + $0x138] ss:$48 sps:$4 sm:$0xff]   ;;  %v5682_v47 = vld [vmem:[%s6933_s7 + $0x194] ss:$48 sps:$4 sm:$0xff]   ;;  %v5740_v36 = vld [vmem:[%s6933_s7 + $0x550] ss:$48 sps:$4 sm:$0xff]  }
 0x1ab   : > { %3798 = vmatpush1.bf16.msra.mxu0 %v5632_v17  ;;  %3944 = vmatpush1.bf16.msra.mxu1 %v5635_v49  ;;  %v5685_v17 = vld [vmem:[%s6933_s7 + $0x19c] ss:$48 sps:$4 sm:$0xff]   ;;  %v1379_v49 = vadd.f32 %v7468_v20, %v1326_v44  ;;  %v5686_v20 = vld [vmem:[%s6933_s7 + $0x1f0] ss:$48 sps:$4 sm:$0xff]   ;;  %v5743_v44 = vld [vmem:[%s6933_s7 + $0x558] ss:$48 sps:$4 sm:$0xff]  }
 0x1ac   : > { %3799 = vmatprep.subr.bf16.mxu0 %v5640_v54  ;;  %3945 = vmatprep.subr.bf16.mxu1 %v5643_v4  ;;  %v5680_v54 = vld [vmem:[%s6933_s7 + $0x190] ss:$48 sps:$4 sm:$0xff]   ;;  %v5683_v4 = vld [vmem:[%s6933_s7 + $0x198] ss:$48 sps:$4 sm:$0xff]  }
 0x1af   : > { %3800 = vmatpush1.bf16.msra.mxu0 %v5638_v30  ;;  %3946 = vmatpush1.bf16.msra.mxu1 %v5641_v19  ;;  %v5688_v30 = vld [vmem:[%s6933_s7 + $0x1f4] ss:$48 sps:$4 sm:$0xff]   ;;  %v5691_v19 = vld [vmem:[%s6933_s7 + $0x1fc] ss:$48 sps:$4 sm:$0xff]  }
 0x1b0   : > { %3801 = vmatprep.subr.bf16.mxu0 %v5646_v23  ;;  %3947 = vmatprep.subr.bf16.mxu1 %v5649_v13  ;;  %v7592_v23 = vpack.c.bf16 %v1379_v49, %v1375_v46  ;;  %v5689_v13 = vld [vmem:[%s6933_s7 + $0x1f8] ss:$48 sps:$4 sm:$0xff]   ;;  %v5754_v46 = vld [vmem:[%s6933_s7 + $0x614] ss:$48 sps:$4 sm:$0xff]   ;;  %v5757_v49 = vld [vmem:[%s6933_s7 + $0x61c] ss:$48 sps:$4 sm:$0xff]  }
 0x1b3   : > { %3802 = vmatpush1.bf16.msra.mxu0 %v5644_v25  ;;  %3948 = vmatpush1.bf16.msra.mxu1 %v5647_v29  ;;  %v5694_v25 = vld [vmem:[%s6933_s7 + $0x254] ss:$48 sps:$4 sm:$0xff]   ;;  %v5697_v29 = vld [vmem:[%s6933_s7 + $0x25c] ss:$48 sps:$4 sm:$0xff]  }
 0x1b4   : > { %3803 = vmatprep.subr.bf16.mxu0 %v5652_v62  ;;  %3949 = vmatprep.subr.bf16.mxu1 %v5655_v43  ;;  %v5692_v62 = vld [vmem:[%s6933_s7 + $0x250] ss:$48 sps:$4 sm:$0xff]   ;;  %v5695_v43 = vld [vmem:[%s6933_s7 + $0x258] ss:$48 sps:$4 sm:$0xff]  }
 0x1b7   : > { %3804 = vmatpush1.bf16.msra.mxu0 %v5650_v14  ;;  %3950 = vmatpush1.bf16.msra.mxu1 %v5653_v22  ;;  %v5706_v14 = vld [vmem:[%s6933_s7 + $0x314] ss:$48 sps:$4 sm:$0xff]   ;;  %v5709_v22 = vld [vmem:[%s6933_s7 + $0x31c] ss:$48 sps:$4 sm:$0xff]  }
 0x1b8   : > { %3992 = vmatprep.subr.bf16.mxu0 %v5658_v51  ;;  %4138 = vmatprep.subr.bf16.mxu1 %v5661_v53  ;;  %v5704_v51 = vld [vmem:[%s6933_s7 + $0x310] ss:$48 sps:$4 sm:$0xff]   ;;  %v5707_v53 = vld [vmem:[%s6933_s7 + $0x318] ss:$48 sps:$4 sm:$0xff]  }
 0x1ba   : > { %3806 = vmatmul.mubr.bf16.vlgmr.msra.gmra.mrb[0].mxu0 %v7401_v6  ;;  %3952 = vmatmul.mubr.bf16.vlgmr.msra.gmra.mrb[0].mxu1 %v7401_v6 }
 0x1bb   : > { %3993 = vmatpush1.bf16.msra.mxu0 %v5656_v15  ;;  %4139 = vmatpush1.bf16.msra.mxu1 %v5659_v45  ;;  %v5712_v15 = vld [vmem:[%s6933_s7 + $0x374] ss:$48 sps:$4 sm:$0xff]   ;;  %v5715_v45 = vld [vmem:[%s6933_s7 + $0x37c] ss:$48 sps:$4 sm:$0xff]  }
 0x1bc   : > { %3994 = vmatprep.subr.bf16.mxu0 %v5664_v32  ;;  %4140 = vmatprep.subr.bf16.mxu1 %v5667_v27  ;;  %v5718_v32 = vld [vmem:[%s6933_s7 + $0x3d4] ss:$48 sps:$4 sm:$0xff]   ;;  %v5721_v27 = vld [vmem:[%s6933_s7 + $0x3dc] ss:$48 sps:$4 sm:$0xff]  }
 0x1bd   : > { %3815 = vmatprep.mubr.bf16.mxu0 %v7544_v39  ;;  %3961 = vmatprep.mubr.bf16.mxu1 %v7544_v39 }
 0x1bf   : > { %3995 = vmatpush1.bf16.msra.mxu0 %v5662_v2  ;;  %4141 = vmatpush1.bf16.msra.mxu1 %v5665_v56  ;;  %v5722_v2 = vld [vmem:[%s6933_s7 + $0x430] ss:$48 sps:$4 sm:$0xff]   ;;  %v5725_v56 = vld [vmem:[%s6933_s7 + $0x438] ss:$48 sps:$4 sm:$0xff]  }
 0x1c0   : > { %3996 = vmatprep.subr.bf16.mxu0 %v5670_v57  ;;  %4142 = vmatprep.subr.bf16.mxu1 %v5673_v58  ;;  %v5730_v57 = vld [vmem:[%s6933_s7 + $0x494] ss:$48 sps:$4 sm:$0xff]   ;;  %v5733_v58 = vld [vmem:[%s6933_s7 + $0x49c] ss:$48 sps:$4 sm:$0xff]  }
 0x1c2   : > { %3816 = vmatmul.mubr.bf16.gmra.mrb[4].mxu0 %v7414_v60  ;;  %3962 = vmatmul.mubr.bf16.gmra.mrb[4].mxu1 %v7414_v60 }
 0x1c3   : > { %3997 = vmatpush1.bf16.msra.mxu0 %v5668_v50  ;;  %4143 = vmatpush1.bf16.msra.mxu1 %v5671_v59  ;;  %v5736_v50 = vld [vmem:[%s6933_s7 + $0x4f4] ss:$48 sps:$4 sm:$0xff]   ;;  %v5739_v59 = vld [vmem:[%s6933_s7 + $0x4fc] ss:$48 sps:$4 sm:$0xff]  }
 0x1c4   : > { %3998 = vmatprep.subr.bf16.mxu0 %v5676_v37  ;;  %4144 = vmatprep.subr.bf16.mxu1 %v5679_v48  ;;  %v5734_v37 = vld [vmem:[%s6933_s7 + $0x4f0] ss:$48 sps:$4 sm:$0xff]   ;;  %v5737_v48 = vld [vmem:[%s6933_s7 + $0x4f8] ss:$48 sps:$4 sm:$0xff]  }
 0x1c5   : > { %3825 = vmatprep.mubr.bf16.mxu0 %v7568_v7  ;;  %3971 = vmatprep.mubr.bf16.mxu1 %v7568_v7 }
 0x1c7   : > { %3999 = vmatpush1.bf16.msra.mxu0 %v5674_v52  ;;  %4145 = vmatpush1.bf16.msra.mxu1 %v5677_v8  ;;  %v5748_v52 = vld [vmem:[%s6933_s7 + $0x5b4] ss:$48 sps:$4 sm:$0xff]   ;;  %v5751_v8 = vld [vmem:[%s6933_s7 + $0x5bc] ss:$48 sps:$4 sm:$0xff]  }
 0x1c8   : > { %4000 = vmatprep.subr.bf16.mxu0 %v5682_v47  ;;  %4146 = vmatprep.subr.bf16.mxu1 %v5685_v17  ;;  %v5746_v47 = vld [vmem:[%s6933_s7 + $0x5b0] ss:$48 sps:$4 sm:$0xff]   ;;  %v5749_v17 = vld [vmem:[%s6933_s7 + $0x5b8] ss:$48 sps:$4 sm:$0xff]  }
 0x1ca   : > { %3826 = vmatmul.mubr.bf16.gmra.mrb[8].mxu0 %v7429_v63  ;;  %3972 = vmatmul.mubr.bf16.gmra.mrb[8].mxu1 %v7429_v63 }
 0x1cb   : > { %4001 = vmatpush1.bf16.msra.mxu0 %v5680_v54  ;;  %4147 = vmatpush1.bf16.msra.mxu1 %v5683_v4  ;;  %v5752_v54 = vld [vmem:[%s6933_s7 + $0x610] ss:$48 sps:$4 sm:$0xff]   ;;  %v5755_v4 = vld [vmem:[%s6933_s7 + $0x618] ss:$48 sps:$4 sm:$0xff]  }
 0x1cc   : > { %4002 = vmatprep.subr.bf16.mxu0 %v5688_v30  ;;  %4148 = vmatprep.subr.bf16.mxu1 %v5691_v19  ;;  %v5760_v30 = vld [vmem:[%s6933_s7 + $0x674] ss:$48 sps:$4 sm:$0xff]   ;;  %v5763_v19 = vld [vmem:[%s6933_s7 + $0x67c] ss:$48 sps:$4 sm:$0xff]  }
 0x1cd   : > { %3835 = vmatprep.mubr.bf16.mxu0 %v7592_v23  ;;  %3981 = vmatprep.mubr.bf16.mxu1 %v7592_v23 }
 0x1cf   : > { %4003 = vmatpush1.bf16.msra.mxu0 %v5686_v20  ;;  %4149 = vmatpush1.bf16.msra.mxu1 %v5689_v13  ;;  %v5758_v20 = vld [vmem:[%s6933_s7 + $0x670] ss:$48 sps:$4 sm:$0xff]   ;;  %v5761_v13 = vld [vmem:[%s6933_s7 + $0x678] ss:$48 sps:$4 sm:$0xff]  }
 0x1d0   : > { %4004 = vmatprep.subr.bf16.mxu0 %v5694_v25  ;;  %4150 = vmatprep.subr.bf16.mxu1 %v5697_v29  ;;  %v5766_v25 = vld [vmem:[%s6933_s7 + $0x6d4] ss:$48 sps:$4 sm:$0xff]   ;;  %v5769_v29 = vld [vmem:[%s6933_s7 + $0x6dc] ss:$48 sps:$4 sm:$0xff]  }
 0x1d2   : > { %3836 = vmatmul.mubr.bf16.gmra.mrb[12].mxu0 %v7433_v35  ;;  %3982 = vmatmul.mubr.bf16.gmra.mrb[12].mxu1 %v7433_v35 }
 0x1d3   : > { %4005 = vmatpush1.bf16.msra.mxu0 %v5692_v62  ;;  %4151 = vmatpush1.bf16.msra.mxu1 %v5695_v43  ;;  %v5764_v62 = vld [vmem:[%s6933_s7 + $0x6d0] ss:$48 sps:$4 sm:$0xff]   ;;  %v5767_v43 = vld [vmem:[%s6933_s7 + $0x6d8] ss:$48 sps:$4 sm:$0xff]  }
 0x1d4   : > { %4006 = vmatprep.subr.bf16.mxu0 %v5700_v31  ;;  %4152 = vmatprep.subr.bf16.mxu1 %v5703_v1  ;;  %v5772_v31 = vld [vmem:[%s6933_s7 + $0x734] ss:$48 sps:$4 sm:$0xff]   ;;  %v5775_v1 = vld [vmem:[%s6933_s7 + $0x73c] ss:$48 sps:$4 sm:$0xff]  }
 0x1d5   : > { %4024 = vmatprep.mubr.bf16.mxu0 %v7343_v9  ;;  %4170 = vmatprep.mubr.bf16.mxu1 %v7343_v9 }
 0x1d7   : > { %4007 = vmatpush1.bf16.msra.mxu0 %v5698_v34  ;;  %4153 = vmatpush1.bf16.msra.mxu1 %v5701_v10  ;;  %v5770_v34 = vld [vmem:[%s6933_s7 + $0x730] ss:$48 sps:$4 sm:$0xff]   ;;  %v5773_v10 = vld [vmem:[%s6933_s7 + $0x738] ss:$48 sps:$4 sm:$0xff]  }
 0x1d8   : > { %4008 = vmatprep.subr.bf16.mxu0 %v5706_v14  ;;  %4154 = vmatprep.subr.bf16.mxu1 %v5709_v22  ;;  %v5778_v14 = vld [vmem:[%s6933_s7 + $0x794] ss:$48 sps:$4 sm:$0xff]   ;;  %v5781_v22 = vld [vmem:[%s6933_s7 + $0x79c] ss:$48 sps:$4 sm:$0xff]  }
 0x1db   : > { %4009 = vmatpush1.bf16.msra.mxu0 %v5704_v51  ;;  %4155 = vmatpush1.bf16.msra.mxu1 %v5707_v53  ;;  %v5776_v51 = vld [vmem:[%s6933_s7 + $0x790] ss:$48 sps:$4 sm:$0xff]   ;;  %v5779_v53 = vld [vmem:[%s6933_s7 + $0x798] ss:$48 sps:$4 sm:$0xff]  }
 0x1dc   : > { %4010 = vmatprep.subr.bf16.mxu0 %v5712_v15  ;;  %4156 = vmatprep.subr.bf16.mxu1 %v5715_v45  ;;  %v5784_v15 = vld [vmem:[%s6933_s7 + $0x7f4] ss:$48 sps:$4 sm:$0xff]   ;;  %v5787_v45 = vld [vmem:[%s6933_s7 + $0x7fc] ss:$48 sps:$4 sm:$0xff]  }
 0x1df   : > { %4011 = vmatpush1.bf16.msra.mxu0 %v5710_v21  ;;  %4157 = vmatpush1.bf16.msra.mxu1 %v5713_v3  ;;  %v5782_v21 = vld [vmem:[%s6933_s7 + $0x7f0] ss:$48 sps:$4 sm:$0xff]   ;;  %v5785_v3 = vld [vmem:[%s6933_s7 + $0x7f8] ss:$48 sps:$4 sm:$0xff]  }
 0x1e0   : > { %4012 = vmatprep.subr.bf16.mxu0 %v5718_v32  ;;  %4158 = vmatprep.subr.bf16.mxu1 %v5721_v27  ;;  %v5790_v32 = vld [vmem:[%s6933_s7 + $0x854] ss:$48 sps:$4 sm:$0xff]   ;;  %v5793_v27 = vld [vmem:[%s6933_s7 + $0x85c] ss:$48 sps:$4 sm:$0xff]  }
 0x1e3   : > { %4013 = vmatpush1.bf16.msra.mxu0 %v5716_v16  ;;  %4159 = vmatpush1.bf16.msra.mxu1 %v5719_v40  ;;  %v5788_v16 = vld [vmem:[%s6933_s7 + $0x850] ss:$48 sps:$4 sm:$0xff]   ;;  %v5791_v40 = vld [vmem:[%s6933_s7 + $0x858] ss:$48 sps:$4 sm:$0xff]  }
 0x1e4   : > { %4014 = vmatprep.subr.bf16.mxu0 %v5724_v42  ;;  %4160 = vmatprep.subr.bf16.mxu1 %v5727_v55  ;;  %v5796_v42 = vld [vmem:[%s6933_s7 + $0x8b4] ss:$48 sps:$4 sm:$0xff]   ;;  %v5799_v55 = vld [vmem:[%s6933_s7 + $0x8bc] ss:$48 sps:$4 sm:$0xff]  }
 0x1e7   : > { %4015 = vmatpush1.bf16.msra.mxu0 %v5722_v2  ;;  %4161 = vmatpush1.bf16.msra.mxu1 %v5725_v56  ;;  %v5794_v2 = vld [vmem:[%s6933_s7 + $0x8b0] ss:$48 sps:$4 sm:$0xff]   ;;  %v5797_v56 = vld [vmem:[%s6933_s7 + $0x8b8] ss:$48 sps:$4 sm:$0xff]  }
 0x1e8   : > { %4016 = vmatprep.subr.bf16.mxu0 %v5730_v57  ;;  %4162 = vmatprep.subr.bf16.mxu1 %v5733_v58  ;;  %v5802_v57 = vld [vmem:[%s6933_s7 + $0x914] ss:$48 sps:$4 sm:$0xff]   ;;  %v5805_v58 = vld [vmem:[%s6933_s7 + $0x91c] ss:$48 sps:$4 sm:$0xff]  }
 0x1eb   : > { %4017 = vmatpush1.bf16.msra.mxu0 %v5728_v38  ;;  %4163 = vmatpush1.bf16.msra.mxu1 %v5731_v41  ;;  %v5800_v38 = vld [vmem:[%s6933_s7 + $0x910] ss:$48 sps:$4 sm:$0xff]   ;;  %v5803_v41 = vld [vmem:[%s6933_s7 + $0x918] ss:$48 sps:$4 sm:$0xff]  }
 0x1ec   : > { %4018 = vmatprep.subr.bf16.mxu0 %v5736_v50  ;;  %4164 = vmatprep.subr.bf16.mxu1 %v5739_v59  ;;  %v5808_v50 = vld [vmem:[%s6933_s7 + $0x974] ss:$48 sps:$4 sm:$0xff]   ;;  %v5811_v59 = vld [vmem:[%s6933_s7 + $0x97c] ss:$48 sps:$4 sm:$0xff]  }
 0x1ef   : > { %4019 = vmatpush1.bf16.msra.mxu0 %v5734_v37  ;;  %4165 = vmatpush1.bf16.msra.mxu1 %v5737_v48  ;;  %v5806_v37 = vld [vmem:[%s6933_s7 + $0x970] ss:$48 sps:$4 sm:$0xff]   ;;  %v5809_v48 = vld [vmem:[%s6933_s7 + $0x978] ss:$48 sps:$4 sm:$0xff]  }
 0x1f0   : > { %4020 = vmatprep.subr.bf16.mxu0 %v5742_v24  ;;  %4166 = vmatprep.subr.bf16.mxu1 %v5745_v33  ;;  %v5814_v24 = vld [vmem:[%s6933_s7 + $0x9d4] ss:$48 sps:$4 sm:$0xff]   ;;  %v5817_v33 = vld [vmem:[%s6933_s7 + $0x9dc] ss:$48 sps:$4 sm:$0xff]  }
 0x1f3   : > { %4021 = vmatpush1.bf16.msra.mxu0 %v5740_v36  ;;  %4167 = vmatpush1.bf16.msra.mxu1 %v5743_v44  ;;  %v5812_v36 = vld [vmem:[%s6933_s7 + $0x9d0] ss:$48 sps:$4 sm:$0xff]   ;;  %v5815_v44 = vld [vmem:[%s6933_s7 + $0x9d8] ss:$48 sps:$4 sm:$0xff]  }
 0x1f4   : > { %4022 = vmatprep.subr.bf16.mxu0 %v5748_v52  ;;  %4168 = vmatprep.subr.bf16.mxu1 %v5751_v8  ;;  %v5820_v52 = vld [vmem:[%s6933_s7 + $0xa34] ss:$48 sps:$4 sm:$0xff]   ;;  %v5823_v8 = vld [vmem:[%s6933_s7 + $0xa3c] ss:$48 sps:$4 sm:$0xff]  }
 0x1f7   : > { %4023 = vmatpush1.bf16.msra.mxu0 %v5746_v47  ;;  %4169 = vmatpush1.bf16.msra.mxu1 %v5749_v17  ;;  %v5818_v47 = vld [vmem:[%s6933_s7 + $0xa30] ss:$48 sps:$4 sm:$0xff]   ;;  %v5821_v17 = vld [vmem:[%s6933_s7 + $0xa38] ss:$48 sps:$4 sm:$0xff]  }
 0x1f8   : > { %4065 = vmatprep.subr.bf16.mxu0 %v5754_v46  ;;  %4211 = vmatprep.subr.bf16.mxu1 %v5757_v49  ;;  %v5826_v46 = vld [vmem:[%s6933_s7 + $0xa94] ss:$48 sps:$4 sm:$0xff]   ;;  %v5829_v49 = vld [vmem:[%s6933_s7 + $0xa9c] ss:$48 sps:$4 sm:$0xff]  }
 0x1fa   : > { %4025 = vmatmul.mubr.bf16.vlgmr.msra.gmra.mrb[16].mxu0 %v7347_v18  ;;  %4171 = vmatmul.mubr.bf16.vlgmr.msra.gmra.mrb[16].mxu1 %v7347_v18 }
 0x1fb   : > { %4066 = vmatpush1.bf16.msra.mxu0 %v5752_v54  ;;  %4212 = vmatpush1.bf16.msra.mxu1 %v5755_v4  ;;  %v5824_v54 = vld [vmem:[%s6933_s7 + $0xa90] ss:$48 sps:$4 sm:$0xff]   ;;  %v5827_v4 = vld [vmem:[%s6933_s7 + $0xa98] ss:$48 sps:$4 sm:$0xff]  }
 0x1fc   : > { %4067 = vmatprep.subr.bf16.mxu0 %v5760_v30  ;;  %4213 = vmatprep.subr.bf16.mxu1 %v5763_v19  ;;  %v5832_v30 = vld [vmem:[%s6933_s7 + $0xaf4] ss:$48 sps:$4 sm:$0xff]   ;;  %v5835_v19 = vld [vmem:[%s6933_s7 + $0xafc] ss:$48 sps:$4 sm:$0xff]  }
 0x1fd   : > { %4034 = vmatprep.mubr.bf16.mxu0 %v7365_v12  ;;  %4180 = vmatprep.mubr.bf16.mxu1 %v7365_v12 }
 0x1ff   : > { %4068 = vmatpush1.bf16.msra.mxu0 %v5758_v20  ;;  %4214 = vmatpush1.bf16.msra.mxu1 %v5761_v13  ;;  %v5830_v20 = vld [vmem:[%s6933_s7 + $0xaf0] ss:$48 sps:$4 sm:$0xff]   ;;  %v5833_v13 = vld [vmem:[%s6933_s7 + $0xaf8] ss:$48 sps:$4 sm:$0xff]  }
 0x200   : > { %4069 = vmatprep.subr.bf16.mxu0 %v5766_v25  ;;  %4215 = vmatprep.subr.bf16.mxu1 %v5769_v29  ;;  %v5838_v25 = vld [vmem:[%s6933_s7 + $0xb54] ss:$48 sps:$4 sm:$0xff]   ;;  %v5841_v29 = vld [vmem:[%s6933_s7 + $0xb5c] ss:$48 sps:$4 sm:$0xff]  }
 0x202   : > { %4035 = vmatmul.mubr.bf16.gmra.mrb[20].mxu0 %v7399_v5  ;;  %4181 = vmatmul.mubr.bf16.gmra.mrb[20].mxu1 %v7399_v5 }
 0x203   : > { %4070 = vmatpush1.bf16.msra.mxu0 %v5764_v62  ;;  %4216 = vmatpush1.bf16.msra.mxu1 %v5767_v43  ;;  %v5836_v62 = vld [vmem:[%s6933_s7 + $0xb50] ss:$48 sps:$4 sm:$0xff]   ;;  %v5839_v43 = vld [vmem:[%s6933_s7 + $0xb58] ss:$48 sps:$4 sm:$0xff]  }
 0x204   : > { %4071 = vmatprep.subr.bf16.mxu0 %v5772_v31  ;;  %4217 = vmatprep.subr.bf16.mxu1 %v5775_v1  ;;  %v5844_v31 = vld [vmem:[%s6933_s7 + $0xbb4] ss:$48 sps:$4 sm:$0xff]   ;;  %v5847_v1 = vld [vmem:[%s6933_s7 + $0xbbc] ss:$48 sps:$4 sm:$0xff]  }
 0x205   : > { %4044 = vmatprep.mubr.bf16.mxu0 %v7417_v61  ;;  %4190 = vmatprep.mubr.bf16.mxu1 %v7417_v61 }
 0x207   : > { %4072 = vmatpush1.bf16.msra.mxu0 %v5770_v34  ;;  %4218 = vmatpush1.bf16.msra.mxu1 %v5773_v10  ;;  %v5842_v34 = vld [vmem:[%s6933_s7 + $0xbb0] ss:$48 sps:$4 sm:$0xff]   ;;  %v5845_v10 = vld [vmem:[%s6933_s7 + $0xbb8] ss:$48 sps:$4 sm:$0xff]  }
 0x208   : > { %4073 = vmatprep.subr.bf16.mxu0 %v5778_v14  ;;  %4219 = vmatprep.subr.bf16.mxu1 %v5781_v22  ;;  %v5850_v14 = vld [vmem:[%s6933_s7 + $0x24] ss:$48 sps:$4 sm:$0xff]   ;;  %v5853_v22 = vld [vmem:[%s6933_s7 + $0x2c] ss:$48 sps:$4 sm:$0xff]  }
 0x20a   : > { %4045 = vmatmul.mubr.bf16.gmra.mrb[24].mxu0 %v7441_v0  ;;  %4191 = vmatmul.mubr.bf16.gmra.mrb[24].mxu1 %v7441_v0 }
 0x20b   : > { %4074 = vmatpush1.bf16.msra.mxu0 %v5776_v51  ;;  %4220 = vmatpush1.bf16.msra.mxu1 %v5779_v53  ;;  %v5848_v51 = vld [vmem:[%s6933_s7 + $0x20] ss:$48 sps:$4 sm:$0xff]   ;;  %v5851_v53 = vld [vmem:[%s6933_s7 + $0x28] ss:$48 sps:$4 sm:$0xff]  }
 0x20c   : > { %4075 = vmatprep.subr.bf16.mxu0 %v5784_v15  ;;  %4221 = vmatprep.subr.bf16.mxu1 %v5787_v45  ;;  %v5856_v15 = vld [vmem:[%s6933_s7 + $0x84] ss:$48 sps:$4 sm:$0xff]   ;;  %v5859_v45 = vld [vmem:[%s6933_s7 + $0x8c] ss:$48 sps:$4 sm:$0xff]  }
 0x20d   : > { %4054 = vmatprep.mubr.bf16.mxu0 %v7455_v11  ;;  %4200 = vmatprep.mubr.bf16.mxu1 %v7455_v11 }
 0x20f   : > { %4076 = vmatpush1.bf16.msra.mxu0 %v5782_v21  ;;  %4222 = vmatpush1.bf16.msra.mxu1 %v5785_v3  ;;  %v5854_v21 = vld [vmem:[%s6933_s7 + $0x80] ss:$48 sps:$4 sm:$0xff]   ;;  %v5857_v3 = vld [vmem:[%s6933_s7 + $0x88] ss:$48 sps:$4 sm:$0xff]  }
 0x210   : > { %4077 = vmatprep.subr.bf16.mxu0 %v5790_v32  ;;  %4223 = vmatprep.subr.bf16.mxu1 %v5793_v27  ;;  %v5862_v32 = vld [vmem:[%s6933_s7 + $0xe4] ss:$48 sps:$4 sm:$0xff]   ;;  %v5865_v27 = vld [vmem:[%s6933_s7 + $0xec] ss:$48 sps:$4 sm:$0xff]  }
 0x212   : > { %4055 = vmatmul.mubr.bf16.gmra.mrb[28].mxu0 %v7482_v26  ;;  %4201 = vmatmul.mubr.bf16.gmra.mrb[28].mxu1 %v7482_v26 }
 0x213   : > { %4078 = vmatpush1.bf16.msra.mxu0 %v5788_v16  ;;  %4224 = vmatpush1.bf16.msra.mxu1 %v5791_v40  ;;  %v5860_v16 = vld [vmem:[%s6933_s7 + $0xe0] ss:$48 sps:$4 sm:$0xff]   ;;  %v5863_v40 = vld [vmem:[%s6933_s7 + $0xe8] ss:$48 sps:$4 sm:$0xff]  }
 0x214   : > { %4079 = vmatprep.subr.bf16.mxu0 %v5796_v42  ;;  %4225 = vmatprep.subr.bf16.mxu1 %v5799_v55  ;;  %v5868_v42 = vld [vmem:[%s6933_s7 + $0x144] ss:$48 sps:$4 sm:$0xff]   ;;  %v5871_v55 = vld [vmem:[%s6933_s7 + $0x14c] ss:$48 sps:$4 sm:$0xff]  }
 0x215   : > { %4097 = vmatprep.mubr.bf16.mxu0 %v7488_v28  ;;  %4243 = vmatprep.mubr.bf16.mxu1 %v7488_v28 }
 0x217   : > { %4080 = vmatpush1.bf16.msra.mxu0 %v5794_v2  ;;  %4226 = vmatpush1.bf16.msra.mxu1 %v5797_v56  ;;  %v5866_v2 = vld [vmem:[%s6933_s7 + $0x140] ss:$48 sps:$4 sm:$0xff]   ;;  %v5869_v56 = vld [vmem:[%s6933_s7 + $0x148] ss:$48 sps:$4 sm:$0xff]  }
 0x218   : > { %4081 = vmatprep.subr.bf16.mxu0 %v5802_v57  ;;  %4227 = vmatprep.subr.bf16.mxu1 %v5805_v58  ;;  %v5874_v57 = vld [vmem:[%s6933_s7 + $0x1a4] ss:$48 sps:$4 sm:$0xff]   ;;  %v5877_v58 = vld [vmem:[%s6933_s7 + $0x1ac] ss:$48 sps:$4 sm:$0xff]  }
 0x21b   : > { %4082 = vmatpush1.bf16.msra.mxu0 %v5800_v38  ;;  %4228 = vmatpush1.bf16.msra.mxu1 %v5803_v41  ;;  %v5872_v38 = vld [vmem:[%s6933_s7 + $0x1a0] ss:$48 sps:$4 sm:$0xff]   ;;  %v5875_v41 = vld [vmem:[%s6933_s7 + $0x1a8] ss:$48 sps:$4 sm:$0xff]  }
 0x21c   : > { %4083 = vmatprep.subr.bf16.mxu0 %v5808_v50  ;;  %4229 = vmatprep.subr.bf16.mxu1 %v5811_v59  ;;  %v5880_v50 = vld [vmem:[%s6933_s7 + $0x204] ss:$48 sps:$4 sm:$0xff]   ;;  %v5883_v59 = vld [vmem:[%s6933_s7 + $0x20c] ss:$48 sps:$4 sm:$0xff]  }
 0x21f   : > { %4084 = vmatpush1.bf16.msra.mxu0 %v5806_v37  ;;  %4230 = vmatpush1.bf16.msra.mxu1 %v5809_v48  ;;  %v5878_v37 = vld [vmem:[%s6933_s7 + $0x200] ss:$48 sps:$4 sm:$0xff]   ;;  %v5881_v48 = vld [vmem:[%s6933_s7 + $0x208] ss:$48 sps:$4 sm:$0xff]  }
 0x220   : > { %4085 = vmatprep.subr.bf16.mxu0 %v5814_v24  ;;  %4231 = vmatprep.subr.bf16.mxu1 %v5817_v33  ;;  %v5886_v24 = vld [vmem:[%s6933_s7 + $0x264] ss:$48 sps:$4 sm:$0xff]   ;;  %v5889_v33 = vld [vmem:[%s6933_s7 + $0x26c] ss:$48 sps:$4 sm:$0xff]  }
 0x223   : > { %4086 = vmatpush1.bf16.msra.mxu0 %v5812_v36  ;;  %4232 = vmatpush1.bf16.msra.mxu1 %v5815_v44  ;;  %v5884_v36 = vld [vmem:[%s6933_s7 + $0x260] ss:$48 sps:$4 sm:$0xff]   ;;  %v5887_v44 = vld [vmem:[%s6933_s7 + $0x268] ss:$48 sps:$4 sm:$0xff]  }
 0x224   : > { %4087 = vmatprep.subr.bf16.mxu0 %v5820_v52  ;;  %4233 = vmatprep.subr.bf16.mxu1 %v5823_v8  ;;  %v5892_v52 = vld [vmem:[%s6933_s7 + $0x2c4] ss:$48 sps:$4 sm:$0xff]   ;;  %v5895_v8 = vld [vmem:[%s6933_s7 + $0x2cc] ss:$48 sps:$4 sm:$0xff]  }
 0x227   : > { %4088 = vmatpush1.bf16.msra.mxu0 %v5818_v47  ;;  %4234 = vmatpush1.bf16.msra.mxu1 %v5821_v17  ;;  %v5890_v47 = vld [vmem:[%s6933_s7 + $0x2c0] ss:$48 sps:$4 sm:$0xff]   ;;  %v5893_v17 = vld [vmem:[%s6933_s7 + $0x2c8] ss:$48 sps:$4 sm:$0xff]  }
 0x228   : > { %4089 = vmatprep.subr.bf16.mxu0 %v5826_v46  ;;  %4235 = vmatprep.subr.bf16.mxu1 %v5829_v49  ;;  %v5898_v46 = vld [vmem:[%s6933_s7 + $0x324] ss:$48 sps:$4 sm:$0xff]   ;;  %v5901_v49 = vld [vmem:[%s6933_s7 + $0x32c] ss:$48 sps:$4 sm:$0xff]  }
 0x22b   : > { %4090 = vmatpush1.bf16.msra.mxu0 %v5824_v54  ;;  %4236 = vmatpush1.bf16.msra.mxu1 %v5827_v4  ;;  %v5896_v54 = vld [vmem:[%s6933_s7 + $0x320] ss:$48 sps:$4 sm:$0xff]   ;;  %v5899_v4 = vld [vmem:[%s6933_s7 + $0x328] ss:$48 sps:$4 sm:$0xff]  }
 0x22c   : > { %4091 = vmatprep.subr.bf16.mxu0 %v5832_v30  ;;  %4237 = vmatprep.subr.bf16.mxu1 %v5835_v19  ;;  %v5904_v30 = vld [vmem:[%s6933_s7 + $0x384] ss:$48 sps:$4 sm:$0xff]   ;;  %v5907_v19 = vld [vmem:[%s6933_s7 + $0x38c] ss:$48 sps:$4 sm:$0xff]  }
 0x22f   : > { %4092 = vmatpush1.bf16.msra.mxu0 %v5830_v20  ;;  %4238 = vmatpush1.bf16.msra.mxu1 %v5833_v13  ;;  %v5902_v20 = vld [vmem:[%s6933_s7 + $0x380] ss:$48 sps:$4 sm:$0xff]   ;;  %v5905_v13 = vld [vmem:[%s6933_s7 + $0x388] ss:$48 sps:$4 sm:$0xff]  }
 0x230   : > { %4093 = vmatprep.subr.bf16.mxu0 %v5838_v25  ;;  %4239 = vmatprep.subr.bf16.mxu1 %v5841_v29  ;;  %v5913_v25 = vld [vmem:[%s6933_s7 + $0x3ec] ss:$48 sps:$4 sm:$0xff]   ;;  %v5908_v29 = vld [vmem:[%s6933_s7 + $0x3e0] ss:$48 sps:$4 sm:$0xff]  }
 0x233   : > { %4094 = vmatpush1.bf16.msra.mxu0 %v5836_v62  ;;  %4240 = vmatpush1.bf16.msra.mxu1 %v5839_v43  ;;  %v5911_v62 = vld [vmem:[%s6933_s7 + $0x3e8] ss:$48 sps:$4 sm:$0xff]   ;;  %v5916_v43 = vld [vmem:[%s6933_s7 + $0x444] ss:$48 sps:$4 sm:$0xff]  }
 0x234   : > { %4095 = vmatprep.subr.bf16.mxu0 %v5844_v31  ;;  %4241 = vmatprep.subr.bf16.mxu1 %v5847_v1  ;;  %v5919_v31 = vld [vmem:[%s6933_s7 + $0x44c] ss:$48 sps:$4 sm:$0xff]   ;;  %v5914_v1 = vld [vmem:[%s6933_s7 + $0x440] ss:$48 sps:$4 sm:$0xff]  }
 0x237   : > { %4096 = vmatpush1.bf16.msra.mxu0 %v5842_v34  ;;  %4242 = vmatpush1.bf16.msra.mxu1 %v5845_v10  ;;  %v5917_v34 = vld [vmem:[%s6933_s7 + $0x448] ss:$48 sps:$4 sm:$0xff]   ;;  %v5922_v10 = vld [vmem:[%s6933_s7 + $0x4a4] ss:$48 sps:$4 sm:$0xff]  }
 0x238   : > { %4284 = vmatprep.subr.bf16.mxu0 %v5850_v14  ;;  %4430 = vmatprep.subr.bf16.mxu1 %v5853_v22  ;;  %v5925_v14 = vld [vmem:[%s6933_s7 + $0x4ac] ss:$48 sps:$4 sm:$0xff]   ;;  %v5920_v22 = vld [vmem:[%s6933_s7 + $0x4a0] ss:$48 sps:$4 sm:$0xff]  }
 0x23a   : > { %4098 = vmatmul.mubr.bf16.vlgmr.msra.gmra.mrb[16].mxu0 %v7401_v6  ;;  %4244 = vmatmul.mubr.bf16.vlgmr.msra.gmra.mrb[16].mxu1 %v7401_v6 }
 0x23b   : > { %4285 = vmatpush1.bf16.msra.mxu0 %v5848_v51  ;;  %4431 = vmatpush1.bf16.msra.mxu1 %v5851_v53  ;;  %v5923_v51 = vld [vmem:[%s6933_s7 + $0x4a8] ss:$48 sps:$4 sm:$0xff]   ;;  %v5928_v53 = vld [vmem:[%s6933_s7 + $0x504] ss:$48 sps:$4 sm:$0xff]  }
 0x23c   : > { %4286 = vmatprep.subr.bf16.mxu0 %v5856_v15  ;;  %4432 = vmatprep.subr.bf16.mxu1 %v5859_v45  ;;  %v5931_v15 = vld [vmem:[%s6933_s7 + $0x50c] ss:$48 sps:$4 sm:$0xff]   ;;  %v5926_v45 = vld [vmem:[%s6933_s7 + $0x500] ss:$48 sps:$4 sm:$0xff]  }
 0x23d   : > { %4107 = vmatprep.mubr.bf16.mxu0 %v7544_v39  ;;  %4253 = vmatprep.mubr.bf16.mxu1 %v7544_v39 }
 0x23f   : > { %4287 = vmatpush1.bf16.msra.mxu0 %v5854_v21  ;;  %4433 = vmatpush1.bf16.msra.mxu1 %v5857_v3  ;;  %v5929_v21 = vld [vmem:[%s6933_s7 + $0x508] ss:$48 sps:$4 sm:$0xff]   ;;  %v5934_v3 = vld [vmem:[%s6933_s7 + $0x564] ss:$48 sps:$4 sm:$0xff]  }
 0x240   : > { %4288 = vmatprep.subr.bf16.mxu0 %v5862_v32  ;;  %4434 = vmatprep.subr.bf16.mxu1 %v5865_v27  ;;  %v5937_v32 = vld [vmem:[%s6933_s7 + $0x56c] ss:$48 sps:$4 sm:$0xff]   ;;  %v5932_v27 = vld [vmem:[%s6933_s7 + $0x560] ss:$48 sps:$4 sm:$0xff]  }
 0x242   : > { %4108 = vmatmul.mubr.bf16.gmra.mrb[20].mxu0 %v7414_v60  ;;  %4254 = vmatmul.mubr.bf16.gmra.mrb[20].mxu1 %v7414_v60 }
 0x243   : > { %4289 = vmatpush1.bf16.msra.mxu0 %v5860_v16  ;;  %4435 = vmatpush1.bf16.msra.mxu1 %v5863_v40  ;;  %v5935_v16 = vld [vmem:[%s6933_s7 + $0x568] ss:$48 sps:$4 sm:$0xff]   ;;  %v5940_v40 = vld [vmem:[%s6933_s7 + $0x5c4] ss:$48 sps:$4 sm:$0xff]  }
 0x244   : > { %4290 = vmatprep.subr.bf16.mxu0 %v5868_v42  ;;  %4436 = vmatprep.subr.bf16.mxu1 %v5871_v55  ;;  %v5943_v42 = vld [vmem:[%s6933_s7 + $0x5cc] ss:$48 sps:$4 sm:$0xff]   ;;  %v5938_v55 = vld [vmem:[%s6933_s7 + $0x5c0] ss:$48 sps:$4 sm:$0xff]  }
 0x245   : > { %4117 = vmatprep.mubr.bf16.mxu0 %v7568_v7  ;;  %4263 = vmatprep.mubr.bf16.mxu1 %v7568_v7 }
 0x247   : > { %4291 = vmatpush1.bf16.msra.mxu0 %v5866_v2  ;;  %4437 = vmatpush1.bf16.msra.mxu1 %v5869_v56  ;;  %v5941_v2 = vld [vmem:[%s6933_s7 + $0x5c8] ss:$48 sps:$4 sm:$0xff]   ;;  %v5946_v56 = vld [vmem:[%s6933_s7 + $0x624] ss:$48 sps:$4 sm:$0xff]  }
 0x248   : > { %4292 = vmatprep.subr.bf16.mxu0 %v5874_v57  ;;  %4438 = vmatprep.subr.bf16.mxu1 %v5877_v58  ;;  %v5949_v57 = vld [vmem:[%s6933_s7 + $0x62c] ss:$48 sps:$4 sm:$0xff]   ;;  %v5944_v58 = vld [vmem:[%s6933_s7 + $0x620] ss:$48 sps:$4 sm:$0xff]  }
 0x24a   : > { %4118 = vmatmul.mubr.bf16.gmra.mrb[24].mxu0 %v7429_v63  ;;  %4264 = vmatmul.mubr.bf16.gmra.mrb[24].mxu1 %v7429_v63 }
 0x24b   : > { %4293 = vmatpush1.bf16.msra.mxu0 %v5872_v38  ;;  %4439 = vmatpush1.bf16.msra.mxu1 %v5875_v41  ;;  %v5947_v38 = vld [vmem:[%s6933_s7 + $0x628] ss:$48 sps:$4 sm:$0xff]   ;;  %v5952_v41 = vld [vmem:[%s6933_s7 + $0x684] ss:$48 sps:$4 sm:$0xff]  }
 0x24c   : > { %4294 = vmatprep.subr.bf16.mxu0 %v5880_v50  ;;  %4440 = vmatprep.subr.bf16.mxu1 %v5883_v59  ;;  %v5955_v50 = vld [vmem:[%s6933_s7 + $0x68c] ss:$48 sps:$4 sm:$0xff]   ;;  %v5950_v59 = vld [vmem:[%s6933_s7 + $0x680] ss:$48 sps:$4 sm:$0xff]  }
 0x24d   : > { %4127 = vmatprep.mubr.bf16.mxu0 %v7592_v23  ;;  %4273 = vmatprep.mubr.bf16.mxu1 %v7592_v23 }
 0x24f   : > { %4295 = vmatpush1.bf16.msra.mxu0 %v5878_v37  ;;  %4441 = vmatpush1.bf16.msra.mxu1 %v5881_v48  ;;  %v5953_v37 = vld [vmem:[%s6933_s7 + $0x688] ss:$48 sps:$4 sm:$0xff]   ;;  %v5958_v48 = vld [vmem:[%s6933_s7 + $0x6e4] ss:$48 sps:$4 sm:$0xff]  }
 0x250   : > { %4296 = vmatprep.subr.bf16.mxu0 %v5886_v24  ;;  %4442 = vmatprep.subr.bf16.mxu1 %v5889_v33  ;;  %v5961_v24 = vld [vmem:[%s6933_s7 + $0x6ec] ss:$48 sps:$4 sm:$0xff]   ;;  %v5959_v33 = vld [vmem:[%s6933_s7 + $0x6e8] ss:$48 sps:$4 sm:$0xff]  }
 0x252   : > { %4128 = vmatmul.mubr.bf16.gmra.mrb[28].mxu0 %v7433_v35  ;;  %4274 = vmatmul.mubr.bf16.gmra.mrb[28].mxu1 %v7433_v35 }
 0x253   : > { %4297 = vmatpush1.bf16.msra.mxu0 %v5884_v36  ;;  %4443 = vmatpush1.bf16.msra.mxu1 %v5887_v44  ;;  %v5964_v36 = vld [vmem:[%s6933_s7 + $0x744] ss:$48 sps:$4 sm:$0xff]   ;;  %v5967_v44 = vld [vmem:[%s6933_s7 + $0x74c] ss:$48 sps:$4 sm:$0xff]  }
 0x254   : > { %4298 = vmatprep.subr.bf16.mxu0 %v5892_v52  ;;  %4444 = vmatprep.subr.bf16.mxu1 %v5895_v8  ;;  %v5965_v52 = vld [vmem:[%s6933_s7 + $0x748] ss:$48 sps:$4 sm:$0xff]   ;;  %v5970_v8 = vld [vmem:[%s6933_s7 + $0x7a4] ss:$48 sps:$4 sm:$0xff]  }
 0x255   : > { %4316 = vmatprep.mubr.bf16.mxu0 %v7343_v9  ;;  %4462 = vmatprep.mubr.bf16.mxu1 %v7343_v9  ;;  %v5910_v9 = vld [vmem:[%s6933_s7 + $0x3e4] ss:$48 sps:$4 sm:$0xff]  }
 0x257   : > { %4299 = vmatpush1.bf16.msra.mxu0 %v5890_v47  ;;  %4445 = vmatpush1.bf16.msra.mxu1 %v5893_v17  ;;  %v5973_v47 = vld [vmem:[%s6933_s7 + $0x7ac] ss:$48 sps:$4 sm:$0xff]   ;;  %v5971_v17 = vld [vmem:[%s6933_s7 + $0x7a8] ss:$48 sps:$4 sm:$0xff]  }
 0x258   : > { %4300 = vmatprep.subr.bf16.mxu0 %v5898_v46  ;;  %4446 = vmatprep.subr.bf16.mxu1 %v5901_v49  ;;  %v5976_v46 = vld [vmem:[%s6933_s7 + $0x804] ss:$48 sps:$4 sm:$0xff]   ;;  %v5979_v49 = vld [vmem:[%s6933_s7 + $0x80c] ss:$48 sps:$4 sm:$0xff]  }
 0x25b   : > { %4301 = vmatpush1.bf16.msra.mxu0 %v5896_v54  ;;  %4447 = vmatpush1.bf16.msra.mxu1 %v5899_v4  ;;  %v5974_v54 = vld [vmem:[%s6933_s7 + $0x800] ss:$48 sps:$4 sm:$0xff]   ;;  %v5982_v4 = vld [vmem:[%s6933_s7 + $0x864] ss:$48 sps:$4 sm:$0xff]  }
 0x25c   : > { %4302 = vmatprep.subr.bf16.mxu0 %v5904_v30  ;;  %4448 = vmatprep.subr.bf16.mxu1 %v5907_v19  ;;  %v5985_v30 = vld [vmem:[%s6933_s7 + $0x86c] ss:$48 sps:$4 sm:$0xff]  }
 0x25f   : > { %4303 = vmatpush1.bf16.msra.mxu0 %v5902_v20  ;;  %4449 = vmatpush1.bf16.msra.mxu1 %v5905_v13 }
 0x260   : > { %4304 = vmatprep.subr.bf16.mxu0 %v5910_v9  ;;  %4450 = vmatprep.subr.bf16.mxu1 %v5913_v25  ;;  %v5980_v25 = vld [vmem:[%s6933_s7 + $0x860] ss:$48 sps:$4 sm:$0xff]  }
 0x263   : > { %4305 = vmatpush1.bf16.msra.mxu0 %v5908_v29  ;;  %4451 = vmatpush1.bf16.msra.mxu1 %v5911_v62  ;;  %v5983_v29 = vld [vmem:[%s6933_s7 + $0x868] ss:$48 sps:$4 sm:$0xff]  }
 0x264   : > { %4306 = vmatprep.subr.bf16.mxu0 %v5916_v43  ;;  %4452 = vmatprep.subr.bf16.mxu1 %v5919_v31  ;;  %v5988_v31 = vld [vmem:[%s6933_s7 + $0x8c4] ss:$48 sps:$4 sm:$0xff]  }
 0x267   : > { %4307 = vmatpush1.bf16.msra.mxu0 %v5914_v1  ;;  %4453 = vmatpush1.bf16.msra.mxu1 %v5917_v34  ;;  %v5991_v1 = vld [vmem:[%s6933_s7 + $0x8cc] ss:$48 sps:$4 sm:$0xff]   ;;  %v5986_v34 = vld [vmem:[%s6933_s7 + $0x8c0] ss:$48 sps:$4 sm:$0xff]  }
 0x268   : > { %4308 = vmatprep.subr.bf16.mxu0 %v5922_v10  ;;  %4454 = vmatprep.subr.bf16.mxu1 %v5925_v14  ;;  %v5989_v10 = vld [vmem:[%s6933_s7 + $0x8c8] ss:$48 sps:$4 sm:$0xff]   ;;  %v5994_v14 = vld [vmem:[%s6933_s7 + $0x924] ss:$48 sps:$4 sm:$0xff]  }
 0x26b   : > { %4309 = vmatpush1.bf16.msra.mxu0 %v5920_v22  ;;  %4455 = vmatpush1.bf16.msra.mxu1 %v5923_v51  ;;  %v5997_v22 = vld [vmem:[%s6933_s7 + $0x92c] ss:$48 sps:$4 sm:$0xff]  }
 0x26c   : > { %4310 = vmatprep.subr.bf16.mxu0 %v5928_v53  ;;  %4456 = vmatprep.subr.bf16.mxu1 %v5931_v15 }
 0x26f   : > { %4311 = vmatpush1.bf16.msra.mxu0 %v5926_v45  ;;  %4457 = vmatpush1.bf16.msra.mxu1 %v5929_v21 }
 0x270   : > { %4312 = vmatprep.subr.bf16.mxu0 %v5934_v3  ;;  %4458 = vmatprep.subr.bf16.mxu1 %v5937_v32  ;;  %v5992_v3 = vld [vmem:[%s6933_s7 + $0x920] ss:$48 sps:$4 sm:$0xff]   ;;  %v5995_v32 = vld [vmem:[%s6933_s7 + $0x928] ss:$48 sps:$4 sm:$0xff]  }
 0x273   : > { %4313 = vmatpush1.bf16.msra.mxu0 %v5932_v27  ;;  %4459 = vmatpush1.bf16.msra.mxu1 %v5935_v16  ;;  %v6000_v16 = vld [vmem:[%s6933_s7 + $0x984] ss:$48 sps:$4 sm:$0xff]  }
 0x274   : > { %4314 = vmatprep.subr.bf16.mxu0 %v5940_v40  ;;  %4460 = vmatprep.subr.bf16.mxu1 %v5943_v42  ;;  %v6003_v40 = vld [vmem:[%s6933_s7 + $0x98c] ss:$48 sps:$4 sm:$0xff]   ;;  %v5998_v42 = vld [vmem:[%s6933_s7 + $0x980] ss:$48 sps:$4 sm:$0xff]  }
 0x277   : > { %4315 = vmatpush1.bf16.msra.mxu0 %v5938_v55  ;;  %4461 = vmatpush1.bf16.msra.mxu1 %v5941_v2  ;;  %v6001_v55 = vld [vmem:[%s6933_s7 + $0x988] ss:$48 sps:$4 sm:$0xff]   ;;  %v6006_v2 = vld [vmem:[%s6933_s7 + $0x9e4] ss:$48 sps:$4 sm:$0xff]  }
 0x278   : > { %4357 = vmatprep.subr.bf16.mxu0 %v5946_v56  ;;  %4503 = vmatprep.subr.bf16.mxu1 %v5949_v57  ;;  %v6009_v56 = vld [vmem:[%s6933_s7 + $0x9ec] ss:$48 sps:$4 sm:$0xff]  }
 0x27a   : > { %4317 = vmatmul.mubr.bf16.vlgmr.msra.gmra.mrb[32].mxu0 %v7347_v18  ;;  %4463 = vmatmul.mubr.bf16.vlgmr.msra.gmra.mrb[32].mxu1 %v7347_v18  ;;  %v5956_v18 = vld [vmem:[%s6933_s7 + $0x6e0] ss:$48 sps:$4 sm:$0xff]  }
 0x27b   : > { %4358 = vmatpush1.bf16.msra.mxu0 %v5944_v58  ;;  %4504 = vmatpush1.bf16.msra.mxu1 %v5947_v38 }
 0x27c   : > { %4359 = vmatprep.subr.bf16.mxu0 %v5952_v41  ;;  %4505 = vmatprep.subr.bf16.mxu1 %v5955_v50 }
 0x27d   : > { %4326 = vmatprep.mubr.bf16.mxu0 %v7365_v12  ;;  %4472 = vmatprep.mubr.bf16.mxu1 %v7365_v12  ;;  %v5962_v12 = vld [vmem:[%s6933_s7 + $0x740] ss:$48 sps:$4 sm:$0xff]  }
 0x27f   : > { %4360 = vmatpush1.bf16.msra.mxu0 %v5950_v59  ;;  %4506 = vmatpush1.bf16.msra.mxu1 %v5953_v37  ;;  %v6004_v37 = vld [vmem:[%s6933_s7 + $0x9e0] ss:$48 sps:$4 sm:$0xff]  }
 0x280   : > { %4361 = vmatprep.subr.bf16.mxu0 %v5958_v48  ;;  %4507 = vmatprep.subr.bf16.mxu1 %v5961_v24  ;;  %v6007_v48 = vld [vmem:[%s6933_s7 + $0x9e8] ss:$48 sps:$4 sm:$0xff]  }
 0x282   : > { %4327 = vmatmul.mubr.bf16.gmra.mrb[36].mxu0 %v7399_v5  ;;  %4473 = vmatmul.mubr.bf16.gmra.mrb[36].mxu1 %v7399_v5  ;;  %v5968_v5 = vld [vmem:[%s6933_s7 + $0x7a0] ss:$48 sps:$4 sm:$0xff]  }
 0x283   : > { %4362 = vmatpush1.bf16.msra.mxu0 %v5956_v18  ;;  %4508 = vmatpush1.bf16.msra.mxu1 %v5959_v33  ;;  %v6012_v33 = vld [vmem:[%s6933_s7 + $0xa44] ss:$48 sps:$4 sm:$0xff]  }
 0x284   : > { %4363 = vmatprep.subr.bf16.mxu0 %v5964_v36  ;;  %4509 = vmatprep.subr.bf16.mxu1 %v5967_v44  ;;  %v6015_v36 = vld [vmem:[%s6933_s7 + $0xa4c] ss:$48 sps:$4 sm:$0xff]   ;;  %v6010_v44 = vld [vmem:[%s6933_s7 + $0xa40] ss:$48 sps:$4 sm:$0xff]  }
 0x285   : > { %4336 = vmatprep.mubr.bf16.mxu0 %v7417_v61  ;;  %4482 = vmatprep.mubr.bf16.mxu1 %v7417_v61  ;;  %v5977_v61 = vld [vmem:[%s6933_s7 + $0x808] ss:$48 sps:$4 sm:$0xff]  }
 0x287   : > { %4364 = vmatpush1.bf16.msra.mxu0 %v5962_v12  ;;  %4510 = vmatpush1.bf16.msra.mxu1 %v5965_v52  ;;  %v6013_v12 = vld [vmem:[%s6933_s7 + $0xa48] ss:$48 sps:$4 sm:$0xff]   ;;  %v6018_v52 = vld [vmem:[%s6933_s7 + $0xaa4] ss:$48 sps:$4 sm:$0xff]  }
 0x288   : > { %4365 = vmatprep.subr.bf16.mxu0 %v5970_v8  ;;  %4511 = vmatprep.subr.bf16.mxu1 %v5973_v47  ;;  %v6021_v8 = vld [vmem:[%s6933_s7 + $0xaac] ss:$48 sps:$4 sm:$0xff]  }
 0x28a   : > { %4337 = vmatmul.mubr.bf16.gmra.mrb[40].mxu0 %v7441_v0  ;;  %4483 = vmatmul.mubr.bf16.gmra.mrb[40].mxu1 %v7441_v0 }
 0x28b   : > { %4366 = vmatpush1.bf16.msra.mxu0 %v5968_v5  ;;  %4512 = vmatpush1.bf16.msra.mxu1 %v5971_v17 }
 0x28c   : > { %4367 = vmatprep.subr.bf16.mxu0 %v5976_v46  ;;  %4513 = vmatprep.subr.bf16.mxu1 %v5979_v49 }
 0x28d   : > { %v3807_v19 = vpop.f32.mrb[0].mxu0  ;;  %v3953_v20 = vpop.f32.mrb[0].mxu1  ;;  %4346 = vmatprep.mubr.bf16.mxu0 %v7455_v11  ;;  %4492 = vmatprep.mubr.bf16.mxu1 %v7455_v11 }
 0x28e   : > { %4576 = vst [vmem:[%s7844_s15] sm:$0xff] %v3807_v19  ;;  %4578 = vst [vmem:[%s7844_s15 + $0x10] sm:$0xff] %v3953_v20  ;;  %v3809_v0 = vpop.f32.mrb[1].mxu0  ;;  %v3955_v13 = vpop.f32.mrb[1].mxu1  ;;  %v6024_v20 = vld [vmem:[%s6933_s7 + $0xb04] ss:$48 sps:$4 sm:$0xff]  }
 0x28f   : > { %4577 = vst [vmem:[%s7844_s15 + $0x8] sm:$0xff] %v3809_v0  ;;  %4579 = vst [vmem:[%s7844_s15 + $0x18] sm:$0xff] %v3955_v13  ;;  %v3811_v9 = vpop.f32.mrb[2].mxu0  ;;  %v3957_v11 = vpop.f32.mrb[2].mxu1  ;;  %4368 = vmatpush1.bf16.msra.mxu0 %v5974_v54  ;;  %4514 = vmatpush1.bf16.msra.mxu1 %v5977_v61  ;;  %v6016_v61 = vld [vmem:[%s6933_s7 + $0xaa0] ss:$48 sps:$4 sm:$0xff]  }
 0x290   : > { %4588 = vst [vmem:[%s7844_s15 + $0x60] sm:$0xff] %v3811_v9  ;;  %4590 = vst [vmem:[%s7844_s15 + $0x70] sm:$0xff] %v3957_v11  ;;  %v3813_v62 = vpop.f32.mrb[3].mxu0  ;;  %v3959_v43 = vpop.f32.mrb[3].mxu1  ;;  %4369 = vmatprep.subr.bf16.mxu0 %v5982_v4  ;;  %4515 = vmatprep.subr.bf16.mxu1 %v5985_v30  ;;  %v6019_v4 = vld [vmem:[%s6933_s7 + $0xaa8] ss:$48 sps:$4 sm:$0xff]  }
 0x291   : > { %4589 = vst [vmem:[%s7844_s15 + $0x68] sm:$0xff] %v3813_v62  ;;  %4591 = vst [vmem:[%s7844_s15 + $0x78] sm:$0xff] %v3959_v43  ;;  %v6027_v0 = vld [vmem:[%s6933_s7 + $0xb0c] ss:$48 sps:$4 sm:$0xff]   ;;  %v6022_v13 = vld [vmem:[%s6933_s7 + $0xb00] ss:$48 sps:$4 sm:$0xff]  }
 0x292   : > { %4347 = vmatmul.mubr.bf16.gmra.mrb[44].mxu0 %v7482_v26  ;;  %4493 = vmatmul.mubr.bf16.gmra.mrb[44].mxu1 %v7482_v26  ;;  %v6025_v9 = vld [vmem:[%s6933_s7 + $0xb08] ss:$48 sps:$4 sm:$0xff]   ;;  %v6030_v11 = vld [vmem:[%s6933_s7 + $0xb64] ss:$48 sps:$4 sm:$0xff]  }
 0x293   : > { %4370 = vmatpush1.bf16.msra.mxu0 %v5980_v25  ;;  %4516 = vmatpush1.bf16.msra.mxu1 %v5983_v29  ;;  %v6033_v25 = vld [vmem:[%s6933_s7 + $0xb6c] ss:$48 sps:$4 sm:$0xff]   ;;  %v6028_v29 = vld [vmem:[%s6933_s7 + $0xb60] ss:$48 sps:$4 sm:$0xff]   ;;  %v6031_v62 = vld [vmem:[%s6933_s7 + $0xb68] ss:$48 sps:$4 sm:$0xff]  }
 0x294   : > { %4371 = vmatprep.subr.bf16.mxu0 %v5988_v31  ;;  %4517 = vmatprep.subr.bf16.mxu1 %v5991_v1  ;;  %v6036_v43 = vld [vmem:[%s6933_s7 + $0xbc4] ss:$48 sps:$4 sm:$0xff]   ;;  %v6039_v31 = vld [vmem:[%s6933_s7 + $0xbcc] ss:$48 sps:$4 sm:$0xff]   ;;  %v6034_v1 = vld [vmem:[%s6933_s7 + $0xbc0] ss:$48 sps:$4 sm:$0xff]  }
 0x295   : > { %v3817_v51 = vpop.f32.mrb[4].mxu0  ;;  %v3963_v53 = vpop.f32.mrb[4].mxu1  ;;  %4389 = vmatprep.mubr.bf16.mxu0 %v7488_v28  ;;  %4535 = vmatprep.mubr.bf16.mxu1 %v7488_v28 }
 0x296   : > { %4600 = vst [vmem:[%s7844_s15 + $0xc0] sm:$0xff] %v3817_v51  ;;  %4602 = vst [vmem:[%s7844_s15 + $0xd0] sm:$0xff] %v3963_v53  ;;  %v3819_v26 = vpop.f32.mrb[5].mxu0  ;;  %v3965_v15 = vpop.f32.mrb[5].mxu1 }
 0x297   : > { %4601 = vst [vmem:[%s7844_s15 + $0xc8] sm:$0xff] %v3819_v26  ;;  %4603 = vst [vmem:[%s7844_s15 + $0xd8] sm:$0xff] %v3965_v15  ;;  %v3821_v45 = vpop.f32.mrb[6].mxu0  ;;  %v3967_v21 = vpop.f32.mrb[6].mxu1  ;;  %4372 = vmatpush1.bf16.msra.mxu0 %v5986_v34  ;;  %4518 = vmatpush1.bf16.msra.mxu1 %v5989_v10  ;;  %v6037_v34 = vld [vmem:[%s6933_s7 + $0xbc8] ss:$48 sps:$4 sm:$0xff]   ;;  %s8011_s7 = scalar_lea.vmem (%p6146_p5), %s8213_s4, %s5339_s5 }
 0x298   : > { %4612 = vst [vmem:[%s7844_s15 + $0x120] sm:$0xff] %v3821_v45  ;;  %4614 = vst [vmem:[%s7844_s15 + $0x130] sm:$0xff] %v3967_v21  ;;  %v3823_v28 = vpop.f32.mrb[7].mxu0  ;;  %v3969_v27 = vpop.f32.mrb[7].mxu1  ;;  %4373 = vmatprep.subr.bf16.mxu0 %v5994_v14  ;;  %4519 = vmatprep.subr.bf16.mxu1 %v5997_v22 }
 0x299   : > { %4613 = vst [vmem:[%s7844_s15 + $0x128] sm:$0xff] %v3823_v28  ;;  %4615 = vst [vmem:[%s7844_s15 + $0x138] sm:$0xff] %v3969_v27 }
 0x29b   : > { %4374 = vmatpush1.bf16.msra.mxu0 %v5992_v3  ;;  %4520 = vmatpush1.bf16.msra.mxu1 %v5995_v32 }
 0x29c   : > { %4375 = vmatprep.subr.bf16.mxu0 %v6000_v16  ;;  %4521 = vmatprep.subr.bf16.mxu1 %v6003_v40 }
 0x29d   : > { %v3827_v57 = vpop.f32.mrb[8].mxu0  ;;  %v3973_v58 = vpop.f32.mrb[8].mxu1 }
 0x29e   : > { %4624 = vst [vmem:[%s7844_s15 + $0x180] sm:$0xff] %v3827_v57  ;;  %4626 = vst [vmem:[%s7844_s15 + $0x190] sm:$0xff] %v3973_v58  ;;  %v3829_v38 = vpop.f32.mrb[9].mxu0  ;;  %v3975_v41 = vpop.f32.mrb[9].mxu1 }
 0x29f   : > { %4625 = vst [vmem:[%s7844_s15 + $0x188] sm:$0xff] %v3829_v38  ;;  %4627 = vst [vmem:[%s7844_s15 + $0x198] sm:$0xff] %v3975_v41  ;;  %v3831_v50 = vpop.f32.mrb[10].mxu0  ;;  %v3977_v59 = vpop.f32.mrb[10].mxu1  ;;  %4376 = vmatpush1.bf16.msra.mxu0 %v5998_v42  ;;  %4522 = vmatpush1.bf16.msra.mxu1 %v6001_v55 }
 0x2a0   : > { %4636 = vst [vmem:[%s7844_s15 + $0x1e0] sm:$0xff] %v3831_v50  ;;  %4638 = vst [vmem:[%s7844_s15 + $0x1f0] sm:$0xff] %v3977_v59  ;;  %v3833_v24 = vpop.f32.mrb[11].mxu0  ;;  %v3979_v18 = vpop.f32.mrb[11].mxu1  ;;  %4377 = vmatprep.subr.bf16.mxu0 %v6006_v2  ;;  %4523 = vmatprep.subr.bf16.mxu1 %v6009_v56 }
 0x2a1   : > { %4637 = vst [vmem:[%s7844_s15 + $0x1e8] sm:$0xff] %v3833_v24  ;;  %4639 = vst [vmem:[%s7844_s15 + $0x1f8] sm:$0xff] %v3979_v18 }
 0x2a3   : > { %4378 = vmatpush1.bf16.msra.mxu0 %v6004_v37  ;;  %4524 = vmatpush1.bf16.msra.mxu1 %v6007_v48 }
 0x2a4   : > { %4379 = vmatprep.subr.bf16.mxu0 %v6012_v33  ;;  %4525 = vmatprep.subr.bf16.mxu1 %v6015_v36 }
 0x2a5   : > { %v3837_v47 = vpop.f32.mrb[12].mxu0  ;;  %v3983_v5 = vpop.f32.mrb[12].mxu1 }
 0x2a6   : > { %4648 = vst [vmem:[%s7844_s15 + $0x240] sm:$0xff] %v3837_v47  ;;  %4650 = vst [vmem:[%s7844_s15 + $0x250] sm:$0xff] %v3983_v5  ;;  %v3839_v17 = vpop.f32.mrb[13].mxu0  ;;  %v3985_v46 = vpop.f32.mrb[13].mxu1 }
 0x2a7   : > { %4649 = vst [vmem:[%s7844_s15 + $0x248] sm:$0xff] %v3839_v17  ;;  %4651 = vst [vmem:[%s7844_s15 + $0x258] sm:$0xff] %v3985_v46  ;;  %v3841_v49 = vpop.f32.mrb[14].mxu0  ;;  %v3987_v54 = vpop.f32.mrb[14].mxu1  ;;  %4380 = vmatpush1.bf16.msra.mxu0 %v6010_v44  ;;  %4526 = vmatpush1.bf16.msra.mxu1 %v6013_v12 }
 0x2a8   : > { %4660 = vst [vmem:[%s7844_s15 + $0x2a0] sm:$0xff] %v3841_v49  ;;  %4662 = vst [vmem:[%s7844_s15 + $0x2b0] sm:$0xff] %v3987_v54  ;;  %v3843_v30 = vpop.f32.mrb[15].mxu0  ;;  %v3989_v19 = vpop.f32.mrb[15].mxu1  ;;  %4381 = vmatprep.subr.bf16.mxu0 %v6018_v52  ;;  %4527 = vmatprep.subr.bf16.mxu1 %v6021_v8 }
 0x2a9   : > { %4661 = vst [vmem:[%s7844_s15 + $0x2a8] sm:$0xff] %v3843_v30  ;;  %4663 = vst [vmem:[%s7844_s15 + $0x2b8] sm:$0xff] %v3989_v19 }
 0x2ab   : > { %4382 = vmatpush1.bf16.msra.mxu0 %v6016_v61  ;;  %4528 = vmatpush1.bf16.msra.mxu1 %v6019_v4 }
 0x2ac   : > { %4383 = vmatprep.subr.bf16.mxu0 %v6024_v20  ;;  %4529 = vmatprep.subr.bf16.mxu1 %v6027_v0 }
 0x2af   : > { %4384 = vmatpush1.bf16.msra.mxu0 %v6022_v13  ;;  %4530 = vmatpush1.bf16.msra.mxu1 %v6025_v9 }
 0x2b0   : > { %4385 = vmatprep.subr.bf16.mxu0 %v6030_v11  ;;  %4531 = vmatprep.subr.bf16.mxu1 %v6033_v25 }
 0x2b3   : > { %4386 = vmatpush1.bf16.msra.mxu0 %v6028_v29  ;;  %4532 = vmatpush1.bf16.msra.mxu1 %v6031_v62 }
 0x2b4   : > { %4387 = vmatprep.subr.bf16.mxu0 %v6036_v43  ;;  %4533 = vmatprep.subr.bf16.mxu1 %v6039_v31 }
 0x2b7   : > { %4388 = vmatpush1.bf16.msra.mxu0 %v6034_v1  ;;  %4534 = vmatpush1.bf16.msra.mxu1 %v6037_v34 }
 0x2ba   : > { %4390 = vmatmul.mubr.bf16.vlgmr.msra.gmra.mrb[32].mxu0 %v7401_v6  ;;  %4536 = vmatmul.mubr.bf16.vlgmr.msra.gmra.mrb[32].mxu1 %v7401_v6 }
 0x2bb   : > { %4399 = vmatprep.mubr.bf16.mxu0 %v7544_v39  ;;  %4545 = vmatprep.mubr.bf16.mxu1 %v7544_v39 }
 0x2c2   : > { %4400 = vmatmul.mubr.bf16.gmra.mrb[36].mxu0 %v7414_v60  ;;  %4546 = vmatmul.mubr.bf16.gmra.mrb[36].mxu1 %v7414_v60 }
 0x2c3   : > { %4409 = vmatprep.mubr.bf16.mxu0 %v7568_v7  ;;  %4555 = vmatprep.mubr.bf16.mxu1 %v7568_v7 }
 0x2ca   : > { %4410 = vmatmul.mubr.bf16.gmra.mrb[40].mxu0 %v7429_v63  ;;  %4556 = vmatmul.mubr.bf16.gmra.mrb[40].mxu1 %v7429_v63 }
 0x2cb   : > { %4419 = vmatprep.mubr.bf16.mxu0 %v7592_v23  ;;  %4565 = vmatprep.mubr.bf16.mxu1 %v7592_v23 }
 0x2d2   : > { %4420 = vmatmul.mubr.bf16.gmra.mrb[44].mxu0 %v7433_v35  ;;  %4566 = vmatmul.mubr.bf16.gmra.mrb[44].mxu1 %v7433_v35 }
 0x30d   : > { %v4099_v6 = vpop.f32.mrb[16].mxu0  ;;  %v4245_v60 = vpop.f32.mrb[16].mxu1 }
 0x30e   : > { %4580 = vst [vmem:[%s7844_s15 + $0x20] sm:$0xff] %v4099_v6  ;;  %4582 = vst [vmem:[%s7844_s15 + $0x30] sm:$0xff] %v4245_v60  ;;  %v4101_v39 = vpop.f32.mrb[17].mxu0  ;;  %v4247_v7 = vpop.f32.mrb[17].mxu1  ;;  %v4694_v6 = vld [vmem:[%s7844_s15] sm:$0xff] (%p6146_p5)  ;;  %v4696_v60 = vld [vmem:[%s7844_s15 + $0x8] sm:$0xff] (%p6146_p5) }
 0x30f   : > { %4581 = vst [vmem:[%s7844_s15 + $0x28] sm:$0xff] %v4101_v39  ;;  %4583 = vst [vmem:[%s7844_s15 + $0x38] sm:$0xff] %v4247_v7  ;;  %v4103_v63 = vpop.f32.mrb[18].mxu0  ;;  %v4249_v23 = vpop.f32.mrb[18].mxu1  ;;  %v4698_v39 = vld [vmem:[%s7844_s15 + $0x10] sm:$0xff] (%p6146_p5)  ;;  %v4700_v7 = vld [vmem:[%s7844_s15 + $0x18] sm:$0xff] (%p6146_p5) }
 0x310   : > { %4592 = vst [vmem:[%s7844_s15 + $0x80] sm:$0xff] %v4103_v63  ;;  %4594 = vst [vmem:[%s7844_s15 + $0x90] sm:$0xff] %v4249_v23  ;;  %v4105_v35 = vpop.f32.mrb[19].mxu0  ;;  %v4251_v10 = vpop.f32.mrb[19].mxu1 }
 0x311   : > { %4593 = vst [vmem:[%s7844_s15 + $0x88] sm:$0xff] %v4105_v35  ;;  %4595 = vst [vmem:[%s7844_s15 + $0x98] sm:$0xff] %v4251_v10 }
 0x312   : > { %4695 = vst [vmem:[%s8011_s7] sm:$0xff] (%p6146_p5), %v4694_v6  ;;  %4697 = vst [vmem:[%s8011_s7 + $0x8] sm:$0xff] (%p6146_p5), %v4696_v60 }
 0x313   : > { %4699 = vst [vmem:[%s8011_s7 + $0x10] sm:$0xff] (%p6146_p5), %v4698_v39  ;;  %4701 = vst [vmem:[%s8011_s7 + $0x18] sm:$0xff] (%p6146_p5), %v4700_v7 }
 0x315   : > { %v4109_v14 = vpop.f32.mrb[20].mxu0  ;;  %v4255_v22 = vpop.f32.mrb[20].mxu1  ;;  %v4702_v63 = vld [vmem:[%s7844_s15 + $0x20] sm:$0xff] (%p6146_p5)  ;;  %v4706_v35 = vld [vmem:[%s7844_s15 + $0x30] sm:$0xff] (%p6146_p5) }
 0x316   : > { %4604 = vst [vmem:[%s7844_s15 + $0xe0] sm:$0xff] %v4109_v14  ;;  %4606 = vst [vmem:[%s7844_s15 + $0xf0] sm:$0xff] %v4255_v22  ;;  %v4111_v51 = vpop.f32.mrb[21].mxu0  ;;  %v4257_v53 = vpop.f32.mrb[21].mxu1  ;;  %v4704_v23 = vld [vmem:[%s7844_s15 + $0x28] sm:$0xff] (%p6146_p5)  ;;  %v4708_v10 = vld [vmem:[%s7844_s15 + $0x38] sm:$0xff] (%p6146_p5) }
 0x317   : > { %4605 = vst [vmem:[%s7844_s15 + $0xe8] sm:$0xff] %v4111_v51  ;;  %4607 = vst [vmem:[%s7844_s15 + $0xf8] sm:$0xff] %v4257_v53  ;;  %v4113_v26 = vpop.f32.mrb[22].mxu0  ;;  %v4259_v15 = vpop.f32.mrb[22].mxu1 }
 0x318   : > { %4616 = vst [vmem:[%s7844_s15 + $0x140] sm:$0xff] %v4113_v26  ;;  %4618 = vst [vmem:[%s7844_s15 + $0x150] sm:$0xff] %v4259_v15  ;;  %v4115_v45 = vpop.f32.mrb[23].mxu0  ;;  %v4261_v21 = vpop.f32.mrb[23].mxu1  ;;  %v4718_v26 = vld [vmem:[%s7844_s15 + $0x60] sm:$0xff] (%p6146_p5)  ;;  %v4720_v15 = vld [vmem:[%s7844_s15 + $0x68] sm:$0xff] (%p6146_p5) }
 0x319   : > { %4617 = vst [vmem:[%s7844_s15 + $0x148] sm:$0xff] %v4115_v45  ;;  %4619 = vst [vmem:[%s7844_s15 + $0x158] sm:$0xff] %v4261_v21  ;;  %v4722_v45 = vld [vmem:[%s7844_s15 + $0x70] sm:$0xff] (%p6146_p5)  ;;  %v4724_v21 = vld [vmem:[%s7844_s15 + $0x78] sm:$0xff] (%p6146_p5) }
 0x31a   : > { %4703 = vst [vmem:[%s8011_s7 + $0x20] sm:$0xff] (%p6146_p5), %v4702_v63  ;;  %4705 = vst [vmem:[%s8011_s7 + $0x28] sm:$0xff] (%p6146_p5), %v4704_v23 }
 0x31b   : > { %4707 = vst [vmem:[%s8011_s7 + $0x30] sm:$0xff] (%p6146_p5), %v4706_v35  ;;  %4709 = vst [vmem:[%s8011_s7 + $0x38] sm:$0xff] (%p6146_p5), %v4708_v10 }
 0x31c   : > { %4719 = vst [vmem:[%s8011_s7 + $0xc0] sm:$0xff] (%p6146_p5), %v4718_v26  ;;  %4721 = vst [vmem:[%s8011_s7 + $0xc8] sm:$0xff] (%p6146_p5), %v4720_v15 }
 0x31d   : > { %v4119_v3 = vpop.f32.mrb[24].mxu0  ;;  %v4265_v32 = vpop.f32.mrb[24].mxu1  ;;  %4723 = vst [vmem:[%s8011_s7 + $0xd0] sm:$0xff] (%p6146_p5), %v4722_v45  ;;  %4725 = vst [vmem:[%s8011_s7 + $0xd8] sm:$0xff] (%p6146_p5), %v4724_v21 }
 0x31e   : > { %4628 = vst [vmem:[%s7844_s15 + $0x1a0] sm:$0xff] %v4119_v3  ;;  %4630 = vst [vmem:[%s7844_s15 + $0x1b0] sm:$0xff] %v4265_v32  ;;  %v4121_v28 = vpop.f32.mrb[25].mxu0  ;;  %v4267_v27 = vpop.f32.mrb[25].mxu1  ;;  %v4726_v3 = vld [vmem:[%s7844_s15 + $0x80] sm:$0xff] (%p6146_p5)  ;;  %v4728_v32 = vld [vmem:[%s7844_s15 + $0x88] sm:$0xff] (%p6146_p5) }
 0x31f   : > { %4629 = vst [vmem:[%s7844_s15 + $0x1a8] sm:$0xff] %v4121_v28  ;;  %4631 = vst [vmem:[%s7844_s15 + $0x1b8] sm:$0xff] %v4267_v27  ;;  %v4123_v16 = vpop.f32.mrb[26].mxu0  ;;  %v4269_v40 = vpop.f32.mrb[26].mxu1  ;;  %v4730_v28 = vld [vmem:[%s7844_s15 + $0x90] sm:$0xff] (%p6146_p5)  ;;  %v4732_v27 = vld [vmem:[%s7844_s15 + $0x98] sm:$0xff] (%p6146_p5) }
 0x320   : > { %4640 = vst [vmem:[%s7844_s15 + $0x200] sm:$0xff] %v4123_v16  ;;  %4642 = vst [vmem:[%s7844_s15 + $0x210] sm:$0xff] %v4269_v40  ;;  %v4125_v42 = vpop.f32.mrb[27].mxu0  ;;  %v4271_v55 = vpop.f32.mrb[27].mxu1 }
 0x321   : > { %4641 = vst [vmem:[%s7844_s15 + $0x208] sm:$0xff] %v4125_v42  ;;  %4643 = vst [vmem:[%s7844_s15 + $0x218] sm:$0xff] %v4271_v55 }
 0x322   : > { %4727 = vst [vmem:[%s8011_s7 + $0xe0] sm:$0xff] (%p6146_p5), %v4726_v3  ;;  %4729 = vst [vmem:[%s8011_s7 + $0xe8] sm:$0xff] (%p6146_p5), %v4728_v32 }
 0x323   : > { %4731 = vst [vmem:[%s8011_s7 + $0xf0] sm:$0xff] (%p6146_p5), %v4730_v28  ;;  %4733 = vst [vmem:[%s8011_s7 + $0xf8] sm:$0xff] (%p6146_p5), %v4732_v27 }
 0x325   : > { %v4129_v2 = vpop.f32.mrb[28].mxu0  ;;  %v4275_v56 = vpop.f32.mrb[28].mxu1 }
 0x326   : > { %4652 = vst [vmem:[%s7844_s15 + $0x260] sm:$0xff] %v4129_v2  ;;  %4654 = vst [vmem:[%s7844_s15 + $0x270] sm:$0xff] %v4275_v56  ;;  %v4131_v57 = vpop.f32.mrb[29].mxu0  ;;  %v4277_v58 = vpop.f32.mrb[29].mxu1  ;;  %v4742_v2 = vld [vmem:[%s7844_s15 + $0xc0] sm:$0xff] (%p6146_p5)  ;;  %v4744_v56 = vld [vmem:[%s7844_s15 + $0xc8] sm:$0xff] (%p6146_p5) }
 0x327   : > { %4653 = vst [vmem:[%s7844_s15 + $0x268] sm:$0xff] %v4131_v57  ;;  %4655 = vst [vmem:[%s7844_s15 + $0x278] sm:$0xff] %v4277_v58  ;;  %v4133_v38 = vpop.f32.mrb[30].mxu0  ;;  %v4279_v41 = vpop.f32.mrb[30].mxu1  ;;  %v4746_v57 = vld [vmem:[%s7844_s15 + $0xd0] sm:$0xff] (%p6146_p5)  ;;  %v4748_v58 = vld [vmem:[%s7844_s15 + $0xd8] sm:$0xff] (%p6146_p5) }
 0x328   : > { %4664 = vst [vmem:[%s7844_s15 + $0x2c0] sm:$0xff] %v4133_v38  ;;  %4666 = vst [vmem:[%s7844_s15 + $0x2d0] sm:$0xff] %v4279_v41  ;;  %v4135_v50 = vpop.f32.mrb[31].mxu0  ;;  %v4281_v59 = vpop.f32.mrb[31].mxu1  ;;  %v4750_v38 = vld [vmem:[%s7844_s15 + $0xe0] sm:$0xff] (%p6146_p5)  ;;  %v4752_v41 = vld [vmem:[%s7844_s15 + $0xe8] sm:$0xff] (%p6146_p5) }
 0x329   : > { %4665 = vst [vmem:[%s7844_s15 + $0x2c8] sm:$0xff] %v4135_v50  ;;  %4667 = vst [vmem:[%s7844_s15 + $0x2d8] sm:$0xff] %v4281_v59  ;;  %v4754_v50 = vld [vmem:[%s7844_s15 + $0xf0] sm:$0xff] (%p6146_p5)  ;;  %v4756_v59 = vld [vmem:[%s7844_s15 + $0xf8] sm:$0xff] (%p6146_p5) }
 0x32a   : > { %4743 = vst [vmem:[%s8011_s7 + $0x180] sm:$0xff] (%p6146_p5), %v4742_v2  ;;  %4745 = vst [vmem:[%s8011_s7 + $0x188] sm:$0xff] (%p6146_p5), %v4744_v56  ;;  %v4822_v6 = vld [vmem:[%s7844_s15 + $0x200] sm:$0xff] (%p6146_p5)  ;;  %v4824_v60 = vld [vmem:[%s7844_s15 + $0x208] sm:$0xff] (%p6146_p5) }
 0x32b   : > { %4747 = vst [vmem:[%s8011_s7 + $0x190] sm:$0xff] (%p6146_p5), %v4746_v57  ;;  %4749 = vst [vmem:[%s8011_s7 + $0x198] sm:$0xff] (%p6146_p5), %v4748_v58  ;;  %v4826_v39 = vld [vmem:[%s7844_s15 + $0x210] sm:$0xff] (%p6146_p5)  ;;  %v4828_v7 = vld [vmem:[%s7844_s15 + $0x218] sm:$0xff] (%p6146_p5) }
 0x32c   : > { %4751 = vst [vmem:[%s8011_s7 + $0x1a0] sm:$0xff] (%p6146_p5), %v4750_v38  ;;  %4753 = vst [vmem:[%s8011_s7 + $0x1a8] sm:$0xff] (%p6146_p5), %v4752_v41 }
 0x32d   : > { %4755 = vst [vmem:[%s8011_s7 + $0x1b0] sm:$0xff] (%p6146_p5), %v4754_v50  ;;  %4757 = vst [vmem:[%s8011_s7 + $0x1b8] sm:$0xff] (%p6146_p5), %v4756_v59  ;;  %v4846_v26 = vld [vmem:[%s7844_s15 + $0x260] sm:$0xff] (%p6146_p5)  ;;  %v4850_v45 = vld [vmem:[%s7844_s15 + $0x270] sm:$0xff] (%p6146_p5) }
 0x32e   : > { %4823 = vst [vmem:[%s8011_s7 + $0x3e0] sm:$0xff] (%p6146_p5), %v4822_v6  ;;  %4825 = vst [vmem:[%s8011_s7 + $0x3e8] sm:$0xff] (%p6146_p5), %v4824_v60  ;;  %v4848_v15 = vld [vmem:[%s7844_s15 + $0x268] sm:$0xff] (%p6146_p5)  ;;  %v4852_v21 = vld [vmem:[%s7844_s15 + $0x278] sm:$0xff] (%p6146_p5) }
 0x32f   : > { %4827 = vst [vmem:[%s8011_s7 + $0x3f0] sm:$0xff] (%p6146_p5), %v4826_v39  ;;  %4829 = vst [vmem:[%s8011_s7 + $0x3f8] sm:$0xff] (%p6146_p5), %v4828_v7  ;;  %v4870_v2 = vld [vmem:[%s7844_s15 + $0x2c0] sm:$0xff] (%p6146_p5)  ;;  %v4874_v57 = vld [vmem:[%s7844_s15 + $0x2d0] sm:$0xff] (%p6146_p5) }
 0x330   : > { %4847 = vst [vmem:[%s8011_s7 + $0x4a0] sm:$0xff] (%p6146_p5), %v4846_v26  ;;  %4849 = vst [vmem:[%s8011_s7 + $0x4a8] sm:$0xff] (%p6146_p5), %v4848_v15  ;;  %v4872_v56 = vld [vmem:[%s7844_s15 + $0x2c8] sm:$0xff] (%p6146_p5)  ;;  %v4876_v58 = vld [vmem:[%s7844_s15 + $0x2d8] sm:$0xff] (%p6146_p5) }
 0x331   : > { %4851 = vst [vmem:[%s8011_s7 + $0x4b0] sm:$0xff] (%p6146_p5), %v4850_v45  ;;  %4853 = vst [vmem:[%s8011_s7 + $0x4b8] sm:$0xff] (%p6146_p5), %v4852_v21 }
 0x332   : > { %4871 = vst [vmem:[%s8011_s7 + $0x560] sm:$0xff] (%p6146_p5), %v4870_v2  ;;  %4873 = vst [vmem:[%s8011_s7 + $0x568] sm:$0xff] (%p6146_p5), %v4872_v56 }
 0x333   : > { %4875 = vst [vmem:[%s8011_s7 + $0x570] sm:$0xff] (%p6146_p5), %v4874_v57  ;;  %4877 = vst [vmem:[%s8011_s7 + $0x578] sm:$0xff] (%p6146_p5), %v4876_v58 }
 0x38d   : > { %v4391_v37 = vpop.f32.mrb[32].mxu0  ;;  %v4537_v48 = vpop.f32.mrb[32].mxu1 }
 0x38e   : > { %4584 = vst [vmem:[%s7844_s15 + $0x40] sm:$0xff] %v4391_v37  ;;  %4586 = vst [vmem:[%s7844_s15 + $0x50] sm:$0xff] %v4537_v48  ;;  %v4393_v24 = vpop.f32.mrb[33].mxu0  ;;  %v4539_v18 = vpop.f32.mrb[33].mxu1 }
 0x38f   : > { %4585 = vst [vmem:[%s7844_s15 + $0x48] sm:$0xff] %v4393_v24  ;;  %4587 = vst [vmem:[%s7844_s15 + $0x58] sm:$0xff] %v4539_v18  ;;  %v4395_v33 = vpop.f32.mrb[34].mxu0  ;;  %v4541_v36 = vpop.f32.mrb[34].mxu1 }
 0x390   : > { %4596 = vst [vmem:[%s7844_s15 + $0xa0] sm:$0xff] %v4395_v33  ;;  %4598 = vst [vmem:[%s7844_s15 + $0xb0] sm:$0xff] %v4541_v36  ;;  %v4397_v44 = vpop.f32.mrb[35].mxu0  ;;  %v4543_v12 = vpop.f32.mrb[35].mxu1  ;;  %v4766_v33 = vld [vmem:[%s7844_s15 + $0x120] sm:$0xff] (%p6146_p5)  ;;  %v4768_v36 = vld [vmem:[%s7844_s15 + $0x128] sm:$0xff] (%p6146_p5) }
 0x391   : > { %4597 = vst [vmem:[%s7844_s15 + $0xa8] sm:$0xff] %v4397_v44  ;;  %4599 = vst [vmem:[%s7844_s15 + $0xb8] sm:$0xff] %v4543_v12  ;;  %v4770_v44 = vld [vmem:[%s7844_s15 + $0x130] sm:$0xff] (%p6146_p5)  ;;  %v4772_v12 = vld [vmem:[%s7844_s15 + $0x138] sm:$0xff] (%p6146_p5) }
 0x392   : > { %4767 = vst [vmem:[%s8011_s7 + $0x240] sm:$0xff] (%p6146_p5), %v4766_v33  ;;  %4769 = vst [vmem:[%s8011_s7 + $0x248] sm:$0xff] (%p6146_p5), %v4768_v36 }
 0x393   : > { %4771 = vst [vmem:[%s8011_s7 + $0x250] sm:$0xff] (%p6146_p5), %v4770_v44  ;;  %4773 = vst [vmem:[%s8011_s7 + $0x258] sm:$0xff] (%p6146_p5), %v4772_v12 }
 0x395   : > { %v4401_v52 = vpop.f32.mrb[36].mxu0  ;;  %v4547_v8 = vpop.f32.mrb[36].mxu1  ;;  %v4710_v14 = vld [vmem:[%s7844_s15 + $0x40] sm:$0xff] (%p6146_p5)  ;;  %v4714_v51 = vld [vmem:[%s7844_s15 + $0x50] sm:$0xff] (%p6146_p5) }
 0x396   : > { %4608 = vst [vmem:[%s7844_s15 + $0x100] sm:$0xff] %v4401_v52  ;;  %4610 = vst [vmem:[%s7844_s15 + $0x110] sm:$0xff] %v4547_v8  ;;  %v4403_v47 = vpop.f32.mrb[37].mxu0  ;;  %v4549_v5 = vpop.f32.mrb[37].mxu1  ;;  %v4712_v22 = vld [vmem:[%s7844_s15 + $0x48] sm:$0xff] (%p6146_p5)  ;;  %v4716_v53 = vld [vmem:[%s7844_s15 + $0x58] sm:$0xff] (%p6146_p5) }
 0x397   : > { %4609 = vst [vmem:[%s7844_s15 + $0x108] sm:$0xff] %v4403_v47  ;;  %4611 = vst [vmem:[%s7844_s15 + $0x118] sm:$0xff] %v4549_v5  ;;  %v4405_v17 = vpop.f32.mrb[38].mxu0  ;;  %v4551_v46 = vpop.f32.mrb[38].mxu1  ;;  %v4734_v16 = vld [vmem:[%s7844_s15 + $0xa0] sm:$0xff] (%p6146_p5)  ;;  %v4738_v42 = vld [vmem:[%s7844_s15 + $0xb0] sm:$0xff] (%p6146_p5) }
 0x398   : > { %4620 = vst [vmem:[%s7844_s15 + $0x160] sm:$0xff] %v4405_v17  ;;  %4622 = vst [vmem:[%s7844_s15 + $0x170] sm:$0xff] %v4551_v46  ;;  %v4407_v49 = vpop.f32.mrb[39].mxu0  ;;  %v4553_v54 = vpop.f32.mrb[39].mxu1  ;;  %v4736_v40 = vld [vmem:[%s7844_s15 + $0xa8] sm:$0xff] (%p6146_p5)  ;;  %v4740_v55 = vld [vmem:[%s7844_s15 + $0xb8] sm:$0xff] (%p6146_p5) }
 0x399   : > { %4621 = vst [vmem:[%s7844_s15 + $0x168] sm:$0xff] %v4407_v49  ;;  %4623 = vst [vmem:[%s7844_s15 + $0x178] sm:$0xff] %v4553_v54  ;;  %v4774_v52 = vld [vmem:[%s7844_s15 + $0x140] sm:$0xff] (%p6146_p5)  ;;  %v4776_v8 = vld [vmem:[%s7844_s15 + $0x148] sm:$0xff] (%p6146_p5) }
 0x39a   : > { %4711 = vst [vmem:[%s8011_s7 + $0x40] sm:$0xff] (%p6146_p5), %v4710_v14  ;;  %4713 = vst [vmem:[%s8011_s7 + $0x48] sm:$0xff] (%p6146_p5), %v4712_v22  ;;  %v4778_v47 = vld [vmem:[%s7844_s15 + $0x150] sm:$0xff] (%p6146_p5)  ;;  %v4780_v5 = vld [vmem:[%s7844_s15 + $0x158] sm:$0xff] (%p6146_p5) }
 0x39b   : > { %4715 = vst [vmem:[%s8011_s7 + $0x50] sm:$0xff] (%p6146_p5), %v4714_v51  ;;  %4717 = vst [vmem:[%s8011_s7 + $0x58] sm:$0xff] (%p6146_p5), %v4716_v53  ;;  %v4838_v14 = vld [vmem:[%s7844_s15 + $0x240] sm:$0xff] (%p6146_p5)  ;;  %v4840_v22 = vld [vmem:[%s7844_s15 + $0x248] sm:$0xff] (%p6146_p5) }
 0x39c   : > { %4735 = vst [vmem:[%s8011_s7 + $0x100] sm:$0xff] (%p6146_p5), %v4734_v16  ;;  %4737 = vst [vmem:[%s8011_s7 + $0x108] sm:$0xff] (%p6146_p5), %v4736_v40  ;;  %v4842_v51 = vld [vmem:[%s7844_s15 + $0x250] sm:$0xff] (%p6146_p5)  ;;  %v4844_v53 = vld [vmem:[%s7844_s15 + $0x258] sm:$0xff] (%p6146_p5) }
 0x39d   : > { %v4411_v61 = vpop.f32.mrb[40].mxu0  ;;  %v4557_v4 = vpop.f32.mrb[40].mxu1  ;;  %4739 = vst [vmem:[%s8011_s7 + $0x110] sm:$0xff] (%p6146_p5), %v4738_v42  ;;  %4741 = vst [vmem:[%s8011_s7 + $0x118] sm:$0xff] (%p6146_p5), %v4740_v55  ;;  %v4758_v37 = vld [vmem:[%s7844_s15 + $0x100] sm:$0xff] (%p6146_p5)  ;;  %v4762_v24 = vld [vmem:[%s7844_s15 + $0x110] sm:$0xff] (%p6146_p5) }
 0x39e   : > { %4632 = vst [vmem:[%s7844_s15 + $0x1c0] sm:$0xff] %v4411_v61  ;;  %4634 = vst [vmem:[%s7844_s15 + $0x1d0] sm:$0xff] %v4557_v4  ;;  %v4413_v30 = vpop.f32.mrb[41].mxu0  ;;  %v4559_v19 = vpop.f32.mrb[41].mxu1  ;;  %v4760_v48 = vld [vmem:[%s7844_s15 + $0x108] sm:$0xff] (%p6146_p5)  ;;  %v4764_v18 = vld [vmem:[%s7844_s15 + $0x118] sm:$0xff] (%p6146_p5) }
 0x39f   : > { %4633 = vst [vmem:[%s7844_s15 + $0x1c8] sm:$0xff] %v4413_v30  ;;  %4635 = vst [vmem:[%s7844_s15 + $0x1d8] sm:$0xff] %v4559_v19  ;;  %v4415_v20 = vpop.f32.mrb[42].mxu0  ;;  %v4561_v0 = vpop.f32.mrb[42].mxu1  ;;  %v4782_v17 = vld [vmem:[%s7844_s15 + $0x160] sm:$0xff] (%p6146_p5)  ;;  %v4786_v49 = vld [vmem:[%s7844_s15 + $0x170] sm:$0xff] (%p6146_p5) }
 0x3a0   : > { %4644 = vst [vmem:[%s7844_s15 + $0x220] sm:$0xff] %v4415_v20  ;;  %4646 = vst [vmem:[%s7844_s15 + $0x230] sm:$0xff] %v4561_v0  ;;  %v4417_v13 = vpop.f32.mrb[43].mxu0  ;;  %v4563_v9 = vpop.f32.mrb[43].mxu1  ;;  %v4784_v46 = vld [vmem:[%s7844_s15 + $0x168] sm:$0xff] (%p6146_p5)  ;;  %v4788_v54 = vld [vmem:[%s7844_s15 + $0x178] sm:$0xff] (%p6146_p5) }
 0x3a1   : > { %4645 = vst [vmem:[%s7844_s15 + $0x228] sm:$0xff] %v4417_v13  ;;  %4647 = vst [vmem:[%s7844_s15 + $0x238] sm:$0xff] %v4563_v9  ;;  %v4790_v61 = vld [vmem:[%s7844_s15 + $0x180] sm:$0xff] (%p6146_p5)  ;;  %v4792_v4 = vld [vmem:[%s7844_s15 + $0x188] sm:$0xff] (%p6146_p5) }
 0x3a2   : > { %4759 = vst [vmem:[%s8011_s7 + $0x1c0] sm:$0xff] (%p6146_p5), %v4758_v37  ;;  %4761 = vst [vmem:[%s8011_s7 + $0x1c8] sm:$0xff] (%p6146_p5), %v4760_v48  ;;  %v4794_v30 = vld [vmem:[%s7844_s15 + $0x190] sm:$0xff] (%p6146_p5)  ;;  %v4796_v19 = vld [vmem:[%s7844_s15 + $0x198] sm:$0xff] (%p6146_p5) }
 0x3a3   : > { %4678 = sbr.rel (!%p6146_p5) target bundleno = 958 (0x3be), region = 63  ;;  %4763 = vst [vmem:[%s8011_s7 + $0x1d0] sm:$0xff] (%p6146_p5), %v4762_v24  ;;  %4765 = vst [vmem:[%s8011_s7 + $0x1d8] sm:$0xff] (%p6146_p5), %v4764_v18  ;;  %v4798_v20 = vld [vmem:[%s7844_s15 + $0x1a0] sm:$0xff] (%p6146_p5)  ;;  %v4800_v0 = vld [vmem:[%s7844_s15 + $0x1a8] sm:$0xff] (%p6146_p5) }
 0x3a4   : > { %4775 = vst [vmem:[%s8011_s7 + $0x260] sm:$0xff] (%p6146_p5), %v4774_v52  ;;  %4777 = vst [vmem:[%s8011_s7 + $0x268] sm:$0xff] (%p6146_p5), %v4776_v8  ;;  %v4802_v13 = vld [vmem:[%s7844_s15 + $0x1b0] sm:$0xff] (%p6146_p5)  ;;  %v4804_v9 = vld [vmem:[%s7844_s15 + $0x1b8] sm:$0xff] (%p6146_p5) }
 0x3a5   : > { %v4421_v11 = vpop.f32.mrb[44].mxu0  ;;  %v4567_v25 = vpop.f32.mrb[44].mxu1  ;;  %4779 = vst [vmem:[%s8011_s7 + $0x270] sm:$0xff] (%p6146_p5), %v4778_v47  ;;  %4781 = vst [vmem:[%s8011_s7 + $0x278] sm:$0xff] (%p6146_p5), %v4780_v5  ;;  %v4862_v16 = vld [vmem:[%s7844_s15 + $0x2a0] sm:$0xff] (%p6146_p5)  ;;  %v4864_v40 = vld [vmem:[%s7844_s15 + $0x2a8] sm:$0xff] (%p6146_p5) }
 0x3a6   : > { %4656 = vst [vmem:[%s7844_s15 + $0x280] sm:$0xff] %v4421_v11  ;;  %4658 = vst [vmem:[%s7844_s15 + $0x290] sm:$0xff] %v4567_v25  ;;  %v4423_v29 = vpop.f32.mrb[45].mxu0  ;;  %v4569_v62 = vpop.f32.mrb[45].mxu1  ;;  %v4806_v11 = vld [vmem:[%s7844_s15 + $0x1c0] sm:$0xff] (%p6146_p5)  ;;  %v4808_v25 = vld [vmem:[%s7844_s15 + $0x1c8] sm:$0xff] (%p6146_p5) }
 0x3a7   : > { %4657 = vst [vmem:[%s7844_s15 + $0x288] sm:$0xff] %v4423_v29  ;;  %4659 = vst [vmem:[%s7844_s15 + $0x298] sm:$0xff] %v4569_v62  ;;  %v4425_v43 = vpop.f32.mrb[46].mxu0  ;;  %v4571_v31 = vpop.f32.mrb[46].mxu1  ;;  %v4810_v29 = vld [vmem:[%s7844_s15 + $0x1d0] sm:$0xff] (%p6146_p5)  ;;  %v4812_v62 = vld [vmem:[%s7844_s15 + $0x1d8] sm:$0xff] (%p6146_p5) }
 0x3a8   : > { %4668 = vst [vmem:[%s7844_s15 + $0x2e0] sm:$0xff] %v4425_v43  ;;  %4670 = vst [vmem:[%s7844_s15 + $0x2f0] sm:$0xff] %v4571_v31  ;;  %v4427_v1 = vpop.f32.mrb[47].mxu0  ;;  %v4573_v34 = vpop.f32.mrb[47].mxu1  ;;  %v4814_v43 = vld [vmem:[%s7844_s15 + $0x1e0] sm:$0xff] (%p6146_p5)  ;;  %v4816_v31 = vld [vmem:[%s7844_s15 + $0x1e8] sm:$0xff] (%p6146_p5) }
 0x3a9   : > { %4669 = vst [vmem:[%s7844_s15 + $0x2e8] sm:$0xff] %v4427_v1  ;;  %4671 = vst [vmem:[%s7844_s15 + $0x2f8] sm:$0xff] %v4573_v34  ;;  %v4818_v1 = vld [vmem:[%s7844_s15 + $0x1f0] sm:$0xff] (%p6146_p5)  ;;  %v4820_v34 = vld [vmem:[%s7844_s15 + $0x1f8] sm:$0xff] (%p6146_p5) }
 0x3aa   : > { %4783 = vst [vmem:[%s8011_s7 + $0x280] sm:$0xff] %v4782_v17  ;;  %4785 = vst [vmem:[%s8011_s7 + $0x288] sm:$0xff] %v4784_v46  ;;  %v4830_v63 = vld [vmem:[%s7844_s15 + $0x220] sm:$0xff]  ;;  %v4832_v23 = vld [vmem:[%s7844_s15 + $0x228] sm:$0xff] }
 0x3ab   : > { %4787 = vst [vmem:[%s8011_s7 + $0x290] sm:$0xff] %v4786_v49  ;;  %4789 = vst [vmem:[%s8011_s7 + $0x298] sm:$0xff] %v4788_v54  ;;  %v4834_v35 = vld [vmem:[%s7844_s15 + $0x230] sm:$0xff]  ;;  %v4836_v10 = vld [vmem:[%s7844_s15 + $0x238] sm:$0xff] }
 0x3ac   : > { %4791 = vst [vmem:[%s8011_s7 + $0x300] sm:$0xff] %v4790_v61  ;;  %4793 = vst [vmem:[%s8011_s7 + $0x308] sm:$0xff] %v4792_v4  ;;  %v4866_v42 = vld [vmem:[%s7844_s15 + $0x2b0] sm:$0xff]  ;;  %v4868_v55 = vld [vmem:[%s7844_s15 + $0x2b8] sm:$0xff] }
 0x3ad   : > { %4795 = vst [vmem:[%s8011_s7 + $0x310] sm:$0xff] %v4794_v30  ;;  %4797 = vst [vmem:[%s8011_s7 + $0x318] sm:$0xff] %v4796_v19  ;;  %v4854_v3 = vld [vmem:[%s7844_s15 + $0x280] sm:$0xff]  ;;  %v4858_v28 = vld [vmem:[%s7844_s15 + $0x290] sm:$0xff] }
 0x3ae   : > { %4799 = vst [vmem:[%s8011_s7 + $0x320] sm:$0xff] %v4798_v20  ;;  %4801 = vst [vmem:[%s8011_s7 + $0x328] sm:$0xff] %v4800_v0  ;;  %v4856_v32 = vld [vmem:[%s7844_s15 + $0x288] sm:$0xff]  ;;  %v4860_v27 = vld [vmem:[%s7844_s15 + $0x298] sm:$0xff] }
 0x3af   : > { %4803 = vst [vmem:[%s8011_s7 + $0x330] sm:$0xff] %v4802_v13  ;;  %4805 = vst [vmem:[%s8011_s7 + $0x338] sm:$0xff] %v4804_v9  ;;  %v4878_v38 = vld [vmem:[%s7844_s15 + $0x2e0] sm:$0xff]  ;;  %v4882_v50 = vld [vmem:[%s7844_s15 + $0x2f0] sm:$0xff] }
 0x3b0   : > { %4807 = vst [vmem:[%s8011_s7 + $0x340] sm:$0xff] %v4806_v11  ;;  %4809 = vst [vmem:[%s8011_s7 + $0x348] sm:$0xff] %v4808_v25  ;;  %v4880_v41 = vld [vmem:[%s7844_s15 + $0x2e8] sm:$0xff]  ;;  %v4884_v59 = vld [vmem:[%s7844_s15 + $0x2f8] sm:$0xff] }
 0x3b1   : > { %4811 = vst [vmem:[%s8011_s7 + $0x350] sm:$0xff] %v4810_v29  ;;  %4813 = vst [vmem:[%s8011_s7 + $0x358] sm:$0xff] %v4812_v62 }
 0x3b2   : > { %4815 = vst [vmem:[%s8011_s7 + $0x3c0] sm:$0xff] %v4814_v43  ;;  %4817 = vst [vmem:[%s8011_s7 + $0x3c8] sm:$0xff] %v4816_v31 }
 0x3b3   : > { %4819 = vst [vmem:[%s8011_s7 + $0x3d0] sm:$0xff] %v4818_v1  ;;  %4821 = vst [vmem:[%s8011_s7 + $0x3d8] sm:$0xff] %v4820_v34 }
 0x3b4   : > { %4831 = vst [vmem:[%s8011_s7 + $0x400] sm:$0xff] %v4830_v63  ;;  %4833 = vst [vmem:[%s8011_s7 + $0x408] sm:$0xff] %v4832_v23 }
 0x3b5   : > { %4835 = vst [vmem:[%s8011_s7 + $0x410] sm:$0xff] %v4834_v35  ;;  %4837 = vst [vmem:[%s8011_s7 + $0x418] sm:$0xff] %v4836_v10 }
 0x3b6   : > { %4839 = vst [vmem:[%s8011_s7 + $0x480] sm:$0xff] %v4838_v14  ;;  %4841 = vst [vmem:[%s8011_s7 + $0x488] sm:$0xff] %v4840_v22 }
 0x3b7   : > { %4843 = vst [vmem:[%s8011_s7 + $0x490] sm:$0xff] %v4842_v51  ;;  %4845 = vst [vmem:[%s8011_s7 + $0x498] sm:$0xff] %v4844_v53 }
 0x3b8   : > { %4855 = vst [vmem:[%s8011_s7 + $0x4c0] sm:$0xff] %v4854_v3  ;;  %4857 = vst [vmem:[%s8011_s7 + $0x4c8] sm:$0xff] %v4856_v32 }
 0x3b9   : > { %4859 = vst [vmem:[%s8011_s7 + $0x4d0] sm:$0xff] %v4858_v28  ;;  %4861 = vst [vmem:[%s8011_s7 + $0x4d8] sm:$0xff] %v4860_v27 }
 0x3ba   : > { %4863 = vst [vmem:[%s8011_s7 + $0x540] sm:$0xff] %v4862_v16  ;;  %4865 = vst [vmem:[%s8011_s7 + $0x548] sm:$0xff] %v4864_v40 }
 0x3bb   : > { %4867 = vst [vmem:[%s8011_s7 + $0x550] sm:$0xff] %v4866_v42  ;;  %4869 = vst [vmem:[%s8011_s7 + $0x558] sm:$0xff] %v4868_v55 }
 0x3bc   : > { %4879 = vst [vmem:[%s8011_s7 + $0x580] sm:$0xff] %v4878_v38  ;;  %4881 = vst [vmem:[%s8011_s7 + $0x588] sm:$0xff] %v4880_v41 }
 0x3bd   : > { %4883 = vst [vmem:[%s8011_s7 + $0x590] sm:$0xff] %v4882_v50  ;;  %4885 = vst [vmem:[%s8011_s7 + $0x598] sm:$0xff] %v4884_v59 }
 0x3be PF: > { %p11_p10 = scmp.ge.s32.totalorder %s6133_s19, 4   ;;  %s8233_s15 = smov %s6084_s16 }
 0x3bf   : > { %s8234_s16 = smov %s6144_s22  ;;  %s8235_s17 = smov %s6133_s19 }
 0x3c0   :  { %13 = sbr.rel (!%p11_p10) target bundleno = 2 (0x2), region = 117 }

</bundles_post_ra>
